<compile_context>
chip_gen: v7x
topology: tpu7x:2x2x1
jax: 0.10.0
libtpu: 0.0.40
codegen_flags: <defaults>
</compile_context>

<pallas_src>
import jax
import jax.numpy as jnp
from jax.experimental import pallas as pl
from jax.experimental.pallas import tpu as pltpu

BN_EPS = 1e-5


def _epilogue_dtype():
    """bf16 epilogue on bf16-native VPU/EUP chips (v6e/v7x); f32 otherwise."""
    try:
        kind = jax.devices()[0].device_kind.lower()
    except Exception:
        return jnp.float32
    for old in ("v2", "v3", "v4", "v5"):
        if old in kind:
            return jnp.float32
    return jnp.bfloat16


# ------------------------------- the kernel ----------------------------------
def _make_kernel(k, stride, Ho, Wo, Cin, act, eg_dtype):
    M = Ho * Wo

    def kernel(x_ref, w_ref, scale_ref, bias_ref, o_ref):
        # x_ref: (1, Hp, Wp, Cin) bf16 (padded input for one batch element)
        # w_ref: (k, Cout, k*Cin) bf16 (one (Cout, k*Cin) slab per dy)
        acc = None
        for dy in range(k):
            taps = []
            for dx in range(k):
                if stride == 1:
                    win = x_ref[0, dy:dy + Ho, dx:dx + Wo, :]          # (Ho, Wo, Cin)
                else:
                    win = x_ref[0, pl.ds(dy, Ho, stride),
                                pl.ds(dx, Wo, stride), :]              # strided read
                taps.append(win.reshape(M, Cin))
            col = taps[0] if len(taps) == 1 else jnp.concatenate(taps, axis=-1)
            # (Cout, k*Cin) x (M, k*Cin)^T -> (Cout, M), f32 accumulation.
            part = jax.lax.dot_general(
                w_ref[dy], col,
                dimension_numbers=(((1,), (1,)), ((), ())),
                preferred_element_type=jnp.float32)
            acc = part if acc is None else acc + part

        # Folded eval-mode BatchNorm (f32, lane-dense (Cout, M)).
        yt = acc * scale_ref[...] + bias_ref[...]

        if act:
            # Stable SiLU with a single reciprocal on the EUP slot.
            y = yt.astype(eg_dtype)
            z = jnp.exp(-jnp.abs(y))                     # exp of non-positive args
            num = jnp.where(y >= 0, jnp.ones_like(z), z)
            inv = pl.reciprocal(1.0 + z.astype(jnp.float32), approx=True)
            yt = y * num * inv.astype(eg_dtype)

        o_ref[0] = yt.astype(o_ref.dtype)

    return kernel


# ------------------------------ host wrapper ---------------------------------
def conv_bn_silu(x_nchw, w_oihw, bn, *, stride=1, padding=None, groups=1,
                 act=True, eps=BN_EPS, out_dtype=jnp.bfloat16):
    """Fused forward of `Conv`: SiLU(BN(Conv2d(x, w, stride, autopad, bias=False))).

    Output is (N, Cout, Ho, Wo) in `out_dtype` (bf16 by default: halves the
    kernel's HBM writeback; cast at the call site if f32 is required).
    """
    if groups != 1:
        # TODO(synk): grouped convolution (g > 1) is not implemented.
        raise NotImplementedError("groups > 1 not supported")
    # TODO(synk): only SiLU (act truthy) / identity (act falsy) are supported,
    # not arbitrary nn.Module activations.

    N, Cin, H, W = x_nchw.shape
    Cout, Cin_w, kh, kw = w_oihw.shape
    assert Cin_w == Cin and kh == kw, "square, non-grouped kernels only"
    k = int(kh)
    p = k // 2 if padding is None else padding            # autopad
    Ho = (H + 2 * p - k) // stride + 1
    Wo = (W + 2 * p - k) // stride + 1
    M = Ho * Wo
    # NOTE: the (Cout, M) result is stored lane-dense when M % 128 == 0 (true
    # for the shapes exercised here); other shapes are still correct but use
    # masked stores.  TODO(synk): pad M up to a multiple of 128 for 7x7/14x14
    # feature maps, and add an output-row grid axis for very large Ho*Wo.

    # NCHW -> NHWC in bf16 (cast BEFORE pad halves the pad's HBM bytes), then a
    # single spatial zero-pad on the host.
    # TODO(synk): in a multi-layer pipeline keep activations NHWC-bf16 between
    # Conv blocks so this per-layer transpose disappears; for small Cin, a
    # channels-folded (Hp, Wp*Cin) layout would also recover lane occupancy.
    x = jnp.transpose(x_nchw.astype(jnp.bfloat16), (0, 2, 3, 1))
    xp = jnp.pad(x, ((0, 0), (p, p), (p, p), (0, 0)))
    Hp, Wp = H + 2 * p, W + 2 * p

    # Weights OIHW -> (k, Cout, k*Cin): one (Cout, k*Cin) slab per dy, each
    # ordered (dx, cin) to match the per-dy im2col concatenation.
    w_dy = jnp.transpose(w_oihw, (2, 0, 3, 1)).reshape(k, Cout, k * Cin)
    w_dy = w_dy.astype(jnp.bfloat16)

    # Eval-mode BatchNorm folded into per-channel scale / bias, shape (Cout, 1).
    scale = (bn["gamma"] / jnp.sqrt(bn["var"] + eps)).astype(jnp.float32)
    bias = (bn["beta"] - bn["mean"] * scale).astype(jnp.float32)
    scale = scale.reshape(Cout, 1)
    bias = bias.reshape(Cout, 1)

    eg_dtype = _epilogue_dtype()
    kernel = _make_kernel(k, stride, Ho, Wo, Cin, bool(act), eg_dtype)

    # Rough VMEM budget (double-buffered input/output blocks + weights +
    # per-dy im2col + f32 accumulator), with headroom; capped at v7x's 64 MiB.
    def _rup(a, b):
        return -(-a // b) * b
    in_blk = Hp * _rup(Wp, 16) * _rup(Cin, 128) * 2
    col_b = _rup(M, 16) * _rup(k * Cin, 128) * 2
    acc_b = _rup(Cout, 8) * _rup(M, 128) * 4
    out_blk = _rup(Cout, 16) * _rup(M, 128) * jnp.dtype(out_dtype).itemsize
    w_b = k * _rup(Cout, 16) * _rup(k * Cin, 128) * 2
    est = 2 * in_blk + 2 * out_blk + 2 * w_b + col_b + 4 * acc_b
    vmem_limit = int(min(64 * 2 ** 20, max(32 * 2 ** 20, 2 * est)))

    K = k * k * Cin
    cost = pl.CostEstimate(
        flops=2 * N * M * K * Cout,
        transcendentals=(N * Cout * M) if act else 0,
        bytes_accessed=int(xp.size * 2 + w_dy.size * 2
                           + (scale.size + bias.size) * 4
                           + N * Cout * M * jnp.dtype(out_dtype).itemsize))

    yt = pl.pallas_call(
        kernel,
        grid=(N,),
        in_specs=[
            pl.BlockSpec((1, Hp, Wp, Cin), lambda b: (b, 0, 0, 0)),
            # Weights / BN params have constant index maps -> fetched once.
            # TODO(synk): on v7x, pipeline_mode=pl.Buffered(1) on these three
            # specs would drop their second (unused) VMEM buffer; deferred to
            # keep lowering portable across jax versions.
            pl.BlockSpec((k, Cout, k * Cin), lambda b: (0, 0, 0)),
            pl.BlockSpec((Cout, 1), lambda b: (0, 0)),
            pl.BlockSpec((Cout, 1), lambda b: (0, 0)),
        ],
        out_specs=pl.BlockSpec((1, Cout, M), lambda b: (b, 0, 0)),
        out_shape=jax.ShapeDtypeStruct((N, Cout, M), out_dtype),
        compiler_params=pltpu.CompilerParams(
            dimension_semantics=("parallel",),
            vmem_limit_bytes=vmem_limit),
        cost_estimate=cost,
    )(xp, w_dy, scale, bias)

    # (N, Cout, Ho*Wo) -> (N, Cout, Ho, Wo): pure reshape, no transpose pass.
    return yt.reshape(N, Cout, Ho, Wo)


# -------------- pure-JAX reference (bf16 matmul, f32 epilogue) ----------------
def reference_forward(x_nchw, w_oihw, bn, *, stride=1, padding=None, act=True,
                      eps=BN_EPS):
    k = w_oihw.shape[-1]
    p = k // 2 if padding is None else padding
    y = jax.lax.conv_general_dilated(
        x_nchw.astype(jnp.bfloat16), w_oihw.astype(jnp.bfloat16),
        window_strides=(stride, stride),
        padding=[(p, p), (p, p)],
        dimension_numbers=("NCHW", "OIHW", "NCHW"),
        preferred_element_type=jnp.float32)
    scale = bn["gamma"] / jnp.sqrt(bn["var"] + eps)
    bias = bn["beta"] - bn["mean"] * scale
    y = y * scale[None, :, None, None] + bias[None, :, None, None]
    if act:
        y = y * jax.nn.sigmoid(y)
    return y


# ----------------------------------- main -------------------------------------
if __name__ == "__main__":
    key = jax.random.PRNGKey(0)
    kx, kw3, kw1, kb1, kb2 = jax.random.split(key, 5)

    N, Cin, H, W = 2, 16, 16, 16
    Cout = 32

    x = jax.random.normal(kx, (N, Cin, H, W), jnp.float32)

    def make_bn(kk, c):
        k1, k2, k3, k4 = jax.random.split(kk, 4)
        return {
            "gamma": 1.0 + 0.1 * jax.random.normal(k1, (c,), jnp.float32),
            "beta": 0.1 * jax.random.normal(k2, (c,), jnp.float32),
            "mean": 0.1 * jax.random.normal(k3, (c,), jnp.float32),
            "var": 0.5 + jax.random.uniform(k4, (c,), jnp.float32),
        }

    def check(y, y_ref, name):
        y32 = y.astype(jnp.float32)
        r32 = y_ref.astype(jnp.float32)
        err = jnp.abs(y32 - r32)
        tol = 3e-2 + 3e-2 * jnp.abs(r32)   # covers bf16 epilogue + bf16 store
        ok = bool(jnp.all(err <= tol))
        assert ok, f"{name}: max abs err {float(jnp.max(err))}"

    # --- Conv(c1=16, c2=32, k=3, s=1): 3x3 conv, autopad=1, BN, SiLU ---
    w3 = jax.random.normal(kw3, (Cout, Cin, 3, 3), jnp.float32) / jnp.sqrt(9.0 * Cin)
    bn3 = make_bn(kb1, Cout)
    y3 = jax.block_until_ready(conv_bn_silu(x, w3, bn3, stride=1))
    y3_ref = jax.block_until_ready(reference_forward(x, w3, bn3, stride=1))
    assert y3.shape == y3_ref.shape == (N, Cout, H, W)
    check(y3, y3_ref, "k=3")

    # --- Conv(c1=16, c2=32, k=1, s=1): the module defaults (1x1 conv) ---
    w1 = jax.random.normal(kw1, (Cout, Cin, 1, 1), jnp.float32) / jnp.sqrt(float(Cin))
    bn1 = make_bn(kb2, Cout)
    y1 = jax.block_until_ready(conv_bn_silu(x, w1, bn1, stride=1))
    y1_ref = jax.block_until_ready(reference_forward(x, w1, bn1, stride=1))
    assert y1.shape == y1_ref.shape == (N, Cout, H, W)
    check(y1, y1_ref, "k=1")

    print("KERNEL_OK")
</pallas_src>

<mosaic_0001>
module attributes {stable_mosaic.version = 11 : i64} {
  func.func @kernel(%arg0: i32, %arg1: memref<1x18x18x16xbf16, #tpu.memory_space<vmem>>, %arg2: memref<3x32x48xbf16, #tpu.memory_space<vmem>>, %arg3: memref<32x1xf32, #tpu.memory_space<vmem>>, %arg4: memref<32x1xf32, #tpu.memory_space<vmem>>, %arg5: memref<1x32x256xbf16, #tpu.memory_space<vmem>>) attributes {dimension_semantics = [#tpu.dimension_semantics<parallel>], iteration_bounds = array<i64: 2>, scalar_prefetch = 0 : i64, scratch_operands = 0 : i64, tpu.core_type = #tpu.core_type<tc>, window_params = [{transform_indices = @transform_0, window_bounds = array<i64: 1, 18, 18, 16>}, {pipeline_mode = #tpu.pipeline_mode<synchronous>, transform_indices = @transform_1, window_bounds = array<i64: 3, 32, 48>}, {pipeline_mode = #tpu.pipeline_mode<synchronous>, transform_indices = @transform_2, window_bounds = array<i64: 32, 1>}, {pipeline_mode = #tpu.pipeline_mode<synchronous>, transform_indices = @transform_3, window_bounds = array<i64: 32, 1>}, {transform_indices = @transform_4, window_bounds = array<i64: 1, 32, 256>}]} {
    %c0 = arith.constant 0 : index
    %c0_0 = arith.constant 0 : index
    %c0_1 = arith.constant 0 : index
    %c0_2 = arith.constant 0 : index
    %0 = vector.load %arg1[%c0, %c0_0, %c0_1, %c0_2] : memref<1x18x18x16xbf16, #tpu.memory_space<vmem>>, vector<1x16x16x16xbf16>
    %1 = vector.shape_cast %0 : vector<1x16x16x16xbf16> to vector<16x16x16xbf16>
    %2 = vector.shape_cast %1 : vector<16x16x16xbf16> to vector<256x16xbf16>
    %c0_3 = arith.constant 0 : index
    %c0_4 = arith.constant 0 : index
    %c1 = arith.constant 1 : index
    %c0_5 = arith.constant 0 : index
    %3 = vector.load %arg1[%c0_3, %c0_4, %c1, %c0_5] : memref<1x18x18x16xbf16, #tpu.memory_space<vmem>>, vector<1x16x16x16xbf16>
    %4 = vector.shape_cast %3 : vector<1x16x16x16xbf16> to vector<16x16x16xbf16>
    %5 = vector.shape_cast %4 : vector<16x16x16xbf16> to vector<256x16xbf16>
    %c0_6 = arith.constant 0 : index
    %c0_7 = arith.constant 0 : index
    %c2 = arith.constant 2 : index
    %c0_8 = arith.constant 0 : index
    %6 = vector.load %arg1[%c0_6, %c0_7, %c2, %c0_8] : memref<1x18x18x16xbf16, #tpu.memory_space<vmem>>, vector<1x16x16x16xbf16>
    %7 = vector.shape_cast %6 : vector<1x16x16x16xbf16> to vector<16x16x16xbf16>
    %8 = vector.shape_cast %7 : vector<16x16x16xbf16> to vector<256x16xbf16>
    %9 = tpu.concatenate %2, %5, %8 in 1 : vector<256x16xbf16>, vector<256x16xbf16>, vector<256x16xbf16> -> vector<256x48xbf16>
    %c0_9 = arith.constant 0 : index
    %c0_10 = arith.constant 0 : index
    %c0_11 = arith.constant 0 : index
    %10 = vector.load %arg2[%c0_9, %c0_10, %c0_11] : memref<3x32x48xbf16, #tpu.memory_space<vmem>>, vector<1x32x48xbf16>
    %11 = vector.shape_cast %10 : vector<1x32x48xbf16> to vector<32x48xbf16>
    %cst = arith.constant dense<0.000000e+00> : vector<32x256xf32>
    %12 = tpu.matmul %11, %9, %cst {dimension_numbers = #tpu.dot_dimension_numbers<[1], [1], [0], [0], [0, 0, 1, 0], [], []>} : vector<32x48xbf16>, vector<256x48xbf16>, vector<32x256xf32> -> vector<32x256xf32>
    %c0_12 = arith.constant 0 : index
    %c1_13 = arith.constant 1 : index
    %c0_14 = arith.constant 0 : index
    %c0_15 = arith.constant 0 : index
    %13 = vector.load %arg1[%c0_12, %c1_13, %c0_14, %c0_15] : memref<1x18x18x16xbf16, #tpu.memory_space<vmem>>, vector<1x16x16x16xbf16>
    %14 = vector.shape_cast %13 : vector<1x16x16x16xbf16> to vector<16x16x16xbf16>
    %15 = vector.shape_cast %14 : vector<16x16x16xbf16> to vector<256x16xbf16>
    %c0_16 = arith.constant 0 : index
    %c1_17 = arith.constant 1 : index
    %c1_18 = arith.constant 1 : index
    %c0_19 = arith.constant 0 : index
    %16 = vector.load %arg1[%c0_16, %c1_17, %c1_18, %c0_19] : memref<1x18x18x16xbf16, #tpu.memory_space<vmem>>, vector<1x16x16x16xbf16>
    %17 = vector.shape_cast %16 : vector<1x16x16x16xbf16> to vector<16x16x16xbf16>
    %18 = vector.shape_cast %17 : vector<16x16x16xbf16> to vector<256x16xbf16>
    %c0_20 = arith.constant 0 : index
    %c1_21 = arith.constant 1 : index
    %c2_22 = arith.constant 2 : index
    %c0_23 = arith.constant 0 : index
    %19 = vector.load %arg1[%c0_20, %c1_21, %c2_22, %c0_23] : memref<1x18x18x16xbf16, #tpu.memory_space<vmem>>, vector<1x16x16x16xbf16>
    %20 = vector.shape_cast %19 : vector<1x16x16x16xbf16> to vector<16x16x16xbf16>
    %21 = vector.shape_cast %20 : vector<16x16x16xbf16> to vector<256x16xbf16>
    %22 = tpu.concatenate %15, %18, %21 in 1 : vector<256x16xbf16>, vector<256x16xbf16>, vector<256x16xbf16> -> vector<256x48xbf16>
    %c1_24 = arith.constant 1 : index
    %c0_25 = arith.constant 0 : index
    %c0_26 = arith.constant 0 : index
    %23 = vector.load %arg2[%c1_24, %c0_25, %c0_26] : memref<3x32x48xbf16, #tpu.memory_space<vmem>>, vector<1x32x48xbf16>
    %24 = vector.shape_cast %23 : vector<1x32x48xbf16> to vector<32x48xbf16>
    %cst_27 = arith.constant dense<0.000000e+00> : vector<32x256xf32>
    %25 = tpu.matmul %24, %22, %cst_27 {dimension_numbers = #tpu.dot_dimension_numbers<[1], [1], [0], [0], [0, 0, 1, 0], [], []>} : vector<32x48xbf16>, vector<256x48xbf16>, vector<32x256xf32> -> vector<32x256xf32>
    %26 = arith.addf %12, %25 : vector<32x256xf32>
    %c0_28 = arith.constant 0 : index
    %c2_29 = arith.constant 2 : index
    %c0_30 = arith.constant 0 : index
    %c0_31 = arith.constant 0 : index
    %27 = vector.load %arg1[%c0_28, %c2_29, %c0_30, %c0_31] : memref<1x18x18x16xbf16, #tpu.memory_space<vmem>>, vector<1x16x16x16xbf16>
    %28 = vector.shape_cast %27 : vector<1x16x16x16xbf16> to vector<16x16x16xbf16>
    %29 = vector.shape_cast %28 : vector<16x16x16xbf16> to vector<256x16xbf16>
    %c0_32 = arith.constant 0 : index
    %c2_33 = arith.constant 2 : index
    %c1_34 = arith.constant 1 : index
    %c0_35 = arith.constant 0 : index
    %30 = vector.load %arg1[%c0_32, %c2_33, %c1_34, %c0_35] : memref<1x18x18x16xbf16, #tpu.memory_space<vmem>>, vector<1x16x16x16xbf16>
    %31 = vector.shape_cast %30 : vector<1x16x16x16xbf16> to vector<16x16x16xbf16>
    %32 = vector.shape_cast %31 : vector<16x16x16xbf16> to vector<256x16xbf16>
    %c0_36 = arith.constant 0 : index
    %c2_37 = arith.constant 2 : index
    %c2_38 = arith.constant 2 : index
    %c0_39 = arith.constant 0 : index
    %33 = vector.load %arg1[%c0_36, %c2_37, %c2_38, %c0_39] : memref<1x18x18x16xbf16, #tpu.memory_space<vmem>>, vector<1x16x16x16xbf16>
    %34 = vector.shape_cast %33 : vector<1x16x16x16xbf16> to vector<16x16x16xbf16>
    %35 = vector.shape_cast %34 : vector<16x16x16xbf16> to vector<256x16xbf16>
    %36 = tpu.concatenate %29, %32, %35 in 1 : vector<256x16xbf16>, vector<256x16xbf16>, vector<256x16xbf16> -> vector<256x48xbf16>
    %c2_40 = arith.constant 2 : index
    %c0_41 = arith.constant 0 : index
    %c0_42 = arith.constant 0 : index
    %37 = vector.load %arg2[%c2_40, %c0_41, %c0_42] : memref<3x32x48xbf16, #tpu.memory_space<vmem>>, vector<1x32x48xbf16>
    %38 = vector.shape_cast %37 : vector<1x32x48xbf16> to vector<32x48xbf16>
    %cst_43 = arith.constant dense<0.000000e+00> : vector<32x256xf32>
    %39 = tpu.matmul %38, %36, %cst_43 {dimension_numbers = #tpu.dot_dimension_numbers<[1], [1], [0], [0], [0, 0, 1, 0], [], []>} : vector<32x48xbf16>, vector<256x48xbf16>, vector<32x256xf32> -> vector<32x256xf32>
    %40 = arith.addf %26, %39 : vector<32x256xf32>
    %c0_44 = arith.constant 0 : index
    %c0_45 = arith.constant 0 : index
    %41 = vector.load %arg3[%c0_44, %c0_45] : memref<32x1xf32, #tpu.memory_space<vmem>>, vector<32x1xf32>
    %42 = vector.broadcast %41 : vector<32x1xf32> to vector<32x256xf32>
    %43 = arith.mulf %40, %42 : vector<32x256xf32>
    %c0_46 = arith.constant 0 : index
    %c0_47 = arith.constant 0 : index
    %44 = vector.load %arg4[%c0_46, %c0_47] : memref<32x1xf32, #tpu.memory_space<vmem>>, vector<32x1xf32>
    %45 = vector.broadcast %44 : vector<32x1xf32> to vector<32x256xf32>
    %46 = arith.addf %43, %45 : vector<32x256xf32>
    %47 = arith.truncf %46 : vector<32x256xf32> to vector<32x256xbf16>
    %48 = math.absf %47 : vector<32x256xbf16>
    %cst_48 = arith.constant 0.000000e+00 : bf16
    %49 = vector.broadcast %cst_48 : bf16 to vector<32x256xbf16>
    %50 = arith.subf %49, %48 : vector<32x256xbf16>
    %51 = math.exp %50 : vector<32x256xbf16>
    %cst_49 = arith.constant 0.000000e+00 : bf16
    %52 = vector.broadcast %cst_49 : bf16 to vector<32x256xbf16>
    %53 = arith.cmpf oge, %47, %52 : vector<32x256xbf16>
    %cst_50 = arith.constant 1.000000e+00 : bf16
    %54 = vector.broadcast %cst_50 : bf16 to vector<32x256xbf16>
    %55 = arith.select %53, %54, %51 : vector<32x256xi1>, vector<32x256xbf16>
    %56 = arith.extf %51 : vector<32x256xbf16> to vector<32x256xf32>
    %cst_51 = arith.constant 1.000000e+00 : f32
    %57 = vector.broadcast %cst_51 : f32 to vector<32x256xf32>
    %58 = arith.addf %57, %56 : vector<32x256xf32>
    %59 = tpu.reciprocal %58 {approx = true} : vector<32x256xf32> -> vector<32x256xf32>
    %60 = arith.mulf %47, %55 : vector<32x256xbf16>
    %61 = arith.truncf %59 : vector<32x256xf32> to vector<32x256xbf16>
    %62 = arith.mulf %60, %61 : vector<32x256xbf16>
    %c0_52 = arith.constant 0 : index
    %c0_53 = arith.constant 0 : index
    %c0_54 = arith.constant 0 : index
    %63 = vector.load %arg5[%c0_52, %c0_53, %c0_54] : memref<1x32x256xbf16, #tpu.memory_space<vmem>>, vector<1x32x256xbf16>
    %64 = vector.shape_cast %63 : vector<1x32x256xbf16> to vector<32x256xbf16>
    %65 = vector.shape_cast %62 : vector<32x256xbf16> to vector<1x32x256xbf16>
    tpu.vector_store %arg5[%c0_52, %c0_53, %c0_54], %65 {strides = array<i32>} : memref<1x32x256xbf16, #tpu.memory_space<vmem>>, vector<1x32x256xbf16>,
    return
  }
  func.func @transform_0(%arg0: i32) -> (i32, i32, i32, i32) {
    %c0_i32 = arith.constant 0 : i32
    %c0_i32_0 = arith.constant 0 : i32
    %c0_i32_1 = arith.constant 0 : i32
    %c0_i32_2 = arith.constant 0 : i32
    return %arg0, %c0_i32, %c0_i32_0, %c0_i32_1 : i32, i32, i32, i32
  }
  func.func @transform_1(%arg0: i32) -> (i32, i32, i32) {
    %c0_i32 = arith.constant 0 : i32
    %c0_i32_0 = arith.constant 0 : i32
    %c0_i32_1 = arith.constant 0 : i32
    %c0_i32_2 = arith.constant 0 : i32
    return %c0_i32, %c0_i32_0, %c0_i32_1 : i32, i32, i32
  }
  func.func @transform_2(%arg0: i32) -> (i32, i32) {
    %c0_i32 = arith.constant 0 : i32
    %c0_i32_0 = arith.constant 0 : i32
    %c0_i32_1 = arith.constant 0 : i32
    return %c0_i32, %c0_i32_0 : i32, i32
  }
  func.func @transform_3(%arg0: i32) -> (i32, i32) {
    %c0_i32 = arith.constant 0 : i32
    %c0_i32_0 = arith.constant 0 : i32
    %c0_i32_1 = arith.constant 0 : i32
    return %c0_i32, %c0_i32_0 : i32, i32
  }
  func.func @transform_4(%arg0: i32) -> (i32, i32, i32) {
    %c0_i32 = arith.constant 0 : i32
    %c0_i32_0 = arith.constant 0 : i32
    %c0_i32_1 = arith.constant 0 : i32
    return %arg0, %c0_i32, %c0_i32_0 : i32, i32, i32
  }
}

</mosaic_0001>

<bundles_post_ra>
// kernel: tpu_custom_call.1
= control target key start
LH: loop header
LB: loop body
LE: loop exit
PB: predicated region body
PF: predicated region fallthrough
CT: control target
= control target key end

     0   :  { %9 = vsyncpa [#allocation3], 0  ;;  %s6100_s0 = inlined_call_operand.vmem [shape: bf16[2,18,18,16], index: 0, kind: input, shape index: {}]   ;;  %s6101_s1 = inlined_call_operand.vmem [shape: bf16[3,32,48], index: 1, kind: input, shape index: {}]   ;;  %s6102_s2 = inlined_call_operand.vmem [shape: f32[32,1], index: 2, kind: input, shape index: {}]   ;;  %s6103_s3 = inlined_call_operand.vmem [shape: f32[32,1], index: 3, kind: input, shape index: {}]   ;;  %s6104_s4 = inlined_call_operand.hbm [shape: bf16[2,32,256], index: 4, kind: output, shape index: {}]  }
   0x1   :  { %11 = vsyncpa [#allocation3 + $0x1], 0  ;;  %s4283_s15 = smov 0   ;;  %s4285_s16 = smov 0  }
   0x2   :  { %s4287_s17 = smov 0   ;;  %s4289_s18 = smov 0  }
   0x3 LB: > { %s4304_s19 = sadd.s32 4294967295, %s4250_s18   ;;  %s3502_s20 = sadd.s32 4294967294, %s4250_s18   ;;  %s4250_s18 = sphi %s4289_s18, %s6123_s18   ;;  %s4246_s17 = sphi %s4287_s17, %s6122_s17   ;;  %s4242_s16 = sphi %s4285_s16, %s6121_s16   ;;  %s4238_s15 = sphi %s4283_s15, %s6120_s15  }
   0x4   : > { %s4308_s21 = sadd.s32 1, %s4250_s18   ;;  %s113_s22 = sadd.s32 1, %s4246_s17 }
   0x5   : > { %s110_s23 = ssub.s32 %s4250_s18, %s4308_s21  ;;  %p123_p0 = scmp.ne.s32.totalorder %s4246_s17, %s4242_s16 }
   0x6   : > { %p111_p1 = scmp.eq.s32.totalorder %s110_s23, 0  ;;  %p124_p2 = scmp.eq.s32.totalorder %s4304_s19, 1 }
   0x7   : > { %p129_p3 = scmp.ne.s32.totalorder %s4242_s16, %s4238_s15  ;;  %p130_p4 = scmp.eq.s32.totalorder %s3502_s20, 1 }
   0x8   : > { %s4319_s24 = scalar_select %p111_p1, %s4246_s17, %s113_s22  }
   0x9   : > { %p4321_p5 = por %p124_p2, %p123_p0  ;;  %p4325_p6 = por %p130_p4, %p129_p3 }
   0xa   : > { %p3505_p7 = scmp.ge.s32.totalorder %s4250_s18, 1  ;;  %p165_p8 = scmp.lt.s32.totalorder %s4250_s18, 3 }
   0xc   : > { %p166_p9 = pnand %p3505_p7, %p165_p8 }
   0xe   : > { %169 = sbr.rel (%p166_p9) target bundleno = 748 (0x2ec), region = 36 }
  0x15   : > { %p191_p10 = scmp.lt.s32.totalorder %s4304_s19, 1  ;;  %vm697_vm0 = vcmask 1042432   ;;  %vm698_vm1 = vcmask 1046532   ;;  %vm246_vm3 = vsmask.f32 3328  ;;  %s4252_s6 = smov 32  }
  0x16   : > { %vm4338_vm2 = vmor %vm697_vm0, %vm698_vm1  ;;  %vm247_vm4 = vsmask.f32 7440  ;;  %s4253_s7 = smov 16   ;;  %vm1036_vm6 = vcmask 130048   ;;  %vm1085_vm7 = vcmask 261120   ;;  %vm2050_vm8 = vcmask 392192  }
  0x17   : > { %s192_s27 = scalar_select %p191_p10, %s4304_s19, 1  ;;  %vm4396_vm5 = vmor %vm246_vm3, %vm247_vm4 }
  0x18   : > { %s3857_s9 = sshll.u32 %s4304_s19, 9  ;;  %s4255_s22 = smov [#allocation2]  }
  0x19   : > { %s3982_s28 = smul.u32 216, %s192_s27  ;;  %s6053_s14 = scalar_lea.hbm %s6104_s4, %s3857_s9 }
  0x1a   : > { %s4192_s23 = sshll.u32 %s4255_s22, 4  ;;  %s4193_s23 = int_to_ptr.vmem [resolvable:$false] %s4192_s23 }
  0x1b   : > { %s4336_s5 = scalar_lea.vmem %s6100_s0, %s3982_s28  ;;  %s4194_s27 = scalar_lea.vmem %s4193_s23, 1024 }
  0x1c   : > { %v4343_v1 = vld [vmem:[%s4336_s5 + $0x64] sm:$0xf]  ;;  %v4346_v2 = vld [vmem:[%s4336_s5 + $0x68] sm:$0x1]  ;;  %v641_v3 = vld [vmem:[%s4336_s5 + $0x60] sm:$0xe] }
  0x1d   : > { %v461_v4 = vshll.u32 %v4346_v2, 16  ;;  %v3516_v5 = vrot.slane %v641_v3, 9  ;;  %v758_v6 = vrot.slane %v4343_v1, 5  ;;  %v761_v7 = vrot.slane %v4346_v2, 5  ;;  %v4353_v8 = vld [vmem:[%s4336_s5 + $0x4] sm:$0xf] }
  0x1e   : > { %v230_v9 = vld [vmem:[%s4336_s5 + $0x8] sm:$0x1]  ;;  %v633_v10 = vld [vmem:[%s4336_s5] sm:$0xe]  ;;  %v702_v11 = vrot.slane %v4353_v8, 5  ;;  %v259_v12 = vshll.u32 %v4353_v8, 16 }
  0x1f   : > { %v759_v13 = vsel %vm4338_vm2, %v3516_v5, %v758_v6  ;;  %v760_v14 = vrot.slane %v758_v6, 4  ;;  %v269_v15 = vshll.u32 %v230_v9, 16  ;;  %v3508_v16 = vrot.slane %v633_v10, 9  ;;  %v4362_v17 = vld [vmem:[%s4336_s5 + $0x70] sm:$0xf] }
  0x20   : > { %v704_v18 = vrot.slane %v702_v11, 4  ;;  %v705_v19 = vrot.slane %v230_v9, 5  ;;  %v4365_v20 = vld [vmem:[%s4336_s5 + $0x74] sm:$0x1]  ;;  %v3628_v21 = vld [vmem:[%s4336_s5 + $0x6c] sm:$0xe] }
  0x21   : > { %v762_v22 = vsel %vm4338_vm2, %v760_v14, %v761_v7  ;;  %v703_v23 = vsel %vm4338_vm2, %v3508_v16, %v702_v11  ;;  %v3644_v24 = vrot.slane %v3628_v21, 9  ;;  %v1677_v25 = vrot.slane %v4362_v17, 5  ;;  %v3573_v26 = vld [vmem:[%s4336_s5 + $0x10] sm:$0xf]  ;;  %v3604_v27 = vld [vmem:[%s4336_s5 + $0x14] sm:$0x1] }
  0x22   : > { %v3564_v28 = vcombine.low %v759_v13, %v762_v22  ;;  %v706_v29 = vsel %vm4338_vm2, %v704_v18, %v705_v19  ;;  %v1680_v30 = vrot.slane %v4365_v20, 5  ;;  %v3620_v31 = vld [vmem:[%s4336_s5 + $0xc] sm:$0xe]  ;;  %v1621_v32 = vrot.slane %v3573_v26, 5  ;;  %v198_v46 = vld [vmem:[%s4336_s5] sm:$0xf] }
  0x23   : > { %v3572_v33 = vld [vmem:[%s4336_s5 + $0xc] sm:$0xf]  ;;  %v3556_v34 = vcombine.low %v703_v23, %v706_v29  ;;  %v1678_v35 = vsel %vm4338_vm2, %v3644_v24, %v1677_v25  ;;  %v1679_v36 = vrot.slane %v1677_v25, 4  ;;  %v3636_v37 = vrot.slane %v3620_v31, 9  ;;  %v214_v21 = vld [vmem:[%s4336_s5 + $0x60] sm:$0xf] }
  0x24   : > { %1020 = vrot.lane.b32.xlu1 %v3564_v28, %s4252_s6  ;;  %v1623_v38 = vrot.slane %v1621_v32, 4  ;;  %v1624_v39 = vrot.slane %v3604_v27, 5  ;;  %v1172_v40 = vshrl.u32 %v3572_v33, 16  ;;  %v1175_v41 = vshll.u32 %v3572_v33, 16  ;;  %v3588_v55 = vld [vmem:[%s4336_s5 + $0x6c] sm:$0xf] }
  0x25   : > { %1004 = vrot.lane.b32.xlu0 %v3556_v34, %s4252_s6  ;;  %v1681_v42 = vsel %vm4338_vm2, %v1679_v36, %v1680_v30  ;;  %v1622_v43 = vsel %vm4338_vm2, %v3636_v37, %v1621_v32  ;;  %v1181_v44 = vshll.u32 %v3573_v26, 16  ;;  %v1185_v45 = vshrl.u32 %v3573_v26, 16 }
  0x26   : > { %v3692_v47 = vcombine.low %v1678_v35, %v1681_v42  ;;  %v1625_v48 = vsel %vm4338_vm2, %v1623_v38, %v1624_v39  ;;  %v1174_v49 = vrot.slane %v1172_v40, 4  ;;  %v1177_v50 = vrot.slane %v1175_v41, 5  ;;  %v216_v35 = vld [vmem:[%s4336_s5 + $0x6c] sm:$0xf]  ;;  %v4417_v39 = vld [vmem:[%s4336_s5 + $0x70] sm:$0xf] }
  0x27   : > { %v3684_v51 = vcombine.low %v1622_v43, %v1625_v48  ;;  %v1183_v52 = vrot.slane %v1181_v44, 5  ;;  %v1187_v53 = vrot.slane %v1185_v45, 4  ;;  %v1191_v54 = vshll.u32 %v3604_v27, 16 }
  0x28   : > { %1939 = vrot.lane.b32.xlu1 %v3692_v47, %s4252_s6  ;;  %v1178_v56 = vor.u32 %v1177_v50, %v1174_v49  ;;  %v250_v57 = vshrl.u32 %v198_v46, 16  ;;  %v253_v58 = vshll.u32 %v198_v46, 16  ;;  %v261_v59 = vrot.slane %v259_v12, 5  ;;  %v4425_v47 = vld [vmem:[%s4336_s5 + $0x74] sm:$0x1] }
  0x29   : > { %1923 = vrot.lane.b32.xlu0 %v3684_v51, %s4252_s6  ;;  %v1188_v61 = vor.u32 %v1187_v53, %v1183_v52  ;;  %v1193_v62 = vrot.slane %v1191_v54, 5  ;;  %v263_v63 = vshrl.u32 %v4353_v8, 16  ;;  %v271_v3 = vrot.slane %v269_v15, 5 }
  0x2a   : > { %v1179_v5 = vrot.slane %v1178_v56, 4  ;;  %v252_v6 = vrot.slane %v250_v57, 4  ;;  %v255_v7 = vrot.slane %v253_v58, 5  ;;  %v1364_v9 = vshrl.u32 %v3588_v55, 16 }
  0x2b   : > { %v1189_v10 = vrot.slane %v1188_v61, 4  ;;  %v265_v11 = vrot.slane %v263_v63, 4  ;;  %v1367_v12 = vshll.u32 %v3588_v55, 16  ;;  %v1373_v13 = vshll.u32 %v4362_v17, 16  ;;  %v4441_v63 = vld [vmem:[%s4336_s5 + $0x14] sm:$0x1] }
  0x2c   : > { %v1184_v14 = vsel %vm4396_vm5, %v1179_v5, %v1183_v52  ;;  %v256_v16 = vor.u32 %v255_v7, %v252_v6  ;;  %v1366_v18 = vrot.slane %v1364_v9, 4  ;;  %v1377_v19 = vshrl.u32 %v4362_v17, 16  ;;  %v200_v52 = vld [vmem:[%s4336_s5 + $0xc] sm:$0xf] }
  0x2d   : > { %v1194_v8 = vsel %vm4396_vm5, %v1189_v10, %v1193_v62  ;;  %v266_v15 = vor.u32 %v265_v11, %v261_v59  ;;  %v1369_v22 = vrot.slane %v1367_v12, 5  ;;  %v1375_v23 = vrot.slane %v1373_v13, 5 }
  0x2e   : > { %v3668_v24 = vcombine.low %v1184_v14, %v1194_v8  ;;  %v257_v25 = vrot.slane %v256_v16, 4  ;;  %v1379_v26 = vrot.slane %v1377_v19, 4  ;;  %v1383_v27 = vshll.u32 %v4365_v20, 16  ;;  %v3590_v16 = vld [vmem:[%s4336_s5 + $0x78] sm:$0xf] }
  0x2f   : > { %v267_v28 = vrot.slane %v266_v15, 4  ;;  %v1370_v29 = vor.u32 %v1369_v22, %v1366_v18  ;;  %v442_v30 = vshrl.u32 %v214_v21, 16  ;;  %v445_v31 = vshll.u32 %v214_v21, 16  ;;  %v4450_v15 = vld [vmem:[%s4336_s5 + $0x7c] sm:$0xf] }
  0x30   : > { %1843 = vrot.lane.b32.xlu1 %v3668_v24, %s4253_s7  ;;  %v262_v17 = vsel %vm4396_vm5, %v257_v25, %v261_v59  ;;  %v1380_v32 = vor.u32 %v1379_v26, %v1375_v23  ;;  %v1385_v33 = vrot.slane %v1383_v27, 5  ;;  %v451_v34 = vshll.u32 %v4343_v1, 16 }
  0x31   : > { %v272_v20 = vsel %vm4396_vm5, %v267_v28, %v271_v3  ;;  %v1371_v36 = vrot.slane %v1370_v29, 4  ;;  %v444_v37 = vrot.slane %v442_v30, 4  ;;  %v447_v38 = vrot.slane %v445_v31, 5  ;;  %v4455_v28 = vld [vmem:[%s4336_s5 + $0x80] sm:$0x1] }
  0x32   : > { %v3540_v40 = vcombine.low %v262_v17, %v272_v20  ;;  %v1381_v41 = vrot.slane %v1380_v32, 4  ;;  %v453_v42 = vrot.slane %v451_v34, 5  ;;  %v455_v43 = vshrl.u32 %v4343_v1, 16  ;;  %v3574_v34 = vld [vmem:[%s4336_s5 + $0x18] sm:$0xf] }
  0x33   : > { %v1376_v44 = vsel %vm4396_vm5, %v1371_v36, %v1375_v23  ;;  %v448_v45 = vor.u32 %v447_v38, %v444_v37  ;;  %v463_v46 = vrot.slane %v461_v4, 5  ;;  %v466_v48 = vshrl.u32 %v216_v35, 16  ;;  %v4434_v4 = vld [vmem:[%s4336_s5 + $0x10] sm:$0xf]  ;;  %v4464_v38 = vld [vmem:[%s4336_s5 + $0x1c] sm:$0xf] }
  0x34   : > { %924 = vrot.lane.b32.xlu0 %v3540_v40, %s4253_s7  ;;  %v1386_v49 = vsel %vm4396_vm5, %v1381_v41, %v1385_v33  ;;  %v457_v50 = vrot.slane %v455_v43, 4  ;;  %v469_v51 = vshll.u32 %v216_v35, 16  ;;  %v475_v1 = vshll.u32 %v4417_v39, 16 }
  0x35   : > { %v3676_v53 = vcombine.low %v1376_v44, %v1386_v49  ;;  %v449_v54 = vrot.slane %v448_v45, 4  ;;  %v468_v55 = vrot.slane %v466_v48, 4  ;;  %v479_v2 = vshrl.u32 %v4417_v39, 16 }
  0x36   : > { %v458_v56 = vor.u32 %v457_v50, %v453_v42  ;;  %v471_v57 = vrot.slane %v469_v51, 5  ;;  %v477_v58 = vrot.slane %v475_v1, 5  ;;  %v485_v59 = vshll.u32 %v4425_v47, 16 }
  0x37   : > { %1859 = vrot.lane.b32.xlu1 %v3676_v53, %s4253_s7  ;;  %v454_v61 = vsel %vm4396_vm5, %v449_v54, %v453_v42  ;;  %v481_v62 = vrot.slane %v479_v2, 4  ;;  %v274_v3 = vshrl.u32 %v200_v52, 16  ;;  %v277_v5 = vshll.u32 %v200_v52, 16  ;;  %v642_v53 = vld [vmem:[%s4336_s5 + $0x6c] sm:$0xe] }
  0x38   : > { %v459_v6 = vrot.slane %v458_v56, 4  ;;  %v472_v7 = vor.u32 %v471_v57, %v468_v55  ;;  %v487_v9 = vrot.slane %v485_v59, 5  ;;  %v283_v10 = vshll.u32 %v4434_v4, 16 }
  0x39   : > { %v482_v11 = vor.u32 %v481_v62, %v477_v58  ;;  %v276_v12 = vrot.slane %v274_v3, 4  ;;  %v279_v13 = vrot.slane %v277_v5, 5  ;;  %v287_v14 = vshrl.u32 %v4434_v4, 16  ;;  %v634_v62 = vld [vmem:[%s4336_s5 + $0xc] sm:$0xe] }
  0x3a   : > { %v464_v18 = vsel %vm4396_vm5, %v459_v6, %v463_v46  ;;  %v473_v19 = vrot.slane %v472_v7, 4  ;;  %v285_v21 = vrot.slane %v283_v10, 5  ;;  %v293_v8 = vshll.u32 %v4441_v63, 16  ;;  %v4471_v46 = vld [vmem:[%s4336_s5 + $0x20] sm:$0x1] }
  0x3b   : > { %v3548_v22 = vcombine.low %v454_v61, %v464_v18  ;;  %v483_v23 = vrot.slane %v482_v11, 4  ;;  %v280_v24 = vor.u32 %v279_v13, %v276_v12  ;;  %v289_v25 = vrot.slane %v287_v14, 4  ;;  %v3629_v13 = vld [vmem:[%s4336_s5 + $0x78] sm:$0xe] }
  0x3c   : > { %v478_v26 = vsel %vm4396_vm5, %v473_v19, %v477_v58  ;;  %v295_v27 = vrot.slane %v293_v8, 5  ;;  %v1388_v29 = vshrl.u32 %v3590_v16, 16  ;;  %v1391_v30 = vshll.u32 %v3590_v16, 16 }
  0x3d   : > { %940 = vrot.lane.b32.xlu0 %v3548_v22, %s4253_s7  ;;  %v488_v31 = vsel %vm4396_vm5, %v483_v23, %v487_v9  ;;  %v281_v17 = vrot.slane %v280_v24, 4  ;;  %v290_v32 = vor.u32 %v289_v25, %v285_v21  ;;  %v1397_v33 = vshll.u32 %v4450_v15, 16 }
  0x3e   : > { %v3549_v35 = vcombine.low %v478_v26, %v488_v31  ;;  %v1390_v20 = vrot.slane %v1388_v29, 4  ;;  %v1393_v36 = vrot.slane %v1391_v30, 5  ;;  %v1401_v37 = vshrl.u32 %v4450_v15, 16  ;;  %v3621_v26 = vld [vmem:[%s4336_s5 + $0x18] sm:$0xe] }
  0x3f   : > { %v286_v40 = vsel %vm4396_vm5, %v281_v17, %v285_v21  ;;  %v291_v41 = vrot.slane %v290_v32, 4  ;;  %v1399_v42 = vrot.slane %v1397_v33, 5  ;;  %v1407_v43 = vshll.u32 %v4455_v28, 16  ;;  %v218_v31 = vld [vmem:[%s4336_s5 + $0x78] sm:$0xf] }
  0x40   : > { %942 = vrot.lane.b32.xlu1 %v3549_v35, %s4253_s7  ;;  %v1394_v44 = vor.u32 %v1393_v36, %v1390_v20  ;;  %v1403_v45 = vrot.slane %v1401_v37, 4  ;;  %v1196_v48 = vshrl.u32 %v3574_v34, 16  ;;  %v1199_v49 = vshll.u32 %v3574_v34, 16  ;;  %v4513_v37 = vld [vmem:[%s4336_s5 + $0x80] sm:$0x1] }
  0x41   : > { %v296_v50 = vsel %vm4396_vm5, %v291_v41, %v295_v27  ;;  %v1409_v51 = vrot.slane %v1407_v43, 5  ;;  %v1205_v1 = vshll.u32 %v4464_v38, 16  ;;  %v1209_v52 = vshrl.u32 %v4464_v38, 16 }
  0x42   : > { %v3541_v54 = vcombine.low %v286_v40, %v296_v50  ;;  %v1395_v55 = vrot.slane %v1394_v44, 4  ;;  %v1404_v2 = vor.u32 %v1403_v45, %v1399_v42  ;;  %v1198_v56 = vrot.slane %v1196_v48, 4  ;;  %v202_v44 = vld [vmem:[%s4336_s5 + $0x18] sm:$0xf]  ;;  %v4526_v48 = vld [vmem:[%s4336_s5 + $0x1c] sm:$0xf] }
  0x43   : > { %v1201_v57 = vrot.slane %v1199_v49, 5  ;;  %v1207_v58 = vrot.slane %v1205_v1, 5  ;;  %v1211_v59 = vrot.slane %v1209_v52, 4  ;;  %v1215_v61 = vshll.u32 %v4471_v46, 16 }
  0x44   : > { %926 = vrot.lane.b32.xlu0 %v3541_v54, %s4253_s7  ;;  %v1400_v3 = vsel %vm4396_vm5, %v1395_v55, %v1399_v42  ;;  %v1405_v5 = vrot.slane %v1404_v2, 4  ;;  %v3517_v6 = vrot.slane %v642_v53, 9  ;;  %v765_v7 = vrot.slane %v4417_v39, 5  ;;  %v4533_v55 = vld [vmem:[%s4336_s5 + $0x20] sm:$0x1] }
  0x45   : > { %v1202_v9 = vor.u32 %v1201_v57, %v1198_v56  ;;  %v1212_v10 = vor.u32 %v1211_v59, %v1207_v58  ;;  %v1217_v11 = vrot.slane %v1215_v61, 5  ;;  %v768_v12 = vrot.slane %v4425_v47, 5  ;;  %v3592_v61 = vld [vmem:[%s4336_s5 + $0x84] sm:$0xf] }
  0x46   : > { %v1410_v14 = vsel %vm4396_vm5, %v1405_v5, %v1409_v51  ;;  %v766_v16 = vsel %vm4338_vm2, %v3517_v6, %v765_v7  ;;  %v767_v18 = vrot.slane %v765_v7, 4  ;;  %v3509_v19 = vrot.slane %v634_v62, 9  ;;  %v4541_v7 = vld [vmem:[%s4336_s5 + $0x88] sm:$0xf] }
  0x47   : > { %v3677_v21 = vcombine.low %v1400_v3, %v1410_v14  ;;  %v1203_v8 = vrot.slane %v1202_v9, 4  ;;  %v1213_v39 = vrot.slane %v1212_v10, 4  ;;  %v709_v22 = vrot.slane %v4434_v4, 5 }
  0x48   : > { %v769_v23 = vsel %vm4338_vm2, %v767_v18, %v768_v12  ;;  %v712_v47 = vrot.slane %v4441_v63, 5  ;;  %v3645_v24 = vrot.slane %v3629_v13, 9  ;;  %v1684_v25 = vrot.slane %v4450_v15, 5  ;;  %v4505_v63 = vld [vmem:[%s4336_s5 + $0x7c] sm:$0xf] }
  0x49   : > { %1861 = vrot.lane.b32.xlu1 %v3677_v21, %s4253_s7  ;;  %v1208_v27 = vsel %vm4396_vm5, %v1203_v8, %v1207_v58  ;;  %v1218_v29 = vsel %vm4396_vm5, %v1213_v39, %v1217_v11  ;;  %v3565_v30 = vcombine.low %v766_v16, %v769_v23  ;;  %v710_v4 = vsel %vm4338_vm2, %v3509_v19, %v709_v22  ;;  %v4545_v16 = vld [vmem:[%s4336_s5 + $0x8c] sm:$0x1]  ;;  %v3576_v23 = vld [vmem:[%s4336_s5 + $0x24] sm:$0xf] }
  0x4a   : > { %v3669_v17 = vcombine.low %v1208_v27, %v1218_v29  ;;  %v711_v15 = vrot.slane %v709_v22, 4  ;;  %v1685_v32 = vsel %vm4338_vm2, %v3645_v24, %v1684_v25  ;;  %v1686_v33 = vrot.slane %v1684_v25, 4 }
  0x4b   : > { %v1687_v34 = vrot.slane %v4455_v28, 5  ;;  %v3637_v35 = vrot.slane %v3621_v26, 9  ;;  %v1628_v20 = vrot.slane %v4464_v38, 5  ;;  %v1631_v36 = vrot.slane %v4471_v46, 5 }
  0x4c   : > { %1845 = vrot.lane.b32.xlu0 %v3669_v17, %s4253_s7  ;;  %v713_v40 = vsel %vm4338_vm2, %v711_v15, %v712_v47  ;;  %v490_v41 = vshrl.u32 %v218_v31, 16  ;;  %v493_v42 = vshll.u32 %v218_v31, 16  ;;  %v499_v43 = vshll.u32 %v4505_v63, 16 }
  0x4d   : > { %1022 = vrot.lane.b32.xlu1 %v3565_v30, %s4252_s6  ;;  %v3557_v28 = vcombine.low %v710_v4, %v713_v40  ;;  %v1688_v38 = vsel %vm4338_vm2, %v1686_v33, %v1687_v34  ;;  %v1629_v45 = vsel %vm4338_vm2, %v3637_v35, %v1628_v20  ;;  %v1630_v46 = vrot.slane %v1628_v20, 4  ;;  %v4562_v40 = vld [vmem:[%s4336_s5 + $0x2c] sm:$0x1] }
  0x4e   : > { %v3693_v49 = vcombine.low %v1685_v32, %v1688_v38  ;;  %v492_v50 = vrot.slane %v490_v41, 4  ;;  %v495_v51 = vrot.slane %v493_v42, 5  ;;  %v501_v1 = vrot.slane %v499_v43, 5  ;;  %v4557_v32 = vld [vmem:[%s4336_s5 + $0x28] sm:$0xf] }
  0x4f   : > { %v1632_v52 = vsel %vm4338_vm2, %v1630_v46, %v1631_v36  ;;  %v503_v53 = vshrl.u32 %v4505_v63, 16  ;;  %v509_v54 = vshll.u32 %v4513_v37, 16  ;;  %v298_v2 = vshrl.u32 %v202_v44, 16  ;;  %v643_v41 = vld [vmem:[%s4336_s5 + $0x78] sm:$0xe] }
  0x50   : > { %1006 = vrot.lane.b32.xlu0 %v3557_v28, %s4252_s6  ;;  %v3685_v56 = vcombine.low %v1629_v45, %v1632_v52  ;;  %v496_v57 = vor.u32 %v495_v51, %v492_v50  ;;  %v301_v58 = vshll.u32 %v202_v44, 16  ;;  %v307_v59 = vshll.u32 %v4526_v48, 16  ;;  %v635_v50 = vld [vmem:[%s4336_s5 + $0x18] sm:$0xe] }
  0x51   : > { %1941 = vrot.lane.b32.xlu1 %v3693_v49, %s4252_s6  ;;  %v505_v62 = vrot.slane %v503_v53, 4  ;;  %v511_v3 = vrot.slane %v509_v54, 5  ;;  %v300_v5 = vrot.slane %v298_v2, 4  ;;  %v311_v6 = vshrl.u32 %v4526_v48, 16 }
  0x52   : > { %v497_v9 = vrot.slane %v496_v57, 4  ;;  %v303_v10 = vrot.slane %v301_v58, 5  ;;  %v309_v11 = vrot.slane %v307_v59, 5  ;;  %v317_v12 = vshll.u32 %v4533_v55, 16 }
  0x53   : > { %v506_v13 = vor.u32 %v505_v62, %v501_v1  ;;  %v313_v14 = vrot.slane %v311_v6, 4  ;;  %v1412_v18 = vshrl.u32 %v3592_v61, 16  ;;  %v1415_v19 = vshll.u32 %v3592_v61, 16 }
  0x54   : > { %1925 = vrot.lane.b32.xlu0 %v3685_v56, %s4252_s6  ;;  %v502_v21 = vsel %vm4396_vm5, %v497_v9, %v501_v1  ;;  %v304_v8 = vor.u32 %v303_v10, %v300_v5  ;;  %v319_v39 = vrot.slane %v317_v12, 5  ;;  %v1421_v22 = vshll.u32 %v4541_v7, 16 }
  0x55   : > { %v507_v47 = vrot.slane %v506_v13, 4  ;;  %v314_v24 = vor.u32 %v313_v14, %v309_v11  ;;  %v1414_v25 = vrot.slane %v1412_v18, 4  ;;  %v1417_v26 = vrot.slane %v1415_v19, 5 }
  0x56   : > { %v305_v27 = vrot.slane %v304_v8, 4  ;;  %v1423_v29 = vrot.slane %v1421_v22, 5  ;;  %v1425_v30 = vshrl.u32 %v4541_v7, 16  ;;  %v1431_v4 = vshll.u32 %v4545_v16, 16  ;;  %v220_v22 = vld [vmem:[%s4336_s5 + $0x84] sm:$0xf] }
  0x57   : > { %v512_v31 = vsel %vm4396_vm5, %v507_v47, %v511_v3  ;;  %v315_v17 = vrot.slane %v314_v24, 4  ;;  %v1418_v15 = vor.u32 %v1417_v26, %v1414_v25  ;;  %v1220_v33 = vshrl.u32 %v3576_v23, 16  ;;  %v3630_v3 = vld [vmem:[%s4336_s5 + $0x84] sm:$0xe] }
  0x58   : > { %v3550_v34 = vcombine.low %v502_v21, %v512_v31  ;;  %v310_v35 = vsel %vm4396_vm5, %v305_v27, %v309_v11  ;;  %v1427_v20 = vrot.slane %v1425_v30, 4  ;;  %v1433_v36 = vrot.slane %v1431_v4, 5  ;;  %v3622_v21 = vld [vmem:[%s4336_s5 + $0x24] sm:$0xe]  ;;  %v4603_v30 = vld [vmem:[%s4336_s5 + $0x88] sm:$0xf] }
  0x59   : > { %v320_v42 = vsel %vm4396_vm5, %v315_v17, %v319_v39  ;;  %v1419_v43 = vrot.slane %v1418_v15, 4  ;;  %v1222_v44 = vrot.slane %v1220_v33, 4  ;;  %v1223_v28 = vshll.u32 %v3576_v23, 16  ;;  %v4606_v4 = vld [vmem:[%s4336_s5 + $0x8c] sm:$0x1] }
  0x5a   : > { %944 = vrot.lane.b32.xlu1 %v3550_v34, %s4253_s7  ;;  %v3542_v38 = vcombine.low %v310_v35, %v320_v42  ;;  %v1428_v45 = vor.u32 %v1427_v20, %v1423_v29  ;;  %v1229_v46 = vshll.u32 %v4557_v32, 16  ;;  %v1233_v49 = vshrl.u32 %v4557_v32, 16  ;;  %v204_v33 = vld [vmem:[%s4336_s5 + $0x24] sm:$0xf] }
  0x5b   : > { %v1424_v51 = vsel %vm4396_vm5, %v1419_v43, %v1423_v29  ;;  %v1225_v1 = vrot.slane %v1223_v28, 5  ;;  %v1239_v52 = vshll.u32 %v4562_v40, 16  ;;  %v3518_v53 = vrot.slane %v643_v41, 9 }
  0x5c   : > { %928 = vrot.lane.b32.xlu0 %v3542_v38, %s4253_s7  ;;  %v1429_v54 = vrot.slane %v1428_v45, 4  ;;  %v1231_v2 = vrot.slane %v1229_v46, 5  ;;  %v1235_v56 = vrot.slane %v1233_v49, 4  ;;  %v772_v57 = vrot.slane %v4505_v63, 5  ;;  %v3594_v49 = vld [vmem:[%s4336_s5 + $0x90] sm:$0xf] }
  0x5d   : > { %v1226_v58 = vor.u32 %v1225_v1, %v1222_v44  ;;  %v1241_v59 = vrot.slane %v1239_v52, 5  ;;  %v775_v61 = vrot.slane %v4513_v37, 5  ;;  %v3510_v62 = vrot.slane %v635_v50, 9  ;;  %v4623_v44 = vld [vmem:[%s4336_s5 + $0x2c] sm:$0x1] }
  0x5e   : > { %v1434_v5 = vsel %vm4396_vm5, %v1429_v54, %v1433_v36  ;;  %v1236_v6 = vor.u32 %v1235_v56, %v1231_v2  ;;  %v773_v9 = vsel %vm4338_vm2, %v3518_v53, %v772_v57  ;;  %v774_v10 = vrot.slane %v772_v57, 4  ;;  %v4617_v36 = vld [vmem:[%s4336_s5 + $0x28] sm:$0xf] }
  0x5f   : > { %v3678_v11 = vcombine.low %v1424_v51, %v1434_v5  ;;  %v1227_v12 = vrot.slane %v1226_v58, 4  ;;  %v716_v63 = vrot.slane %v4526_v48, 5  ;;  %v719_v13 = vrot.slane %v4533_v55, 5 }
  0x60   : > { %v1237_v14 = vrot.slane %v1236_v6, 4  ;;  %v776_v37 = vsel %vm4338_vm2, %v774_v10, %v775_v61  ;;  %v3646_v18 = vrot.slane %v3630_v3, 9  ;;  %v1691_v19 = vrot.slane %v4541_v7, 5  ;;  %v4634_v61 = vld [vmem:[%s4336_s5 + $0x94] sm:$0xf] }
  0x61   : > { %1863 = vrot.lane.b32.xlu1 %v3678_v11, %s4253_s7  ;;  %v1232_v8 = vsel %vm4396_vm5, %v1227_v12, %v1231_v2  ;;  %v3566_v39 = vcombine.low %v773_v9, %v776_v37  ;;  %v717_v48 = vsel %vm4338_vm2, %v3510_v62, %v716_v63  ;;  %v718_v55 = vrot.slane %v716_v63, 4  ;;  %v4637_v9 = vld [vmem:[%s4336_s5 + $0x98] sm:$0x1] }
  0x62   : > { %v1242_v23 = vsel %vm4396_vm5, %v1237_v14, %v1241_v59  ;;  %v1692_v7 = vsel %vm4338_vm2, %v3646_v18, %v1691_v19  ;;  %v1693_v47 = vrot.slane %v1691_v19, 4  ;;  %v1694_v24 = vrot.slane %v4545_v16, 5 }
  0x63   : > { %v3670_v25 = vcombine.low %v1232_v8, %v1242_v23  ;;  %v720_v26 = vsel %vm4338_vm2, %v718_v55, %v719_v13  ;;  %v3638_v27 = vrot.slane %v3622_v21, 9  ;;  %v1635_v29 = vrot.slane %v4557_v32, 5  ;;  %v3578_v21 = vld [vmem:[%s4336_s5 + $0x30] sm:$0xf] }
  0x64   : > { %v3558_v31 = vcombine.low %v717_v48, %v720_v26  ;;  %v1695_v17 = vsel %vm4338_vm2, %v1693_v47, %v1694_v24  ;;  %v1638_v15 = vrot.slane %v4562_v40, 5  ;;  %v514_v16 = vshrl.u32 %v220_v22, 16 }
  0x65   : > { %1847 = vrot.lane.b32.xlu0 %v3670_v25, %s4253_s7  ;;  %1024 = vrot.lane.b32.xlu1 %v3566_v39, %s4252_s6  ;;  %v3694_v34 = vcombine.low %v1692_v7, %v1695_v17  ;;  %v1636_v32 = vsel %vm4338_vm2, %v3638_v27, %v1635_v29  ;;  %v1637_v35 = vrot.slane %v1635_v29, 4  ;;  %v517_v20 = vshll.u32 %v220_v22, 16  ;;  %v4649_v22 = vld [vmem:[%s4336_s5 + $0x34] sm:$0xf]  ;;  %v4654_v25 = vld [vmem:[%s4336_s5 + $0x38] sm:$0x1] }
  0x66   : > { %v516_v41 = vrot.slane %v514_v16, 4  ;;  %v523_v42 = vshll.u32 %v4603_v30, 16  ;;  %v527_v40 = vshrl.u32 %v4603_v30, 16  ;;  %v533_v43 = vshll.u32 %v4606_v4, 16 }
  0x67   : > { %v1639_v28 = vsel %vm4338_vm2, %v1637_v35, %v1638_v15  ;;  %v519_v38 = vrot.slane %v517_v20, 5  ;;  %v322_v45 = vshrl.u32 %v204_v33, 16  ;;  %v325_v46 = vshll.u32 %v204_v33, 16 }
  0x68   : > { %v3686_v50 = vcombine.low %v1636_v32, %v1639_v28  ;;  %v525_v51 = vrot.slane %v523_v42, 5  ;;  %v529_v1 = vrot.slane %v527_v40, 4  ;;  %v535_v52 = vrot.slane %v533_v43, 5  ;;  %v636_v42 = vld [vmem:[%s4336_s5 + $0x24] sm:$0xe] }
  0x69   : > { %1008 = vrot.lane.b32.xlu0 %v3558_v31, %s4252_s6  ;;  %1943 = vrot.lane.b32.xlu1 %v3694_v34, %s4252_s6  ;;  %v520_v53 = vor.u32 %v519_v38, %v516_v41  ;;  %v324_v54 = vrot.slane %v322_v45, 4  ;;  %v327_v2 = vrot.slane %v325_v46, 5  ;;  %v331_v56 = vshll.u32 %v4617_v36, 16  ;;  %v644_v34 = vld [vmem:[%s4336_s5 + $0x84] sm:$0xe] }
  0x6a   : > { %v530_v57 = vor.u32 %v529_v1, %v525_v51  ;;  %v335_v58 = vshrl.u32 %v4617_v36, 16  ;;  %v341_v59 = vshll.u32 %v4623_v44, 16  ;;  %v1436_v62 = vshrl.u32 %v3594_v49, 16 }
  0x6b   : > { %v521_v3 = vrot.slane %v520_v53, 4  ;;  %v328_v5 = vor.u32 %v327_v2, %v324_v54  ;;  %v333_v6 = vrot.slane %v331_v56, 5  ;;  %v1439_v10 = vshll.u32 %v3594_v49, 16  ;;  %v3631_v54 = vld [vmem:[%s4336_s5 + $0x90] sm:$0xe] }
  0x6c   : > { %v531_v11 = vrot.slane %v530_v57, 4  ;;  %v337_v12 = vrot.slane %v335_v58, 4  ;;  %v343_v63 = vrot.slane %v341_v59, 5  ;;  %v1438_v13 = vrot.slane %v1436_v62, 4 }
  0x6d   : > { %1927 = vrot.lane.b32.xlu0 %v3686_v50, %s4252_s6  ;;  %v526_v14 = vsel %vm4396_vm5, %v521_v3, %v525_v51  ;;  %v329_v37 = vrot.slane %v328_v5, 4  ;;  %v1441_v18 = vrot.slane %v1439_v10, 5  ;;  %v1445_v19 = vshll.u32 %v4634_v61, 16 }
  0x6e   : > { %v536_v8 = vsel %vm4396_vm5, %v531_v11, %v535_v52  ;;  %v338_v39 = vor.u32 %v337_v12, %v333_v6  ;;  %v1449_v48 = vshrl.u32 %v4634_v61, 16  ;;  %v1455_v55 = vshll.u32 %v4637_v9, 16 }
  0x6f   : > { %v3551_v23 = vcombine.low %v526_v14, %v536_v8  ;;  %v334_v7 = vsel %vm4396_vm5, %v329_v37, %v333_v6  ;;  %v1442_v47 = vor.u32 %v1441_v18, %v1438_v13  ;;  %v1447_v24 = vrot.slane %v1445_v19, 5  ;;  %v222_v13 = vld [vmem:[%s4336_s5 + $0x90] sm:$0xf]  ;;  %v4695_v8 = vld [vmem:[%s4336_s5 + $0x98] sm:$0x1] }
  0x70   : > { %v339_v26 = vrot.slane %v338_v39, 4  ;;  %v1451_v27 = vrot.slane %v1449_v48, 4  ;;  %v1457_v29 = vrot.slane %v1455_v55, 5  ;;  %v1244_v31 = vshrl.u32 %v3578_v21, 16 }
  0x71   : > { %946 = vrot.lane.b32.xlu1 %v3551_v23, %s4253_s7  ;;  %v1443_v17 = vrot.slane %v1442_v47, 4  ;;  %v1247_v15 = vshll.u32 %v3578_v21, 16  ;;  %v1253_v16 = vshll.u32 %v4649_v22, 16  ;;  %v1257_v33 = vshrl.u32 %v4649_v22, 16  ;;  %v4692_v21 = vld [vmem:[%s4336_s5 + $0x94] sm:$0xf] }
  0x72   : > { %v344_v32 = vsel %vm4396_vm5, %v339_v26, %v343_v63  ;;  %v1452_v35 = vor.u32 %v1451_v27, %v1447_v24  ;;  %v1246_v20 = vrot.slane %v1244_v31, 4  ;;  %v1263_v41 = vshll.u32 %v4654_v25, 16  ;;  %v4710_v31 = vld [vmem:[%s4336_s5 + $0x34] sm:$0xf] }
  0x73   : > { %v3543_v40 = vcombine.low %v334_v7, %v344_v32  ;;  %v1448_v43 = vsel %vm4396_vm5, %v1443_v17, %v1447_v24  ;;  %v1249_v28 = vrot.slane %v1247_v15, 5  ;;  %v1255_v38 = vrot.slane %v1253_v16, 5  ;;  %v206_v24 = vld [vmem:[%s4336_s5 + $0x30] sm:$0xf] }
  0x74   : > { %v1453_v45 = vrot.slane %v1452_v35, 4  ;;  %v1259_v46 = vrot.slane %v1257_v33, 4  ;;  %v1265_v49 = vrot.slane %v1263_v41, 5  ;;  %v3519_v50 = vrot.slane %v644_v34, 9 }
  0x75   : > { %930 = vrot.lane.b32.xlu0 %v3543_v40, %s4253_s7  ;;  %v1250_v51 = vor.u32 %v1249_v28, %v1246_v20  ;;  %v779_v1 = vrot.slane %v4603_v30, 5  ;;  %v782_v52 = vrot.slane %v4606_v4, 5  ;;  %v3511_v53 = vrot.slane %v636_v42, 9  ;;  %v3623_v30 = vld [vmem:[%s4336_s5 + $0x30] sm:$0xe] }
  0x76   : > { %v1458_v2 = vsel %vm4396_vm5, %v1453_v45, %v1457_v29  ;;  %v1260_v56 = vor.u32 %v1259_v46, %v1255_v38  ;;  %v723_v57 = vrot.slane %v4617_v36, 5  ;;  %v726_v58 = vrot.slane %v4623_v44, 5  ;;  %v4715_v20 = vld [vmem:[%s4336_s5 + $0x38] sm:$0x1]  ;;  %v3596_v28 = vld [vmem:[%s4336_s5 + $0x9c] sm:$0xf] }
  0x77   : > { %v3679_v59 = vcombine.low %v1448_v43, %v1458_v2  ;;  %v1251_v62 = vrot.slane %v1250_v51, 4  ;;  %v780_v3 = vsel %vm4338_vm2, %v3519_v50, %v779_v1  ;;  %v781_v5 = vrot.slane %v779_v1, 4  ;;  %v4725_v50 = vld [vmem:[%s4336_s5 + $0xa0] sm:$0xf] }
  0x78   : > { %v1261_v4 = vrot.slane %v1260_v56, 4  ;;  %v724_v6 = vsel %vm4338_vm2, %v3511_v53, %v723_v57  ;;  %v725_v10 = vrot.slane %v723_v57, 4  ;;  %v3647_v11 = vrot.slane %v3631_v54, 9  ;;  %v4729_v57 = vld [vmem:[%s4336_s5 + $0xa4] sm:$0x1] }
  0x79   : > { %1865 = vrot.lane.b32.xlu1 %v3679_v59, %s4253_s7  ;;  %v1256_v36 = vsel %vm4396_vm5, %v1251_v62, %v1255_v38  ;;  %v783_v44 = vsel %vm4338_vm2, %v781_v5, %v782_v52  ;;  %v1698_v12 = vrot.slane %v4634_v61, 5  ;;  %v1701_v63 = vrot.slane %v4637_v9, 5 }
  0x7a   : > { %v1266_v14 = vsel %vm4396_vm5, %v1261_v4, %v1265_v49  ;;  %v3567_v37 = vcombine.low %v780_v3, %v783_v44  ;;  %v727_v18 = vsel %vm4338_vm2, %v725_v10, %v726_v58  ;;  %v3639_v19 = vrot.slane %v3623_v30, 9  ;;  %v3580_v30 = vld [vmem:[%s4336_s5 + $0x3c] sm:$0xf] }
  0x7b   : > { %v3671_v39 = vcombine.low %v1256_v36, %v1266_v14  ;;  %v3559_v48 = vcombine.low %v724_v6, %v727_v18  ;;  %v1699_v61 = vsel %vm4338_vm2, %v3647_v11, %v1698_v12  ;;  %v1700_v9 = vrot.slane %v1698_v12, 4  ;;  %v4739_v36 = vld [vmem:[%s4336_s5 + $0x40] sm:$0xf] }
  0x7c   : > { %v1642_v55 = vrot.slane %v4649_v22, 5  ;;  %v1645_v23 = vrot.slane %v4654_v25, 5  ;;  %v538_v7 = vshrl.u32 %v222_v13, 16  ;;  %v541_v47 = vshll.u32 %v222_v13, 16 }
  0x7d   : > { %1849 = vrot.lane.b32.xlu0 %v3671_v39, %s4253_s7  ;;  %1026 = vrot.lane.b32.xlu1 %v3567_v37, %s4252_s6  ;;  %v1702_v26 = vsel %vm4338_vm2, %v1700_v9, %v1701_v63  ;;  %v547_v27 = vshll.u32 %v4692_v21, 16  ;;  %v551_v29 = vshrl.u32 %v4692_v21, 16  ;;  %v557_v22 = vshll.u32 %v4695_v8, 16 }
  0x7e   : > { %v3695_v25 = vcombine.low %v1699_v61, %v1702_v26  ;;  %v1643_v17 = vsel %vm4338_vm2, %v3639_v19, %v1642_v55  ;;  %v1644_v15 = vrot.slane %v1642_v55, 4  ;;  %v540_v16 = vrot.slane %v538_v7, 4  ;;  %v4747_v61 = vld [vmem:[%s4336_s5 + $0x44] sm:$0x1] }
  0x7f   : > { %v543_v33 = vrot.slane %v541_v47, 5  ;;  %v549_v34 = vrot.slane %v547_v27, 5  ;;  %v553_v32 = vrot.slane %v551_v29, 4  ;;  %v559_v35 = vrot.slane %v557_v22, 5 }
  0x80   : > { %v1646_v41 = vsel %vm4338_vm2, %v1644_v15, %v1645_v23  ;;  %v346_v42 = vshrl.u32 %v206_v24, 16  ;;  %v349_v40 = vshll.u32 %v206_v24, 16  ;;  %v355_v43 = vshll.u32 %v4710_v31, 16  ;;  %v645_v23 = vld [vmem:[%s4336_s5 + $0x90] sm:$0xe] }
  0x81   : > { %1010 = vrot.lane.b32.xlu0 %v3559_v48, %s4252_s6  ;;  %1945 = vrot.lane.b32.xlu1 %v3695_v25, %s4252_s6  ;;  %v3687_v38 = vcombine.low %v1643_v17, %v1646_v41  ;;  %v544_v45 = vor.u32 %v543_v33, %v540_v16  ;;  %v554_v46 = vor.u32 %v553_v32, %v549_v34  ;;  %v359_v49 = vshrl.u32 %v4710_v31, 16  ;;  %v637_v17 = vld [vmem:[%s4336_s5 + $0x30] sm:$0xe] }
  0x82   : > { %v348_v51 = vrot.slane %v346_v42, 4  ;;  %v351_v1 = vrot.slane %v349_v40, 5  ;;  %v357_v52 = vrot.slane %v355_v43, 5  ;;  %v365_v53 = vshll.u32 %v4715_v20, 16  ;;  %v3632_v40 = vld [vmem:[%s4336_s5 + $0x9c] sm:$0xe] }
  0x83   : > { %v545_v54 = vrot.slane %v544_v45, 4  ;;  %v555_v2 = vrot.slane %v554_v46, 4  ;;  %v361_v56 = vrot.slane %v359_v49, 4  ;;  %v1460_v58 = vshrl.u32 %v3596_v28, 16 }
  0x84   : > { %v352_v59 = vor.u32 %v351_v1, %v348_v51  ;;  %v367_v62 = vrot.slane %v365_v53, 5  ;;  %v1463_v3 = vshll.u32 %v3596_v28, 16  ;;  %v1469_v5 = vshll.u32 %v4725_v50, 16 }
  0x85   : > { %1929 = vrot.lane.b32.xlu0 %v3687_v38, %s4252_s6  ;;  %v550_v4 = vsel %vm4396_vm5, %v545_v54, %v549_v34  ;;  %v560_v6 = vsel %vm4396_vm5, %v555_v2, %v559_v35  ;;  %v362_v10 = vor.u32 %v361_v56, %v357_v52  ;;  %v1462_v11 = vrot.slane %v1460_v58, 4  ;;  %v3624_v54 = vld [vmem:[%s4336_s5 + $0x3c] sm:$0xe] }
  0x86   : > { %v3552_v44 = vcombine.low %v550_v4, %v560_v6  ;;  %v353_v12 = vrot.slane %v352_v59, 4  ;;  %v1465_v63 = vrot.slane %v1463_v3, 5  ;;  %v1471_v13 = vrot.slane %v1469_v5, 5 }
  0x87   : > { %v363_v14 = vrot.slane %v362_v10, 4  ;;  %v1473_v37 = vshrl.u32 %v4725_v50, 16  ;;  %v1479_v18 = vshll.u32 %v4729_v57, 16  ;;  %v1268_v19 = vshrl.u32 %v3580_v30, 16 }
  0x88   : > { %948 = vrot.lane.b32.xlu1 %v3552_v44, %s4253_s7  ;;  %v358_v39 = vsel %vm4396_vm5, %v353_v12, %v357_v52  ;;  %v1466_v48 = vor.u32 %v1465_v63, %v1462_v11  ;;  %v1271_v9 = vshll.u32 %v3580_v30, 16  ;;  %v1277_v55 = vshll.u32 %v4739_v36, 16  ;;  %v4782_v11 = vld [vmem:[%s4336_s5 + $0xa0] sm:$0xf] }
  0x89   : > { %v368_v7 = vsel %vm4396_vm5, %v363_v14, %v367_v62  ;;  %v1475_v47 = vrot.slane %v1473_v37, 4  ;;  %v1481_v24 = vrot.slane %v1479_v18, 5  ;;  %v1270_v26 = vrot.slane %v1268_v19, 4 }
  0x8a   : > { %v3544_v27 = vcombine.low %v358_v39, %v368_v7  ;;  %v1467_v29 = vrot.slane %v1466_v48, 4  ;;  %v1273_v22 = vrot.slane %v1271_v9, 5  ;;  %v1279_v25 = vrot.slane %v1277_v55, 5 }
  0x8b   : > { %v1476_v15 = vor.u32 %v1475_v47, %v1471_v13  ;;  %v1281_v16 = vshrl.u32 %v4739_v36, 16  ;;  %v1287_v33 = vshll.u32 %v4747_v61, 16  ;;  %v3520_v34 = vrot.slane %v645_v23, 9  ;;  %v4806_v47 = vld [vmem:[%s4336_s5 + $0x40] sm:$0xf] }
  0x8c   : > { %932 = vrot.lane.b32.xlu0 %v3544_v27, %s4253_s7  ;;  %v1472_v32 = vsel %vm4396_vm5, %v1467_v29, %v1471_v13  ;;  %v1274_v35 = vor.u32 %v1273_v22, %v1270_v26  ;;  %v786_v41 = vrot.slane %v4692_v21, 5  ;;  %v789_v42 = vrot.slane %v4695_v8, 5  ;;  %v4791_v13 = vld [vmem:[%s4336_s5 + $0xa4] sm:$0x1] }
  0x8d   : > { %v1477_v43 = vrot.slane %v1476_v15, 4  ;;  %v1283_v28 = vrot.slane %v1281_v16, 4  ;;  %v1289_v38 = vrot.slane %v1287_v33, 5  ;;  %v3512_v45 = vrot.slane %v637_v17, 9 }
  0x8e   : > { %v1275_v46 = vrot.slane %v1274_v35, 4  ;;  %v787_v49 = vsel %vm4338_vm2, %v3520_v34, %v786_v41  ;;  %v788_v51 = vrot.slane %v786_v41, 4  ;;  %v730_v1 = vrot.slane %v4710_v31, 5 }
  0x8f   : > { %v1482_v52 = vsel %vm4396_vm5, %v1477_v43, %v1481_v24  ;;  %v1284_v53 = vor.u32 %v1283_v28, %v1279_v25  ;;  %v733_v21 = vrot.slane %v4715_v20, 5  ;;  %v3648_v8 = vrot.slane %v3632_v40, 9  ;;  %v224_v20 = vld [vmem:[%s4336_s5 + $0x9c] sm:$0xf]  ;;  %v4809_v24 = vld [vmem:[%s4336_s5 + $0x44] sm:$0x1] }
  0x90   : > { %v3680_v2 = vcombine.low %v1472_v32, %v1482_v52  ;;  %v1280_v56 = vsel %vm4396_vm5, %v1275_v46, %v1279_v25  ;;  %v790_v58 = vsel %vm4338_vm2, %v788_v51, %v789_v42  ;;  %v731_v59 = vsel %vm4338_vm2, %v3512_v45, %v730_v1  ;;  %v3598_v25 = vld [vmem:[%s4336_s5 + $0xa8] sm:$0xf]  ;;  %v4818_v28 = vld [vmem:[%s4336_s5 + $0xac] sm:$0xf] }
  0x91   : > { %v1285_v31 = vrot.slane %v1284_v53, 4  ;;  %v3568_v62 = vcombine.low %v787_v49, %v790_v58  ;;  %v732_v3 = vrot.slane %v730_v1, 4  ;;  %v1705_v5 = vrot.slane %v4725_v50, 5  ;;  %v4821_v1 = vld [vmem:[%s4336_s5 + $0xb0] sm:$0x1] }
  0x92   : > { %1867 = vrot.lane.b32.xlu1 %v3680_v2, %s4253_s7  ;;  %v1708_v30 = vrot.slane %v4729_v57, 5  ;;  %v3640_v4 = vrot.slane %v3624_v54, 9  ;;  %v1649_v6 = vrot.slane %v4739_v36, 5  ;;  %v1652_v10 = vrot.slane %v4747_v61, 5  ;;  %v208_v61 = vld [vmem:[%s4336_s5 + $0x3c] sm:$0xf] }
  0x93   : > { %v1290_v44 = vsel %vm4396_vm5, %v1285_v31, %v1289_v38  ;;  %v734_v12 = vsel %vm4338_vm2, %v732_v3, %v733_v21  ;;  %v1706_v50 = vsel %vm4338_vm2, %v3648_v8, %v1705_v5  ;;  %v1707_v63 = vrot.slane %v1705_v5, 4 }
  0x94   : > { %v3672_v57 = vcombine.low %v1280_v56, %v1290_v44  ;;  %v3560_v36 = vcombine.low %v731_v59, %v734_v12  ;;  %v1650_v14 = vsel %vm4338_vm2, %v3640_v4, %v1649_v6  ;;  %v1651_v37 = vrot.slane %v1649_v6, 4  ;;  %v3582_v59 = vld [vmem:[%s4336_s5 + $0x48] sm:$0xf] }
  0x95   : > { %v1709_v18 = vsel %vm4338_vm2, %v1707_v63, %v1708_v30  ;;  %v562_v19 = vshrl.u32 %v224_v20, 16  ;;  %v565_v39 = vshll.u32 %v224_v20, 16  ;;  %v571_v48 = vshll.u32 %v4782_v11, 16  ;;  %v4833_v20 = vld [vmem:[%s4336_s5 + $0x4c] sm:$0xf] }
  0x96   : > { %1851 = vrot.lane.b32.xlu0 %v3672_v57, %s4253_s7  ;;  %1028 = vrot.lane.b32.xlu1 %v3568_v62, %s4252_s6  ;;  %v3696_v9 = vcombine.low %v1706_v50, %v1709_v18  ;;  %v1653_v55 = vsel %vm4338_vm2, %v1651_v37, %v1652_v10  ;;  %v575_v23 = vshrl.u32 %v4782_v11, 16  ;;  %v581_v7 = vshll.u32 %v4791_v13, 16  ;;  %v4835_v30 = vpop.permute.xlu1 %1020  ;;  %v4840_v57 = vld [vmem:[%s4336_s5 + $0x50] sm:$0x1] }
  0x97   : > { %v3688_v26 = vcombine.low %v1650_v14, %v1653_v55  ;;  %v564_v27 = vrot.slane %v562_v19, 4  ;;  %v567_v29 = vrot.slane %v565_v39, 5  ;;  %v573_v22 = vrot.slane %v571_v48, 5  ;;  %v646_v39 = vld [vmem:[%s4336_s5 + $0x9c] sm:$0xe] }
  0x98   : > { %v577_v17 = vrot.slane %v575_v23, 4  ;;  %v583_v15 = vrot.slane %v581_v7, 5  ;;  %v370_v16 = vshrl.u32 %v208_v61, 16  ;;  %v373_v33 = vshll.u32 %v208_v61, 16  ;;  %v4848_v23 = vpop.permute.xlu0 %1004 }
  0x99   : > { %v568_v34 = vor.u32 %v567_v29, %v564_v27  ;;  %v379_v32 = vshll.u32 %v4806_v47, 16  ;;  %v383_v35 = vshrl.u32 %v4806_v47, 16  ;;  %v389_v41 = vshll.u32 %v4809_v24, 16 }
  0x9a   : > { %1012 = vrot.lane.b32.xlu0 %v3560_v36, %s4252_s6  ;;  %1947 = vrot.lane.b32.xlu1 %v3696_v9, %s4252_s6  ;;  %v578_v42 = vor.u32 %v577_v17, %v573_v22  ;;  %v372_v40 = vrot.slane %v370_v16, 4  ;;  %v375_v43 = vrot.slane %v373_v33, 5  ;;  %v1484_v38 = vshrl.u32 %v3598_v25, 16  ;;  %v638_v16 = vld [vmem:[%s4336_s5 + $0x3c] sm:$0xe]  ;;  %v4856_v33 = vpop.permute.xlu1 %1939 }
  0x9b   : > { %v569_v45 = vrot.slane %v568_v34, 4  ;;  %v381_v46 = vrot.slane %v379_v32, 5  ;;  %v385_v49 = vrot.slane %v383_v35, 4  ;;  %v391_v51 = vrot.slane %v389_v41, 5 }
  0x9c   : > { %v579_v52 = vrot.slane %v578_v42, 4  ;;  %v376_v53 = vor.u32 %v375_v43, %v372_v40  ;;  %v1486_v21 = vrot.slane %v1484_v38, 4  ;;  %v1487_v8 = vshll.u32 %v3598_v25, 16  ;;  %v3633_v42 = vld [vmem:[%s4336_s5 + $0xa8] sm:$0xe] }
  0x9d   : > { %v574_v54 = vsel %vm4396_vm5, %v569_v45, %v573_v22  ;;  %v386_v2 = vor.u32 %v385_v49, %v381_v46  ;;  %v1493_v56 = vshll.u32 %v4818_v28, 16  ;;  %v1497_v58 = vshrl.u32 %v4818_v28, 16 }
  0x9e   : > { %1931 = vrot.lane.b32.xlu0 %v3688_v26, %s4252_s6  ;;  %v584_v31 = vsel %vm4396_vm5, %v579_v52, %v583_v15  ;;  %v377_v62 = vrot.slane %v376_v53, 4  ;;  %v1489_v3 = vrot.slane %v1487_v8, 5  ;;  %v1503_v5 = vshll.u32 %v4821_v1, 16  ;;  %v3625_v8 = vld [vmem:[%s4336_s5 + $0x48] sm:$0xe] }
  0x9f   : > { %v3553_v4 = vcombine.low %v574_v54, %v584_v31  ;;  %v387_v6 = vrot.slane %v386_v2, 4  ;;  %v1495_v10 = vrot.slane %v1493_v56, 5  ;;  %v1499_v44 = vrot.slane %v1497_v58, 4  ;;  %v4871_v54 = vpop.permute.xlu0 %1923  ;;  %v226_v58 = vld [vmem:[%s4336_s5 + $0xa8] sm:$0xf] }
  0xa0   : > { %v382_v12 = vsel %vm4396_vm5, %v377_v62, %v381_v46  ;;  %v1490_v50 = vor.u32 %v1489_v3, %v1486_v21  ;;  %v1505_v63 = vrot.slane %v1503_v5, 5  ;;  %v1292_v36 = vshrl.u32 %v3582_v59, 16 }
  0xa1   : > { %950 = vrot.lane.b32.xlu1 %v3553_v4, %s4253_s7  ;;  %v392_v14 = vsel %vm4396_vm5, %v387_v6, %v391_v51  ;;  %v1500_v37 = vor.u32 %v1499_v44, %v1495_v10  ;;  %v1295_v18 = vshll.u32 %v3582_v59, 16  ;;  %v1301_v19 = vshll.u32 %v4833_v20, 16  ;;  %v4889_v44 = vld [vmem:[%s4336_s5 + $0xac] sm:$0xf] }
  0xa2   : > { %v3545_v48 = vcombine.low %v382_v12, %v392_v14  ;;  %v1491_v61 = vrot.slane %v1490_v50, 4  ;;  %v1294_v9 = vrot.slane %v1292_v36, 4  ;;  %v1305_v55 = vshrl.u32 %v4833_v20, 16  ;;  %v4883_v3 = vpop.permute.xlu1 %1843  ;;  %v4892_v12 = vld [vmem:[%s4336_s5 + $0xb0] sm:$0x1] }
  0xa3   : > { %v1501_v7 = vrot.slane %v1500_v37, 4  ;;  %v1297_v26 = vrot.slane %v1295_v18, 5  ;;  %v1303_v27 = vrot.slane %v1301_v19, 5  ;;  %v1311_v29 = vshll.u32 %v4840_v57, 16  ;;  %v210_v14 = vld [vmem:[%s4336_s5 + $0x48] sm:$0xf] }
  0xa4   : > { %934 = vrot.lane.b32.xlu0 %v3545_v48, %s4253_s7  ;;  %v1496_v22 = vsel %vm4396_vm5, %v1491_v61, %v1495_v10  ;;  %v1307_v25 = vrot.slane %v1305_v55, 4  ;;  %v3521_v17 = vrot.slane %v646_v39, 9  ;;  %v793_v15 = vrot.slane %v4782_v11, 5  ;;  %v4903_v39 = vld [vmem:[%s4336_s5 + $0x4c] sm:$0xf] }
  0xa5   : > { %v1506_v34 = vsel %vm4396_vm5, %v1501_v7, %v1505_v63  ;;  %v1298_v32 = vor.u32 %v1297_v26, %v1294_v9  ;;  %v1313_v35 = vrot.slane %v1311_v29, 5  ;;  %v796_v41 = vrot.slane %v4791_v13, 5  ;;  %v4909_v55 = vld [vmem:[%s4336_s5 + $0x50] sm:$0x1] }
  0xa6   : > { %v3681_v40 = vcombine.low %v1496_v22, %v1506_v34  ;;  %v1308_v43 = vor.u32 %v1307_v25, %v1303_v27  ;;  %v794_v38 = vsel %vm4338_vm2, %v3521_v17, %v793_v15  ;;  %v795_v45 = vrot.slane %v793_v15, 4  ;;  %v4911_v7 = vpop.permute.xlu0 %924  ;;  %v3600_v25 = vld [vmem:[%s4336_s5 + $0xb4] sm:$0xf] }
  0xa7   : > { %v1299_v11 = vrot.slane %v1298_v32, 4  ;;  %v3513_v46 = vrot.slane %v638_v16, 9  ;;  %v737_v49 = vrot.slane %v4806_v47, 5  ;;  %v740_v51 = vrot.slane %v4809_v24, 5 }
  0xa8   : > { %1869 = vrot.lane.b32.xlu1 %v3681_v40, %s4253_s7  ;;  %v1309_v52 = vrot.slane %v1308_v43, 4  ;;  %v797_v13 = vsel %vm4338_vm2, %v795_v45, %v796_v41  ;;  %v3649_v53 = vrot.slane %v3633_v42, 9  ;;  %v1712_v21 = vrot.slane %v4818_v28, 5 }
  0xa9   : > { %v1304_v2 = vsel %vm4396_vm5, %v1299_v11, %v1303_v27  ;;  %v3569_v47 = vcombine.low %v794_v38, %v797_v13  ;;  %v738_v24 = vsel %vm4338_vm2, %v3513_v46, %v737_v49  ;;  %v739_v56 = vrot.slane %v737_v49, 4  ;;  %v4917_v32 = vpop.permute.xlu1 %1859  ;;  %v4924_v11 = vld [vmem:[%s4336_s5 + $0xb8] sm:$0xf]  ;;  %v4927_v13 = vld [vmem:[%s4336_s5 + $0xbc] sm:$0x1] }
  0xaa   : > { %v1314_v59 = vsel %vm4396_vm5, %v1309_v52, %v1313_v35  ;;  %v1713_v28 = vsel %vm4338_vm2, %v3649_v53, %v1712_v21  ;;  %v1714_v31 = vrot.slane %v1712_v21, 4  ;;  %v1715_v62 = vrot.slane %v4821_v1, 5 }
  0xab   : > { %v3673_v5 = vcombine.low %v1304_v2, %v1314_v59  ;;  %v741_v4 = vsel %vm4338_vm2, %v739_v56, %v740_v51  ;;  %v3641_v6 = vrot.slane %v3625_v8, 9  ;;  %v1656_v10 = vrot.slane %v4833_v20, 5 }
  0xac   : > { %1030 = vrot.lane.b32.xlu1 %v3569_v47, %s4252_s6  ;;  %v3561_v50 = vcombine.low %v738_v24, %v741_v4  ;;  %v1716_v1 = vsel %vm4338_vm2, %v1714_v31, %v1715_v62  ;;  %v1659_v63 = vrot.slane %v4840_v57, 5  ;;  %v586_v36 = vshrl.u32 %v226_v58, 16  ;;  %v3584_v31 = vld [vmem:[%s4336_s5 + $0x54] sm:$0xf] }
  0xad   : > { %1853 = vrot.lane.b32.xlu0 %v3673_v5, %s4253_s7  ;;  %v3697_v37 = vcombine.low %v1713_v28, %v1716_v1  ;;  %v1657_v20 = vsel %vm4338_vm2, %v3641_v6, %v1656_v10  ;;  %v1658_v18 = vrot.slane %v1656_v10, 4  ;;  %v589_v19 = vshll.u32 %v226_v58, 16  ;;  %v4941_v10 = vld [vmem:[%s4336_s5 + $0x58] sm:$0xf] }
  0xae   : > { %v588_v48 = vrot.slane %v586_v36, 4  ;;  %v595_v61 = vshll.u32 %v4889_v44, 16  ;;  %v599_v9 = vshrl.u32 %v4889_v44, 16  ;;  %v605_v57 = vshll.u32 %v4892_v12, 16 }
  0xaf   : > { %v1660_v26 = vsel %vm4338_vm2, %v1658_v18, %v1659_v63  ;;  %v591_v27 = vrot.slane %v589_v19, 5  ;;  %v394_v29 = vshrl.u32 %v210_v14, 16  ;;  %v397_v22 = vshll.u32 %v210_v14, 16  ;;  %v4929_v24 = vpop.permute.xlu0 %940 }
  0xb0   : > { %1949 = vrot.lane.b32.xlu1 %v3697_v37, %s4252_s6  ;;  %v3689_v17 = vcombine.low %v1657_v20, %v1660_v26  ;;  %v597_v15 = vrot.slane %v595_v61, 5  ;;  %v601_v16 = vrot.slane %v599_v9, 4  ;;  %v607_v34 = vrot.slane %v605_v57, 5  ;;  %v4948_v37 = vld [vmem:[%s4336_s5 + $0x5c] sm:$0x1] }
  0xb1   : > { %1014 = vrot.lane.b32.xlu0 %v3561_v50, %s4252_s6  ;;  %v592_v35 = vor.u32 %v591_v27, %v588_v48  ;;  %v396_v41 = vrot.slane %v394_v29, 4  ;;  %v399_v42 = vrot.slane %v397_v22, 5  ;;  %v403_v40 = vshll.u32 %v4903_v39, 16  ;;  %v647_v27 = vld [vmem:[%s4336_s5 + $0xa8] sm:$0xe] }
  0xb2   : > { %v602_v43 = vor.u32 %v601_v16, %v597_v15  ;;  %v407_v38 = vshrl.u32 %v4903_v39, 16  ;;  %v413_v45 = vshll.u32 %v4909_v55, 16  ;;  %v1508_v46 = vshrl.u32 %v3600_v25, 16  ;;  %v4943_v50 = vpop.permute.xlu1 %942 }
  0xb3   : > { %v593_v49 = vrot.slane %v592_v35, 4  ;;  %v400_v51 = vor.u32 %v399_v42, %v396_v41  ;;  %v405_v52 = vrot.slane %v403_v40, 5  ;;  %v1511_v53 = vshll.u32 %v3600_v25, 16 }
  0xb4   : > { %v603_v21 = vrot.slane %v602_v43, 4  ;;  %v409_v8 = vrot.slane %v407_v38, 4  ;;  %v415_v2 = vrot.slane %v413_v45, 5  ;;  %v1510_v47 = vrot.slane %v1508_v46, 4 }
  0xb5   : > { %1933 = vrot.lane.b32.xlu0 %v3689_v17, %s4252_s6  ;;  %v598_v56 = vsel %vm4396_vm5, %v593_v49, %v597_v15  ;;  %v401_v58 = vrot.slane %v400_v51, 4  ;;  %v1513_v59 = vrot.slane %v1511_v53, 5  ;;  %v1517_v28 = vshll.u32 %v4924_v11, 16  ;;  %v639_v15 = vld [vmem:[%s4336_s5 + $0x48] sm:$0xe] }
  0xb6   : > { %v608_v62 = vsel %vm4396_vm5, %v603_v21, %v607_v34  ;;  %v410_v5 = vor.u32 %v409_v8, %v405_v52  ;;  %v1521_v4 = vshrl.u32 %v4924_v11, 16  ;;  %v1527_v6 = vshll.u32 %v4927_v13, 16  ;;  %v4958_v16 = vpop.permute.xlu0 %926  ;;  %v3634_v21 = vld [vmem:[%s4336_s5 + $0xb4] sm:$0xe] }
  0xb7   : > { %v3554_v1 = vcombine.low %v598_v56, %v608_v62  ;;  %v406_v63 = vsel %vm4396_vm5, %v401_v58, %v405_v52  ;;  %v1514_v36 = vor.u32 %v1513_v59, %v1510_v47  ;;  %v1519_v14 = vrot.slane %v1517_v28, 5 }
  0xb8   : > { %v411_v20 = vrot.slane %v410_v5, 4  ;;  %v1523_v18 = vrot.slane %v1521_v4, 4  ;;  %v1529_v19 = vrot.slane %v1527_v6, 5  ;;  %v1316_v48 = vshrl.u32 %v3584_v31, 16 }
  0xb9   : > { %952 = vrot.lane.b32.xlu1 %v3554_v1, %s4253_s7  ;;  %v1515_v61 = vrot.slane %v1514_v36, 4  ;;  %v1319_v9 = vshll.u32 %v3584_v31, 16  ;;  %v1325_v57 = vshll.u32 %v4941_v10, 16  ;;  %v1329_v26 = vshrl.u32 %v4941_v10, 16  ;;  %v228_v36 = vld [vmem:[%s4336_s5 + $0xb4] sm:$0xf] }
  0xba   : > { %v416_v29 = vsel %vm4396_vm5, %v411_v20, %v415_v2  ;;  %v1524_v22 = vor.u32 %v1523_v18, %v1519_v14  ;;  %v1318_v25 = vrot.slane %v1316_v48, 4  ;;  %v1335_v17 = vshll.u32 %v4948_v37, 16  ;;  %v4992_v48 = vld [vmem:[%s4336_s5 + $0xb8] sm:$0xf] }
  0xbb   : > { %v3546_v34 = vcombine.low %v406_v63, %v416_v29  ;;  %v1520_v35 = vsel %vm4396_vm5, %v1515_v61, %v1519_v14  ;;  %v1321_v41 = vrot.slane %v1319_v9, 5  ;;  %v1327_v42 = vrot.slane %v1325_v57, 5  ;;  %v4962_v46 = vpop.permute.xlu1 %1861  ;;  %v4995_v61 = vld [vmem:[%s4336_s5 + $0xbc] sm:$0x1] }
  0xbc   : > { %v1525_v40 = vrot.slane %v1524_v22, 4  ;;  %v1331_v43 = vrot.slane %v1329_v26, 4  ;;  %v1337_v38 = vrot.slane %v1335_v17, 5  ;;  %v3522_v45 = vrot.slane %v647_v27, 9  ;;  %v212_v17 = vld [vmem:[%s4336_s5 + $0x54] sm:$0xf] }
  0xbd   : > { %936 = vrot.lane.b32.xlu0 %v3546_v34, %s4253_s7  ;;  %v1322_v49 = vor.u32 %v1321_v41, %v1318_v25  ;;  %v800_v51 = vrot.slane %v4889_v44, 5  ;;  %v803_v52 = vrot.slane %v4892_v12, 5  ;;  %v3514_v53 = vrot.slane %v639_v15, 9  ;;  %v3626_v44 = vld [vmem:[%s4336_s5 + $0x54] sm:$0xe] }
  0xbe   : > { %v1530_v8 = vsel %vm4396_vm5, %v1525_v40, %v1529_v19  ;;  %v1332_v2 = vor.u32 %v1331_v43, %v1327_v42  ;;  %v744_v47 = vrot.slane %v4903_v39, 5  ;;  %v747_v56 = vrot.slane %v4909_v55, 5  ;;  %v4977_v6 = vpop.permute.xlu0 %1845 }
  0xbf   : > { %v3682_v58 = vcombine.low %v1520_v35, %v1530_v8  ;;  %v1323_v59 = vrot.slane %v1322_v49, 4  ;;  %v801_v28 = vsel %vm4338_vm2, %v3522_v45, %v800_v51  ;;  %v802_v31 = vrot.slane %v800_v51, 4  ;;  %v4997_v9 = vpop.permute.xlu1 %1022 }
  0xc0   : > { %v1333_v12 = vrot.slane %v1332_v2, 4  ;;  %v745_v62 = vsel %vm4338_vm2, %v3514_v53, %v744_v47  ;;  %v746_v5 = vrot.slane %v744_v47, 4  ;;  %v3650_v4 = vrot.slane %v3634_v21, 9  ;;  %v5019_v53 = vld [vmem:[%s4336_s5 + $0x5c] sm:$0x1] }
  0xc1   : > { %1871 = vrot.lane.b32.xlu1 %v3682_v58, %s4253_s7  ;;  %v1328_v39 = vsel %vm4396_vm5, %v1323_v59, %v1327_v42  ;;  %v804_v55 = vsel %vm4338_vm2, %v802_v31, %v803_v52  ;;  %v1719_v1 = vrot.slane %v4924_v11, 5  ;;  %v1722_v63 = vrot.slane %v4927_v13, 5 }
  0xc2   : > { %v1338_v14 = vsel %vm4396_vm5, %v1333_v12, %v1337_v38  ;;  %v3570_v20 = vcombine.low %v801_v28, %v804_v55  ;;  %v748_v18 = vsel %vm4338_vm2, %v746_v5, %v747_v56  ;;  %v3642_v19 = vrot.slane %v3626_v44, 9  ;;  %v5016_v38 = vpop.permute.xlu0 %1006  ;;  %v3602_v56 = vld [vmem:[%s4336_s5 + $0xc0] sm:$0xf]  ;;  %v5031_v12 = vld [vmem:[%s4336_s5 + $0xc4] sm:$0xf] }
  0xc3   : > { %v3674_v11 = vcombine.low %v1328_v39, %v1338_v14  ;;  %v3562_v57 = vcombine.low %v745_v62, %v748_v18  ;;  %v1720_v13 = vsel %vm4338_vm2, %v3650_v4, %v1719_v1  ;;  %v1721_v26 = vrot.slane %v1719_v1, 4  ;;  %v5025_v58 = vpop.permute.xlu1 %1941 }
  0xc4   : > { %v1663_v27 = vrot.slane %v4941_v10, 5  ;;  %v1666_v29 = vrot.slane %v4948_v37, 5  ;;  %v610_v22 = vshrl.u32 %v228_v36, 16  ;;  %v613_v25 = vshll.u32 %v228_v36, 16  ;;  %v5012_v10 = vld [vmem:[%s4336_s5 + $0x58] sm:$0xf] }
  0xc5   : > { %1855 = vrot.lane.b32.xlu0 %v3674_v11, %s4253_s7  ;;  %1032 = vrot.lane.b32.xlu1 %v3570_v20, %s4252_s6  ;;  %v1723_v15 = vsel %vm4338_vm2, %v1721_v26, %v1722_v63  ;;  %v619_v34 = vshll.u32 %v4992_v48, 16  ;;  %v623_v35 = vshrl.u32 %v4992_v48, 16  ;;  %v629_v41 = vshll.u32 %v4995_v61, 16  ;;  %v5035_v36 = vld [vmem:[%s4336_s5 + $0xc8] sm:$0x1] }
  0xc6   : > { %v3698_v37 = vcombine.low %v1720_v13, %v1723_v15  ;;  %v1664_v42 = vsel %vm4338_vm2, %v3642_v19, %v1663_v27  ;;  %v1665_v40 = vrot.slane %v1663_v27, 4  ;;  %v612_v43 = vrot.slane %v610_v22, 4  ;;  %v5039_v13 = vpop.permute.xlu0 %1925 }
  0xc7   : > { %v615_v45 = vrot.slane %v613_v25, 5  ;;  %v621_v49 = vrot.slane %v619_v34, 5  ;;  %v625_v51 = vrot.slane %v623_v35, 4  ;;  %v631_v52 = vrot.slane %v629_v41, 5  ;;  %v5047_v25 = vld [vmem:[%s4336_s5 + $0x64] sm:$0xf] }
  0xc8   : > { %v1667_v21 = vsel %vm4338_vm2, %v1665_v40, %v1666_v29  ;;  %v418_v8 = vshrl.u32 %v212_v17, 16  ;;  %v421_v2 = vshll.u32 %v212_v17, 16  ;;  %v427_v47 = vshll.u32 %v5012_v10, 16 }
  0xc9   : > { %1016 = vrot.lane.b32.xlu0 %v3562_v57, %s4252_s6  ;;  %1951 = vrot.lane.b32.xlu1 %v3698_v37, %s4252_s6  ;;  %v3690_v59 = vcombine.low %v1664_v42, %v1667_v21  ;;  %v616_v28 = vor.u32 %v615_v45, %v612_v43  ;;  %v626_v31 = vor.u32 %v625_v51, %v621_v49  ;;  %v431_v44 = vshrl.u32 %v5012_v10, 16  ;;  %v3586_v57 = vld [vmem:[%s4336_s5 + $0x60] sm:$0xf]  ;;  %v5057_v51 = vld [vmem:[%s4336_s5 + $0x68] sm:$0x1] }
  0xca   : > { %v420_v62 = vrot.slane %v418_v8, 4  ;;  %v423_v5 = vrot.slane %v421_v2, 5  ;;  %v429_v4 = vrot.slane %v427_v47, 5  ;;  %v437_v39 = vshll.u32 %v5019_v53, 16  ;;  %v648_v8 = vld [vmem:[%s4336_s5 + $0xb4] sm:$0xe] }
  0xcb   : > { %v617_v55 = vrot.slane %v616_v28, 4  ;;  %v627_v1 = vrot.slane %v626_v31, 4  ;;  %v433_v63 = vrot.slane %v431_v44, 4  ;;  %v1532_v14 = vshrl.u32 %v3602_v56, 16 }
  0xcc   : > { %v424_v20 = vor.u32 %v423_v5, %v420_v62  ;;  %v439_v18 = vrot.slane %v437_v39, 5  ;;  %v1535_v19 = vshll.u32 %v3602_v56, 16  ;;  %v1541_v11 = vshll.u32 %v5031_v12, 16  ;;  %v5049_v41 = vpop.permute.xlu1 %944  ;;  %v640_v5 = vld [vmem:[%s4336_s5 + $0x54] sm:$0xe] }
  0xcd   : > { %1935 = vrot.lane.b32.xlu0 %v3690_v59, %s4252_s6  ;;  %v622_v26 = vsel %vm4396_vm5, %v617_v55, %v621_v49  ;;  %v632_v27 = vsel %vm4396_vm5, %v627_v1, %v631_v52  ;;  %v434_v29 = vor.u32 %v433_v63, %v429_v4  ;;  %v1534_v22 = vrot.slane %v1532_v14, 4 }
  0xce   : > { %v3555_v17 = vcombine.low %v622_v26, %v632_v27  ;;  %v425_v15 = vrot.slane %v424_v20, 4  ;;  %v1537_v34 = vrot.slane %v1535_v19, 5  ;;  %v1543_v35 = vrot.slane %v1541_v11, 5  ;;  %v5064_v39 = vpop.permute.xlu0 %928 }
  0xcf   : > { %v435_v37 = vrot.slane %v434_v29, 4  ;;  %v1545_v42 = vshrl.u32 %v5031_v12, 16  ;;  %v1551_v40 = vshll.u32 %v5035_v36, 16  ;;  %v1340_v43 = vshrl.u32 %v3586_v57, 16 }
  0xd0   : > { %954 = vrot.lane.b32.xlu1 %v3555_v17, %s4253_s7  ;;  %v430_v45 = vsel %vm4396_vm5, %v425_v15, %v429_v4  ;;  %v1538_v49 = vor.u32 %v1537_v34, %v1534_v22  ;;  %v1343_v52 = vshll.u32 %v3586_v57, 16  ;;  %v1349_v21 = vshll.u32 %v5047_v25, 16 }
  0xd1   : > { %v440_v2 = vsel %vm4396_vm5, %v435_v37, %v439_v18  ;;  %v1547_v47 = vrot.slane %v1545_v42, 4  ;;  %v1553_v56 = vrot.slane %v1551_v40, 5  ;;  %v1342_v59 = vrot.slane %v1340_v43, 4  ;;  %v3635_v37 = vld [vmem:[%s4336_s5 + $0xc0] sm:$0xe] }
  0xd2   : > { %v3547_v28 = vcombine.low %v430_v45, %v440_v2  ;;  %v1539_v31 = vrot.slane %v1538_v49, 4  ;;  %v1345_v44 = vrot.slane %v1343_v52, 5  ;;  %v1351_v62 = vrot.slane %v1349_v21, 5  ;;  %v3627_v45 = vld [vmem:[%s4336_s5 + $0x60] sm:$0xe] }
  0xd3   : > { %v1548_v4 = vor.u32 %v1547_v47, %v1543_v35  ;;  %v1353_v55 = vshrl.u32 %v5047_v25, 16  ;;  %v1359_v1 = vshll.u32 %v5057_v51, 16  ;;  %v3523_v63 = vrot.slane %v648_v8, 9  ;;  %v5073_v11 = vpop.permute.xlu1 %1863  ;;  %v4107_v8 = vld [vmem:[%s4336_s5 + $0x10] sm:$0xf] }
  0xd4   : > { %938 = vrot.lane.b32.xlu0 %v3547_v28, %s4253_s7  ;;  %v1544_v14 = vsel %vm4396_vm5, %v1539_v31, %v1543_v35  ;;  %v1346_v20 = vor.u32 %v1345_v44, %v1342_v59  ;;  %v807_v18 = vrot.slane %v4992_v48, 5  ;;  %v810_v19 = vrot.slane %v4995_v61, 5  ;;  %v4108_v2 = vld [vmem:[%s4336_s5 + $0xc] sm:$0xf]  ;;  %v4110_v59 = vld [vmem:[%s4336_s5] sm:$0xf] }
  0xd5   : > { %v1549_v57 = vrot.slane %v1548_v4, 4  ;;  %v1355_v26 = vrot.slane %v1353_v55, 4  ;;  %v1361_v27 = vrot.slane %v1359_v1, 5  ;;  %v3515_v29 = vrot.slane %v640_v5, 9 }
  0xd6   : > { %v1347_v22 = vrot.slane %v1346_v20, 4  ;;  %v808_v17 = vsel %vm4338_vm2, %v3523_v63, %v807_v18  ;;  %v809_v15 = vrot.slane %v807_v18, 4  ;;  %v751_v34 = vrot.slane %v5012_v10, 5 }
  0xd7   : > { %v1554_v48 = vsel %vm4396_vm5, %v1549_v57, %v1553_v56  ;;  %v1356_v61 = vor.u32 %v1355_v26, %v1351_v62  ;;  %v754_v35 = vrot.slane %v5019_v53, 5  ;;  %v5089_v49 = vpop.permute.xlu0 %1847  ;;  %v3652_v47 = vcombine.low %v4108_v2, %v4107_v8  ;;  %v4109_v56 = vld [vmem:[%s4336_s5 + $0x4] sm:$0xf]  ;;  %v5098_v5 = vpop.permute.xlu1 %1024 }
  0xd8   : > { %v3683_v42 = vcombine.low %v1544_v14, %v1554_v48  ;;  %v1352_v40 = vsel %vm4396_vm5, %v1347_v22, %v1351_v62  ;;  %v811_v43 = vsel %vm4338_vm2, %v809_v15, %v810_v19  ;;  %v752_v10 = vsel %vm4338_vm2, %v3515_v29, %v751_v34  ;;  %v5110_v14 = vld [vmem:[%s4336_s5 + $0x7c] sm:$0xf]  ;;  %v4112_v29 = vld [vmem:[%s4336_s5 + $0x6c] sm:$0xf]  ;;  %v4114_v15 = vld [vmem:[%s4336_s5 + $0x60] sm:$0xf] }
  0xd9   : > { %v1357_v52 = vrot.slane %v1356_v61, 4  ;;  %v3571_v21 = vcombine.low %v808_v17, %v811_v43  ;;  %v753_v53 = vrot.slane %v751_v34, 4  ;;  %v3524_v28 = vcombine.low %v4110_v59, %v4109_v56  ;;  %v4113_v17 = vld [vmem:[%s4336_s5 + $0x64] sm:$0xf]  ;;  %v5127_v34 = vld [vmem:[%s4336_s5 + $0x80] sm:$0x1] }
  0xda   : > { %1873 = vrot.lane.b32.xlu1 %v3683_v42, %s4253_s7  ;;  %v3651_v31 = vrot.slane %v3635_v37, 9  ;;  %v1726_v44 = vrot.slane %v5031_v12, 5  ;;  %v1729_v62 = vrot.slane %v5035_v36, 5  ;;  %v5106_v1 = vsel %vm1036_vm6, %v3652_v47, %v4883_v3  ;;  %v3728_v12 = vld [vmem:[%s4336_s5 + $0x78] sm:$0xf] }
  0xdb   : > { %v1362_v4 = vsel %vm4396_vm5, %v1357_v52, %v1361_v27  ;;  %v755_v55 = vsel %vm4338_vm2, %v753_v53, %v754_v35  ;;  %v3643_v63 = vrot.slane %v3627_v45, 9  ;;  %v5114_v18 = vsel %vm1036_vm6, %v3524_v28, %v4911_v7  ;;  %v4111_v27 = vld [vmem:[%s4336_s5 + $0x70] sm:$0xf]  ;;  %v5130_v35 = vpop.permute.xlu0 %1008  ;;  %v3712_v43 = vld [vmem:[%s4336_s5 + $0x18] sm:$0xf]  ;;  %v5144_v8 = vpop.permute.xlu1 %1943 }
  0xdc   : > { %v3675_v36 = vcombine.low %v1352_v40, %v1362_v4  ;;  %v3563_v20 = vcombine.low %v752_v10, %v755_v55  ;;  %v1727_v19 = vsel %vm4338_vm2, %v3651_v31, %v1726_v44  ;;  %v1728_v57 = vrot.slane %v1726_v44, 4  ;;  %v5142_v53 = vld [vmem:[%s4336_s5 + $0x1c] sm:$0xf] }
  0xdd   : > { %v1670_v3 = vrot.slane %v5047_v25, 5  ;;  %v1673_v26 = vrot.slane %v5057_v51, 5  ;;  %v3660_v22 = vcombine.low %v4112_v29, %v4111_v27  ;;  %v3532_v7 = vcombine.low %v4114_v15, %v4113_v17 }
  0xde   : > { %1857 = vrot.lane.b32.xlu0 %v3675_v36, %s4253_s7  ;;  %1034 = vrot.lane.b32.xlu1 %v3571_v21, %s4252_s6  ;;  %v2485_v48 = vshrl.u32 %v3728_v12, 16  ;;  %v2488_v61 = vshll.u32 %v3728_v12, 16  ;;  %v2494_v25 = vshll.u32 %v5110_v14, 16  ;;  %v1730_v51 = vsel %vm4338_vm2, %v1728_v57, %v1729_v62 }
  0xdf   : > { %v1671_v37 = vsel %vm4338_vm2, %v3643_v63, %v1670_v3  ;;  %v1672_v42 = vrot.slane %v1670_v3, 4  ;;  %v1981_v40 = vsel %vm1036_vm6, %v3660_v22, %v4917_v32  ;;  %v3699_v10 = vcombine.low %v1727_v19, %v1730_v51  ;;  %v5151_v32 = vld [vmem:[%s4336_s5 + $0x20] sm:$0x1]  ;;  %v5158_v3 = vpop.permute.xlu0 %1927  ;;  %v3768_v51 = vld [vmem:[%s4336_s5 + $0x78] sm:$0xe] }
  0xe0   : > { %v1063_v45 = vsel %vm1036_vm6, %v3532_v7, %v4929_v24  ;;  %v2487_v52 = vrot.slane %v2485_v48, 4  ;;  %v2490_v21 = vrot.slane %v2488_v61, 5  ;;  %v2496_v47 = vrot.slane %v2494_v25, 5 }
  0xe1   : > { %v1674_v2 = vsel %vm4338_vm2, %v1672_v42, %v1673_v26  ;;  %v2498_v56 = vshrl.u32 %v5110_v14, 16  ;;  %v2504_v59 = vshll.u32 %v5127_v34, 16  ;;  %v2293_v31 = vshrl.u32 %v3712_v43, 16  ;;  %v4115_v42 = vld [vmem:[%s4336_s5 + $0x6c] sm:$0xf] }
  0xe2   : > { %1018 = vrot.lane.b32.xlu0 %v3563_v20, %s4252_s6  ;;  %1953 = vrot.lane.b32.xlu1 %v3699_v10, %s4252_s6  ;;  %v3691_v24 = vcombine.low %v1671_v37, %v1674_v2  ;;  %v2491_v28 = vor.u32 %v2490_v21, %v2487_v52  ;;  %v2296_v44 = vshll.u32 %v3712_v43, 16  ;;  %v2302_v55 = vshll.u32 %v5142_v53, 16  ;;  %v4116_v43 = vld [vmem:[%s4336_s5 + $0x70] sm:$0xf] }
  0xe3   : > { %v2500_v62 = vrot.slane %v2498_v56, 4  ;;  %v2506_v4 = vrot.slane %v2504_v59, 5  ;;  %v2306_v63 = vshrl.u32 %v5142_v53, 16  ;;  %v2295_v36 = vrot.slane %v2293_v31, 4  ;;  %v5165_v7 = vpop.permute.xlu1 %946 }
  0xe4   : > { %v2492_v12 = vrot.slane %v2491_v28, 4  ;;  %v2298_v19 = vrot.slane %v2296_v44, 5  ;;  %v2312_v57 = vshll.u32 %v5151_v32, 16  ;;  %v2304_v26 = vrot.slane %v2302_v55, 5  ;;  %v4118_v28 = vld [vmem:[%s4336_s5 + $0x10] sm:$0xf] }
  0xe5   : > { %v2501_v20 = vor.u32 %v2500_v62, %v2496_v47  ;;  %v2308_v27 = vrot.slane %v2306_v63, 4  ;;  %v2020_v15 = vsel %vm1085_vm7, %v1981_v40, %v4856_v33  ;;  %v1103_v25 = vsel %vm1085_vm7, %v1063_v45, %v4835_v30  ;;  %v4063_v30 = vld [vmem:[%s6101_s1 + $0x10] sm:$0xff]  }
  0xe6   : > { %1937 = vrot.lane.b32.xlu0 %v3691_v24, %s4252_s6  ;;  %v2497_v29 = vsel %vm4396_vm5, %v2492_v12, %v2496_v47  ;;  %v2299_v22 = vor.u32 %v2298_v19, %v2295_v36  ;;  %v2314_v17 = vrot.slane %v2312_v57, 5  ;;  %3950 = vmatprep.subr.msk.bf16.mxu1 %vm2050_vm8, %v2020_v15  ;;  %v3533_v10 = vcombine.low %v4115_v42, %v4116_v43  ;;  %v4117_v24 = vld [vmem:[%s4336_s5 + $0xc] sm:$0xf]  ;;  %v5208_v36 = vld [vmem:[%s4336_s5 + $0x88] sm:$0xf]  ;;  %v4064_v43 = vld [vmem:[%s6101_s1] sm:$0xff]  }
  0xe7   : > { %v2502_v48 = vrot.slane %v2501_v20, 4  ;;  %v2309_v61 = vor.u32 %v2308_v27, %v2304_v26  ;;  %3958 = vmatprep.subr.msk.bf16.mxu0 %vm2050_vm8, %v1103_v25  ;;  %v2004_v33 = vsel %vm1085_vm7, %v5106_v1, %v4871_v54  ;;  %v1087_v40 = vsel %vm1085_vm7, %v5114_v18, %v4848_v23  ;;  %v3760_v54 = vld [vmem:[%s4336_s5 + $0x18] sm:$0xe]  ;;  %v5194_v56 = vpop.permute.xlu0 %930  ;;  %3874 = vmatprep.mubr.msk.bf16.mxu1 %vm2050_vm8, %v4063_v30  ;;  %v5224_v15 = vld [vmem:[%s4336_s5 + $0x8c] sm:$0x1] }
  0xe8   : > { %v2300_v37 = vrot.slane %v2299_v22, 4  ;;  %v2057_v21 = vsel %vm2050_vm8, %v2004_v33, 0  ;;  %v2158_v2 = vsel %vm2050_vm8, %v1087_v40, 0  ;;  %v5192_v23 = vsel %vm1036_vm6, %v3533_v10, %v4943_v50  ;;  %v3730_v50 = vld [vmem:[%s4336_s5 + $0x84] sm:$0xf]  ;;  %3894 = vmatprep.mubr.msk.bf16.mxu0 %vm2050_vm8, %v4064_v43 }
  0xe9   : > { %v2507_v45 = vsel %vm4396_vm5, %v2502_v48, %v2506_v4  ;;  %v2310_v52 = vrot.slane %v2309_v61, 4  ;;  %3859 = vmatpush3.bf16.xpose.msra.mxu1 %v2057_v21  ;;  %3879 = vmatpush3.bf16.xpose.msra.mxu0 %v2158_v2  ;;  %v3784_v18 = vrot.slane %v3768_v51, 9  ;;  %v3525_v31 = vcombine.low %v4117_v24, %v4118_v28  ;;  %v4119_v20 = vld [vmem:[%s4336_s5 + $0x78] sm:$0xf]  ;;  %v4122_v22 = vld [vmem:[%s4336_s5 + $0x1c] sm:$0xf] }
  0xea   : > { %v3816_v1 = vcombine.low %v2497_v29, %v2507_v45  ;;  %v2305_v47 = vsel %vm4396_vm5, %v2300_v37, %v2304_v26  ;;  %v2798_v44 = vrot.slane %v5110_v14, 5  ;;  %v2801_v62 = vrot.slane %v5127_v34, 5  ;;  %v4120_v26 = vld [vmem:[%s4336_s5 + $0x7c] sm:$0xf]  ;;  %v4121_v29 = vld [vmem:[%s4336_s5 + $0x18] sm:$0xf] }
  0xeb   : > { %v2315_v59 = vsel %vm4396_vm5, %v2310_v52, %v2314_v17  ;;  %v3776_v55 = vrot.slane %v3760_v54, 9  ;;  %v2742_v63 = vrot.slane %v5142_v53, 5  ;;  %v2745_v12 = vrot.slane %v5151_v32, 5  ;;  %v5210_v14 = vpop.permute.xlu1 %1865  ;;  %v3714_v48 = vld [vmem:[%s4336_s5 + $0x24] sm:$0xf] }
  0xec   : > { %2980 = vrot.lane.b32.xlu1 %v3816_v1, %s4253_s7  ;;  %v3808_v4 = vcombine.low %v2305_v47, %v2315_v59  ;;  %v1042_v34 = vsel %vm1036_vm6, %v3525_v31, %v4958_v16  ;;  %v2799_v19 = vsel %vm4338_vm2, %v3784_v18, %v2798_v44  ;;  %v2800_v57 = vrot.slane %v2798_v44, 4  ;;  %v3715_v42 = vld [vmem:[%s4336_s5 + $0x28] sm:$0xf]  ;;  %v5245_v45 = vld [vmem:[%s4336_s5 + $0x2c] sm:$0x1] }
  0xed   : > { %v3661_v27 = vcombine.low %v4119_v20, %v4120_v26  ;;  %v2743_v53 = vsel %vm4338_vm2, %v3776_v55, %v2742_v63  ;;  %v2744_v32 = vrot.slane %v2742_v63, 4  ;;  %v3653_v17 = vcombine.low %v4121_v29, %v4122_v22  ;;  %v3761_v26 = vld [vmem:[%s4336_s5 + $0x24] sm:$0xe] }
  0xee   : > { %2964 = vrot.lane.b32.xlu0 %v3808_v4, %s4253_s7  ;;  %v2509_v16 = vshrl.u32 %v3730_v50, 16  ;;  %v2802_v61 = vsel %vm4338_vm2, %v2800_v57, %v2801_v62  ;;  %v2512_v51 = vshll.u32 %v3730_v50, 16  ;;  %v2518_v37 = vshll.u32 %v5208_v36, 16  ;;  %v3769_v62 = vld [vmem:[%s4336_s5 + $0x84] sm:$0xe] }
  0xef   : > { %v5231_v25 = vsel %vm1036_vm6, %v3661_v27, %v4962_v46  ;;  %v3832_v10 = vcombine.low %v2799_v19, %v2802_v61  ;;  %v2746_v33 = vsel %vm4338_vm2, %v2744_v32, %v2745_v12  ;;  %v5242_v40 = vsel %vm1036_vm6, %v3653_v17, %v4977_v6  ;;  %v5247_v46 = vpop.permute.xlu0 %1849  ;;  %v5253_v59 = vpop.permute.xlu1 %1026 }
  0xf0   : > { %v2511_v30 = vrot.slane %v2509_v16, 4  ;;  %v3824_v52 = vcombine.low %v2743_v53, %v2746_v33  ;;  %v2514_v21 = vrot.slane %v2512_v51, 5  ;;  %v2520_v2 = vrot.slane %v2518_v37, 5 }
  0xf1   : > { %v2522_v54 = vshrl.u32 %v5208_v36, 16  ;;  %3060 = vrot.lane.b32.xlu1 %v3832_v10, %s4252_s6  ;;  %v2528_v1 = vshll.u32 %v5224_v15, 16  ;;  %v2317_v47 = vshrl.u32 %v3714_v48, 16  ;;  %v2320_v6 = vshll.u32 %v3714_v48, 16 }
  0xf2   : > { %v2326_v18 = vshll.u32 %v3715_v42, 16  ;;  %3044 = vrot.lane.b32.xlu0 %v3824_v52, %s4252_s6  ;;  %v2515_v24 = vor.u32 %v2514_v21, %v2511_v30  ;;  %v2330_v31 = vshrl.u32 %v3715_v42, 16  ;;  %v2336_v44 = vshll.u32 %v5245_v45, 16  ;;  %v5283_v21 = vld [vmem:[%s4336_s5 + $0x94] sm:$0xf] }
  0xf3   : > { %v2524_v28 = vrot.slane %v2522_v54, 4  ;;  %v2530_v50 = vrot.slane %v2528_v1, 5  ;;  %v2319_v4 = vrot.slane %v2317_v47, 4  ;;  %v2322_v55 = vrot.slane %v2320_v6, 5  ;;  %v5264_v22 = vpop.permute.xlu0 %1010  ;;  %v5292_v6 = vld [vmem:[%s4336_s5 + $0x98] sm:$0x1] }
  0xf4   : > { %v2328_v63 = vrot.slane %v2326_v18, 5  ;;  %v2516_v12 = vrot.slane %v2515_v24, 4  ;;  %v2332_v57 = vrot.slane %v2330_v31, 4  ;;  %v2338_v20 = vrot.slane %v2336_v44, 5  ;;  %v3716_v44 = vld [vmem:[%s4336_s5 + $0x30] sm:$0xf] }
  0xf5   : > { %v2525_v19 = vor.u32 %v2524_v28, %v2520_v2  ;;  %v2323_v27 = vor.u32 %v2322_v55, %v2319_v4  ;;  %v1105_v53 = vsel %vm1085_vm7, %v5192_v23, %v4997_v9  ;;  %v1089_v32 = vsel %vm1085_vm7, %v1042_v34, %v5016_v38  ;;  %v5271_v38 = vpop.permute.xlu1 %1945 }
  0xf6   : > { %v3785_v29 = vrot.slane %v3769_v62, 9  ;;  %v2521_v17 = vsel %vm4396_vm5, %v2516_v12, %v2520_v2  ;;  %v2333_v48 = vor.u32 %v2332_v57, %v2328_v63  ;;  %v2805_v61 = vrot.slane %v5208_v36, 5  ;;  %3959 = vmatprep.subr.msk.bf16.mxu0 %vm2050_vm8, %v1105_v53  ;;  %v3732_v36 = vld [vmem:[%s4336_s5 + $0x90] sm:$0xf]  ;;  %v5315_v57 = vld [vmem:[%s4336_s5 + $0x38] sm:$0x1] }
  0xf7   : > { %v2526_v16 = vrot.slane %v2525_v19, 4  ;;  %v2324_v51 = vrot.slane %v2323_v27, 4  ;;  %v2808_v9 = vrot.slane %v5224_v15, 5  ;;  %v3777_v23 = vrot.slane %v3761_v26, 9  ;;  %v5299_v62 = vpop.permute.xlu0 %1929 }
  0xf8   : > { %v2749_v37 = vrot.slane %v3715_v42, 5  ;;  %v2334_v43 = vrot.slane %v2333_v48, 4  ;;  %v2806_v10 = vsel %vm4338_vm2, %v3785_v29, %v2805_v61  ;;  %v2807_v33 = vrot.slane %v2805_v61, 4 }
  0xf9   : > { %v2531_v34 = vsel %vm4396_vm5, %v2526_v16, %v2530_v50  ;;  %v2329_v52 = vsel %vm4396_vm5, %v2324_v51, %v2328_v63  ;;  %v2752_v1 = vrot.slane %v5245_v45, 5  ;;  %v2160_v47 = vsel %vm2050_vm8, %v1089_v32, 0  ;;  %v5309_v63 = vld [vmem:[%s4336_s5 + $0x34] sm:$0xf] }
  0xfa   : > { %v3817_v30 = vcombine.low %v2521_v17, %v2531_v34  ;;  %v2750_v15 = vsel %vm4338_vm2, %v3777_v23, %v2749_v37  ;;  %v2751_v42 = vrot.slane %v2749_v37, 4  ;;  %v2339_v2 = vsel %vm4396_vm5, %v2334_v43, %v2338_v20  ;;  %3881 = vmatpush3.bf16.xpose.msra.mxu0 %v2160_v47  ;;  %v5317_v20 = vpop.permute.xlu1 %948  ;;  %v4126_v47 = vld [vmem:[%s4336_s5 + $0x1c] sm:$0xf] }
  0xfb   : > { %v2809_v54 = vsel %vm4338_vm2, %v2807_v33, %v2808_v9  ;;  %v3809_v18 = vcombine.low %v2329_v52, %v2339_v2  ;;  %v2022_v28 = vsel %vm1085_vm7, %v5231_v25, %v5025_v58  ;;  %v2533_v31 = vshrl.u32 %v3732_v36, 16  ;;  %v3770_v9 = vld [vmem:[%s4336_s5 + $0x90] sm:$0xe]  ;;  %v4123_v52 = vld [vmem:[%s4336_s5 + $0x78] sm:$0xf] }
  0xfc   : > { %2982 = vrot.lane.b32.xlu1 %v3817_v30, %s4253_s7  ;;  %v3833_v24 = vcombine.low %v2806_v10, %v2809_v54  ;;  %v2753_v45 = vsel %vm4338_vm2, %v2751_v42, %v2752_v1  ;;  %v2006_v50 = vsel %vm1085_vm7, %v5242_v40, %v5039_v13  ;;  %v2536_v4 = vshll.u32 %v3732_v36, 16  ;;  %3951 = vmatprep.subr.msk.bf16.mxu1 %vm2050_vm8, %v2022_v28  ;;  %v4125_v1 = vld [vmem:[%s4336_s5 + $0x18] sm:$0xf] }
  0xfd   : > { %v2542_v55 = vshll.u32 %v5283_v21, 16  ;;  %2966 = vrot.lane.b32.xlu0 %v3809_v18, %s4253_s7  ;;  %v3825_v58 = vcombine.low %v2750_v15, %v2753_v45  ;;  %v2535_v25 = vrot.slane %v2533_v31, 4  ;;  %v2546_v12 = vshrl.u32 %v5283_v21, 16  ;;  %v4124_v15 = vld [vmem:[%s4336_s5 + $0x7c] sm:$0xf] }
  0xfe   : > { %v2552_v19 = vshll.u32 %v5292_v6, 16  ;;  %v2538_v13 = vrot.slane %v2536_v4, 5  ;;  %v2341_v26 = vshrl.u32 %v3716_v44, 16  ;;  %v2344_v27 = vshll.u32 %v3716_v44, 16  ;;  %v5326_v10 = vpop.permute.xlu0 %932  ;;  %v3762_v4 = vld [vmem:[%s4336_s5 + $0x30] sm:$0xe] }
  0xff   : > { %v2544_v40 = vrot.slane %v2542_v55, 5  ;;  %v2548_v53 = vrot.slane %v2546_v12, 4  ;;  %v2350_v29 = vshll.u32 %v5309_v63, 16  ;;  %v2354_v17 = vshrl.u32 %v5309_v63, 16 }
 0x100   : > { %3062 = vrot.lane.b32.xlu1 %v3833_v24, %s4252_s6  ;;  %v2554_v32 = vrot.slane %v2552_v19, 5  ;;  %v2539_v16 = vor.u32 %v2538_v13, %v2535_v25  ;;  %v2343_v48 = vrot.slane %v2341_v26, 4  ;;  %v2346_v61 = vrot.slane %v2344_v27, 5 }
 0x101   : > { %v2360_v51 = vshll.u32 %v5315_v57, 16  ;;  %3046 = vrot.lane.b32.xlu0 %v3825_v58, %s4252_s6  ;;  %v2549_v23 = vor.u32 %v2548_v53, %v2544_v40  ;;  %v2352_v37 = vrot.slane %v2350_v29, 5  ;;  %v2356_v34 = vrot.slane %v2354_v17, 4  ;;  %v5359_v53 = vld [vmem:[%s4336_s5 + $0xa0] sm:$0xf] }
 0x102   : > { %v2059_v43 = vsel %vm2050_vm8, %v2006_v50, 0  ;;  %v2540_v33 = vrot.slane %v2539_v16, 4  ;;  %v2347_v36 = vor.u32 %v2346_v61, %v2343_v48  ;;  %v3534_v42 = vcombine.low %v4123_v52, %v4124_v15  ;;  %v4127_v16 = vld [vmem:[%s4336_s5 + $0x84] sm:$0xf]  ;;  %v4128_v48 = vld [vmem:[%s4336_s5 + $0x88] sm:$0xf] }
 0x103   : > { %v2362_v30 = vrot.slane %v2360_v51, 5  ;;  %3861 = vmatpush3.bf16.xpose.msra.mxu1 %v2059_v43  ;;  %v2550_v2 = vrot.slane %v2549_v23, 4  ;;  %v2357_v54 = vor.u32 %v2356_v34, %v2352_v37  ;;  %v3526_v18 = vcombine.low %v4125_v1, %v4126_v47  ;;  %v4129_v51 = vld [vmem:[%s4336_s5 + $0x24] sm:$0xf] }
 0x104   : > { %v3786_v24 = vrot.slane %v3770_v9, 9  ;;  %v5332_v28 = vpop.permute.xlu1 %1867  ;;  %v2545_v31 = vsel %vm4396_vm5, %v2540_v33, %v2544_v40  ;;  %v2348_v44 = vrot.slane %v2347_v36, 4  ;;  %v5338_v45 = vsel %vm1036_vm6, %v3534_v42, %v5049_v41  ;;  %v3734_v40 = vld [vmem:[%s4336_s5 + $0x9c] sm:$0xf]  ;;  %v4130_v9 = vld [vmem:[%s4336_s5 + $0x28] sm:$0xf] }
 0x105   : > { %v2812_v50 = vrot.slane %v5283_v21, 5  ;;  %v2555_v55 = vsel %vm4396_vm5, %v2550_v2, %v2554_v32  ;;  %v2358_v58 = vrot.slane %v2357_v54, 4  ;;  %v5346_v25 = vsel %vm1036_vm6, %v3526_v18, %v5064_v39  ;;  %v5371_v23 = vld [vmem:[%s4336_s5 + $0xa4] sm:$0x1]  ;;  %v3718_v33 = vld [vmem:[%s4336_s5 + $0x3c] sm:$0xf] }
 0x106   : > { %v2815_v12 = vrot.slane %v5292_v6, 5  ;;  %v3818_v19 = vcombine.low %v2545_v31, %v2555_v55  ;;  %v2353_v41 = vsel %vm4396_vm5, %v2348_v44, %v2352_v37  ;;  %v3778_v26 = vrot.slane %v3762_v4, 9  ;;  %v5387_v2 = vld [vmem:[%s4336_s5 + $0x40] sm:$0xf] }
 0x107   : > { %v2813_v21 = vsel %vm4338_vm2, %v3786_v24, %v2812_v50  ;;  %v2814_v13 = vrot.slane %v2812_v50, 4  ;;  %v2363_v39 = vsel %vm4396_vm5, %v2358_v58, %v2362_v30  ;;  %v2756_v27 = vrot.slane %v5309_v63, 5  ;;  %v5394_v24 = vld [vmem:[%s4336_s5 + $0x44] sm:$0x1] }
 0x108   : > { %v2759_v6 = vrot.slane %v5315_v57, 5  ;;  %v5361_v32 = vpop.permute.xlu0 %1851  ;;  %2984 = vrot.lane.b32.xlu1 %v3818_v19, %s4253_s7  ;;  %v3810_v29 = vcombine.low %v2353_v41, %v2363_v39  ;;  %v3662_v61 = vcombine.low %v4127_v16, %v4128_v48  ;;  %v3654_v63 = vcombine.low %v4129_v51, %v4130_v9  ;;  %v5376_v36 = vpop.permute.xlu1 %1028 }
 0x109   : > { %v2816_v17 = vsel %vm4338_vm2, %v2814_v13, %v2815_v12  ;;  %v2757_v37 = vsel %vm4338_vm2, %v3778_v26, %v2756_v27  ;;  %v2758_v34 = vrot.slane %v2756_v27, 4  ;;  %v2557_v43 = vshrl.u32 %v3734_v40, 16 }
 0x10a   : > { %v3834_v57 = vcombine.low %v2813_v21, %v2816_v17  ;;  %2968 = vrot.lane.b32.xlu0 %v3810_v29, %s4253_s7  ;;  %v1987_v30 = vsel %vm1036_vm6, %v3662_v61, %v5073_v11  ;;  %v5383_v52 = vsel %vm1036_vm6, %v3654_v63, %v5089_v49  ;;  %v2560_v15 = vshll.u32 %v3734_v40, 16  ;;  %v3771_v40 = vld [vmem:[%s4336_s5 + $0x9c] sm:$0xe] }
 0x10b   : > { %v2566_v42 = vshll.u32 %v5359_v53, 16  ;;  %v2760_v54 = vsel %vm4338_vm2, %v2758_v34, %v2759_v6  ;;  %v2559_v1 = vrot.slane %v2557_v43, 4  ;;  %v2570_v47 = vshrl.u32 %v5359_v53, 16  ;;  %v3763_v29 = vld [vmem:[%s4336_s5 + $0x3c] sm:$0xe] }
 0x10c   : > { %v2576_v18 = vshll.u32 %v5371_v23, 16  ;;  %3064 = vrot.lane.b32.xlu1 %v3834_v57, %s4252_s6  ;;  %v3826_v11 = vcombine.low %v2757_v37, %v2760_v54  ;;  %v2562_v49 = vrot.slane %v2560_v15, 5  ;;  %v2365_v44 = vshrl.u32 %v3718_v33, 16  ;;  %v5398_v12 = vpop.permute.xlu0 %1012  ;;  %v5408_v17 = vpop.permute.xlu1 %1947 }
 0x10d   : > { %v2568_v31 = vrot.slane %v2566_v42, 5  ;;  %v2572_v50 = vrot.slane %v2570_v47, 4  ;;  %v2368_v55 = vshll.u32 %v3718_v33, 16  ;;  %v2374_v58 = vshll.u32 %v5387_v2, 16  ;;  %v5427_v47 = vld [vmem:[%s4336_s5 + $0xa8] sm:$0xf] }
 0x10e   : > { %v2578_v4 = vrot.slane %v2576_v18, 5  ;;  %3048 = vrot.lane.b32.xlu0 %v3826_v11, %s4252_s6  ;;  %v2563_v19 = vor.u32 %v2562_v49, %v2559_v1  ;;  %v2367_v41 = vrot.slane %v2365_v44, 4  ;;  %v2378_v21 = vshrl.u32 %v5387_v2, 16  ;;  %6114 = vst [vmem:[#allocation5_spill] sm:$0xff] %v5427_v47  ;;  %v5437_v44 = vld [vmem:[%s4336_s5 + $0xac] sm:$0xf] }
 0x10f   : > { %v2384_v13 = vshll.u32 %v5394_v24, 16  ;;  %v2573_v39 = vor.u32 %v2572_v50, %v2568_v31  ;;  %v2370_v26 = vrot.slane %v2368_v55, 5  ;;  %v2376_v27 = vrot.slane %v2374_v58, 5  ;;  %v5440_v50 = vld [vmem:[%s4336_s5 + $0xb0] sm:$0x1] }
 0x110   : > { %v1107_v6 = vsel %vm1085_vm7, %v5338_v45, %v5098_v5  ;;  %v2564_v16 = vrot.slane %v2563_v19, 4  ;;  %v2380_v48 = vrot.slane %v2378_v21, 4  ;;  %v1091_v51 = vsel %vm1085_vm7, %v5346_v25, %v5130_v35  ;;  %v5422_v42 = vpop.permute.xlu0 %1931 }
 0x111   : > { %v2386_v61 = vrot.slane %v2384_v13, 5  ;;  %3960 = vmatprep.subr.msk.bf16.mxu0 %vm2050_vm8, %v1107_v6  ;;  %v2574_v9 = vrot.slane %v2573_v39, 4  ;;  %v2371_v63 = vor.u32 %v2370_v26, %v2367_v41  ;;  %v3787_v57 = vrot.slane %v3771_v40, 9  ;;  %v5464_v6 = vld [vmem:[%s4336_s5 + $0x4c] sm:$0xf] }
 0x112   : > { %v2819_v37 = vrot.slane %v5359_v53, 5  ;;  %v2569_v5 = vsel %vm4396_vm5, %v2564_v16, %v2568_v31  ;;  %v2381_v45 = vor.u32 %v2380_v48, %v2376_v27  ;;  %v2822_v34 = vrot.slane %v5371_v23, 5  ;;  %6116 = vst [vmem:[#allocation7_spill] sm:$0xff] %v5464_v6  ;;  %v5468_v16 = vld [vmem:[%s4336_s5 + $0x50] sm:$0x1] }
 0x113   : > { %v3779_v43 = vrot.slane %v3763_v29, 9  ;;  %v2579_v35 = vsel %vm4396_vm5, %v2574_v9, %v2578_v4  ;;  %v2372_v25 = vrot.slane %v2371_v63, 4  ;;  %v2763_v1 = vrot.slane %v5387_v2, 5  ;;  %v5442_v4 = vpop.permute.xlu1 %950 }
 0x114   : > { %v2820_v33 = vsel %vm4338_vm2, %v3787_v57, %v2819_v37  ;;  %v2821_v15 = vrot.slane %v2819_v37, 4  ;;  %v3819_v53 = vcombine.low %v2569_v5, %v2579_v35  ;;  %v2382_v54 = vrot.slane %v2381_v45, 4 }
 0x115   : > { %v2766_v23 = vrot.slane %v5394_v24, 5  ;;  %v2377_v18 = vsel %vm4396_vm5, %v2372_v25, %v2376_v27  ;;  %v2162_v49 = vsel %vm2050_vm8, %v1091_v51, 0  ;;  %v2024_v31 = vsel %vm1085_vm7, %v1987_v30, %v5144_v8  ;;  %v5450_v8 = vld [vmem:[%s4336_s5 + $0x48] sm:$0xf] }
 0x116   : > { %v2823_v11 = vsel %vm4338_vm2, %v2821_v15, %v2822_v34  ;;  %2986 = vrot.lane.b32.xlu1 %v3819_v53, %s4253_s7  ;;  %v2387_v24 = vsel %vm4396_vm5, %v2382_v54, %v2386_v61  ;;  %v2764_v58 = vsel %vm4338_vm2, %v3779_v43, %v2763_v1  ;;  %v2765_v19 = vrot.slane %v2763_v1, 4  ;;  %3883 = vmatpush3.bf16.xpose.msra.mxu0 %v2162_v49  ;;  %v5471_v61 = vpop.permute.xlu0 %934  ;;  %v3772_v53 = vld [vmem:[%s4336_s5 + $0xa8] sm:$0xe] }
 0x117   : > { %v3835_v55 = vcombine.low %v2820_v33, %v2823_v11  ;;  %6115 = vst [vmem:[#allocation6_spill] sm:$0xff] %v5450_v8  ;;  %v3811_v30 = vcombine.low %v2377_v18, %v2387_v24  ;;  %v2008_v41 = vsel %vm1085_vm7, %v5383_v52, %v5158_v3  ;;  %v2581_v21 = vshrl.u32 %v5427_v47, 16  ;;  %3952 = vmatprep.subr.msk.bf16.mxu1 %vm2050_vm8, %v2024_v31  ;;  %v4131_v18 = vld [vmem:[%s4336_s5 + $0x84] sm:$0xf]  ;;  %v4132_v11 = vld [vmem:[%s4336_s5 + $0x88] sm:$0xf] }
 0x118   : > { %v2584_v13 = vshll.u32 %v5427_v47, 16  ;;  %v2767_v40 = vsel %vm4338_vm2, %v2765_v19, %v2766_v23  ;;  %v2590_v39 = vshll.u32 %v5437_v44, 16  ;;  %v2594_v26 = vshrl.u32 %v5437_v44, 16  ;;  %v4134_v19 = vld [vmem:[%s4336_s5 + $0x28] sm:$0xf] }
 0x119   : > { %v2600_v27 = vshll.u32 %v5440_v50, 16  ;;  %2970 = vrot.lane.b32.xlu0 %v3811_v30, %s4253_s7  ;;  %v3827_v3 = vcombine.low %v2764_v58, %v2767_v40  ;;  %v2583_v52 = vrot.slane %v2581_v21, 4  ;;  %v2389_v48 = vshrl.u32 %v5450_v8, 16  ;;  %v4133_v58 = vld [vmem:[%s4336_s5 + $0x24] sm:$0xf] }
 0x11a   : > { %v2586_v29 = vrot.slane %v2584_v13, 5  ;;  %3066 = vrot.lane.b32.xlu1 %v3835_v55, %s4252_s6  ;;  %v2592_v51 = vrot.slane %v2590_v39, 5  ;;  %v2596_v9 = vrot.slane %v2594_v26, 4  ;;  %v2392_v57 = vshll.u32 %v5450_v8, 16  ;;  %v5477_v43 = vpop.permute.xlu1 %1869  ;;  %v3764_v21 = vld [vmem:[%s4336_s5 + $0x48] sm:$0xe] }
 0x11b   : > { %v2602_v63 = vrot.slane %v2600_v27, 5  ;;  %v2391_v5 = vrot.slane %v2389_v48, 4  ;;  %v2398_v45 = vshll.u32 %v5464_v6, 16  ;;  %v2402_v34 = vshrl.u32 %v5464_v6, 16 }
 0x11c   : > { %v2587_v37 = vor.u32 %v2586_v29, %v2583_v52  ;;  %v2597_v35 = vor.u32 %v2596_v9, %v2592_v51  ;;  %v2394_v25 = vrot.slane %v2392_v57, 5  ;;  %v2408_v33 = vshll.u32 %v5468_v16, 16 }
 0x11d   : > { %v2061_v15 = vsel %vm2050_vm8, %v2008_v41, 0  ;;  %3050 = vrot.lane.b32.xlu0 %v3827_v3, %s4252_s6  ;;  %v2400_v1 = vrot.slane %v2398_v45, 5  ;;  %v2404_v23 = vrot.slane %v2402_v34, 4  ;;  %v3535_v49 = vcombine.low %v4131_v18, %v4132_v11  ;;  %v5512_v45 = vld [vmem:[%s4336_s5 + $0xb4] sm:$0xf] }
 0x11e   : > { %v2588_v54 = vrot.slane %v2587_v37, 4  ;;  %3863 = vmatpush3.bf16.xpose.msra.mxu1 %v2061_v15  ;;  %v2598_v31 = vrot.slane %v2597_v35, 4  ;;  %v2395_v24 = vor.u32 %v2394_v25, %v2391_v5  ;;  %v2410_v55 = vrot.slane %v2408_v33, 5  ;;  %v5504_v57 = vpop.permute.xlu1 %1030  ;;  %v4135_v35 = vld [vmem:[%s4336_s5 + $0x90] sm:$0xf] }
 0x11f   : > { %v3527_v30 = vcombine.low %v4133_v58, %v4134_v19  ;;  %v2405_v13 = vor.u32 %v2404_v23, %v2400_v1  ;;  %v5492_v40 = vsel %vm1036_vm6, %v3535_v49, %v5165_v7  ;;  %v3788_v39 = vrot.slane %v3772_v53, 9  ;;  %v5494_v26 = vpop.permute.xlu0 %1853  ;;  %v4136_v25 = vld [vmem:[%s4336_s5 + $0x94] sm:$0xf]  ;;  %v4137_v15 = vld [vmem:[%s4336_s5 + $0x30] sm:$0xf] }
 0x120   : > { %v2593_v41 = vsel %vm4396_vm5, %v2588_v54, %v2592_v51  ;;  %v2603_v27 = vsel %vm4396_vm5, %v2598_v31, %v2602_v63  ;;  %v2396_v3 = vrot.slane %v2395_v24, 4  ;;  %v2826_v29 = vrot.slane %v5437_v44, 5  ;;  %v4138_v53 = vld [vmem:[%s4336_s5 + $0x34] sm:$0xf]  ;;  %v5530_v31 = vld [vmem:[%s4336_s5 + $0xbc] sm:$0x1] }
 0x121   : > { %v5500_v52 = vsel %vm1036_vm6, %v3527_v30, %v5194_v56  ;;  %v3820_v48 = vcombine.low %v2593_v41, %v2603_v27  ;;  %v2406_v7 = vrot.slane %v2405_v13, 4  ;;  %v2829_v51 = vrot.slane %v5440_v50, 5 }
 0x122   : > { %v3780_v9 = vrot.slane %v3764_v21, 9  ;;  %v2401_v63 = vsel %vm4396_vm5, %v2396_v3, %v2400_v1  ;;  %v2827_v56 = vsel %vm4338_vm2, %v3788_v39, %v2826_v29  ;;  %v2828_v37 = vrot.slane %v2826_v29, 4  ;;  %v5523_v1 = vld [vmem:[%s4336_s5 + $0xb8] sm:$0xf]  ;;  %v5558_v29 = vld [vmem:[%s4336_s5 + $0x5c] sm:$0x1] }
 0x123   : > { %v2770_v5 = vrot.slane %v5464_v6, 5  ;;  %2988 = vrot.lane.b32.xlu1 %v3820_v48, %s4253_s7  ;;  %v2411_v50 = vsel %vm4396_vm5, %v2406_v7, %v2410_v55  ;;  %v2773_v34 = vrot.slane %v5468_v16, 5  ;;  %v3663_v33 = vcombine.low %v4135_v35, %v4136_v25  ;;  %v5533_v16 = vld [vmem:[%s4336_s5 + $0x54] sm:$0xf]  ;;  %v5544_v30 = vpop.permute.xlu0 %1014  ;;  %v5553_v39 = vld [vmem:[%s4336_s5 + $0x58] sm:$0xf]  ;;  %v5561_v7 = vpop.permute.xlu1 %1949 }
 0x124   : > { %v3655_v54 = vcombine.low %v4137_v15, %v4138_v53  ;;  %v3812_v23 = vcombine.low %v2401_v63, %v2411_v50  ;;  %v2830_v18 = vsel %vm4338_vm2, %v2828_v37, %v2829_v51  ;;  %v2605_v19 = vshrl.u32 %v5512_v45, 16  ;;  %v3773_v53 = vld [vmem:[%s4336_s5 + $0xb4] sm:$0xe] }
 0x125   : > { %v2771_v11 = vsel %vm4338_vm2, %v3780_v9, %v2770_v5  ;;  %v2772_v49 = vrot.slane %v2770_v5, 4  ;;  %v3836_v24 = vcombine.low %v2827_v56, %v2830_v18  ;;  %v5537_v55 = vsel %vm1036_vm6, %v3663_v33, %v5210_v14 }
 0x126   : > { %v5541_v58 = vsel %vm1036_vm6, %v3655_v54, %v5247_v46  ;;  %2972 = vrot.lane.b32.xlu0 %v3812_v23, %s4253_s7  ;;  %v2608_v41 = vshll.u32 %v5512_v45, 16  ;;  %v2614_v13 = vshll.u32 %v5523_v1, 16  ;;  %v2618_v14 = vshrl.u32 %v5523_v1, 16 }
 0x127   : > { %v2774_v21 = vsel %vm4338_vm2, %v2772_v49, %v2773_v34  ;;  %3068 = vrot.lane.b32.xlu1 %v3836_v24, %s4252_s6  ;;  %v2607_v27 = vrot.slane %v2605_v19, 4  ;;  %v2624_v3 = vshll.u32 %v5530_v31, 16  ;;  %v2413_v48 = vshrl.u32 %v5533_v16, 16  ;;  %v3765_v49 = vld [vmem:[%s4336_s5 + $0x54] sm:$0xe]  ;;  %v5576_v24 = vpop.permute.xlu0 %1933 }
 0x128   : > { %v3828_v46 = vcombine.low %v2771_v11, %v2774_v21  ;;  %v2610_v51 = vrot.slane %v2608_v41, 5  ;;  %v2616_v9 = vrot.slane %v2614_v13, 5  ;;  %v2620_v63 = vrot.slane %v2618_v14, 4 }
 0x129   : > { %v2416_v56 = vshll.u32 %v5533_v16, 16  ;;  %v2626_v37 = vrot.slane %v2624_v3, 5  ;;  %v2415_v5 = vrot.slane %v2413_v48, 4  ;;  %v2422_v50 = vshll.u32 %v5553_v39, 16 }
 0x12a   : > { %v2426_v34 = vshrl.u32 %v5553_v39, 16  ;;  %3052 = vrot.lane.b32.xlu0 %v3828_v46, %s4252_s6  ;;  %v2611_v35 = vor.u32 %v2610_v51, %v2607_v27  ;;  %v2621_v25 = vor.u32 %v2620_v63, %v2616_v9  ;;  %v2432_v15 = vshll.u32 %v5558_v29, 16  ;;  %v5588_v51 = vld [vmem:[%s4336_s5 + $0xc0] sm:$0xf] }
 0x12b   : > { %v2418_v33 = vrot.slane %v2416_v56, 5  ;;  %v2424_v54 = vrot.slane %v2422_v50, 5  ;;  %v1109_v18 = vsel %vm1085_vm7, %v5492_v40, %v5253_v59  ;;  %v1093_v11 = vsel %vm1085_vm7, %v5500_v52, %v5264_v22  ;;  %v5581_v40 = vpop.permute.xlu1 %952 }
 0x12c   : > { %v2428_v23 = vrot.slane %v2426_v34, 4  ;;  %v2612_v19 = vrot.slane %v2611_v35, 4  ;;  %v2622_v21 = vrot.slane %v2621_v25, 4  ;;  %v2434_v13 = vrot.slane %v2432_v15, 5  ;;  %3961 = vmatprep.subr.msk.bf16.mxu0 %vm2050_vm8, %v1109_v18  ;;  %v5598_v35 = vld [vmem:[%s4336_s5 + $0xc4] sm:$0xf] }
 0x12d   : > { %v2419_v41 = vor.u32 %v2418_v33, %v2415_v5  ;;  %v3789_v46 = vrot.slane %v3773_v53, 9  ;;  %v2833_v27 = vrot.slane %v5523_v1, 5  ;;  %v2836_v59 = vrot.slane %v5530_v31, 5  ;;  %v5609_v53 = vld [vmem:[%s4336_s5 + $0xc8] sm:$0x1] }
 0x12e   : > { %v2429_v14 = vor.u32 %v2428_v23, %v2424_v54  ;;  %v2617_v22 = vsel %vm4396_vm5, %v2612_v19, %v2616_v9  ;;  %v2627_v52 = vsel %vm4396_vm5, %v2622_v21, %v2626_v37  ;;  %v3781_v48 = vrot.slane %v3765_v49, 9 }
 0x12f   : > { %v2420_v3 = vrot.slane %v2419_v41, 4  ;;  %v3821_v63 = vcombine.low %v2617_v22, %v2627_v52  ;;  %v2834_v5 = vsel %vm4338_vm2, %v3789_v46, %v2833_v27  ;;  %v2835_v31 = vrot.slane %v2833_v27, 4  ;;  %v5615_v23 = vpop.permute.xlu0 %936 }
 0x130   : > { %v2430_v56 = vrot.slane %v2429_v14, 4  ;;  %v2777_v9 = vrot.slane %v5553_v39, 5  ;;  %v2780_v34 = vrot.slane %v5558_v29, 5  ;;  %v2164_v37 = vsel %vm2050_vm8, %v1093_v11, 0 }
 0x131   : > { %v2425_v50 = vsel %vm4396_vm5, %v2420_v3, %v2424_v54  ;;  %2990 = vrot.lane.b32.xlu1 %v3821_v63, %s4253_s7  ;;  %v2837_v33 = vsel %vm4338_vm2, %v2835_v31, %v2836_v59  ;;  %3885 = vmatpush3.bf16.xpose.msra.mxu0 %v2164_v37  ;;  %v2026_v15 = vsel %vm1085_vm7, %v5537_v55, %v5271_v38  ;;  %v2629_v29 = vshrl.u32 %v5588_v51, 16  ;;  %v5613_v54 = vld [vmem:[%s4336_s5 + $0x60] sm:$0xf] }
 0x132   : > { %v2435_v25 = vsel %vm4396_vm5, %v2430_v56, %v2434_v13  ;;  %v3837_v11 = vcombine.low %v2834_v5, %v2837_v33  ;;  %v2778_v49 = vsel %vm4338_vm2, %v3781_v48, %v2777_v9  ;;  %v2779_v19 = vrot.slane %v2777_v9, 4  ;;  %3953 = vmatprep.subr.msk.bf16.mxu1 %vm2050_vm8, %v2026_v15  ;;  %v5626_v13 = vld [vmem:[%s4336_s5 + $0x64] sm:$0xf] }
 0x133   : > { %v3813_v18 = vcombine.low %v2425_v50, %v2435_v25  ;;  %v2010_v38 = vsel %vm1085_vm7, %v5541_v58, %v5299_v62  ;;  %v2631_v55 = vrot.slane %v2629_v29, 4  ;;  %v2632_v21 = vshll.u32 %v5588_v51, 16  ;;  %v5628_v14 = vpop.permute.xlu1 %1871  ;;  %v5636_v62 = vld [vmem:[%s4336_s5 + $0x68] sm:$0x1]  ;;  %v3774_v25 = vld [vmem:[%s4336_s5 + $0xc0] sm:$0xe] }
 0x134   : > { %v2638_v41 = vshll.u32 %v5598_v35, 16  ;;  %v2781_v46 = vsel %vm4338_vm2, %v2779_v19, %v2780_v34  ;;  %v2642_v27 = vshrl.u32 %v5598_v35, 16  ;;  %v2648_v59 = vshll.u32 %v5609_v53, 16 }
 0x135   : > { %2974 = vrot.lane.b32.xlu0 %v3813_v18, %s4253_s7  ;;  %v2437_v58 = vshrl.u32 %v5613_v54, 16  ;;  %3070 = vrot.lane.b32.xlu1 %v3837_v11, %s4252_s6  ;;  %v3829_v22 = vcombine.low %v2778_v49, %v2781_v46  ;;  %v2634_v52 = vrot.slane %v2632_v21, 5  ;;  %v2440_v48 = vshll.u32 %v5613_v54, 16  ;;  %v4139_v11 = vld [vmem:[%s4336_s5 + $0x90] sm:$0xf] }
 0x136   : > { %v2640_v3 = vrot.slane %v2638_v41, 5  ;;  %v2644_v63 = vrot.slane %v2642_v27, 4  ;;  %v2650_v56 = vrot.slane %v2648_v59, 5  ;;  %v2446_v31 = vshll.u32 %v5626_v13, 16  ;;  %v4140_v49 = vld [vmem:[%s4336_s5 + $0x94] sm:$0xf] }
 0x137   : > { %v2439_v5 = vrot.slane %v2437_v58, 4  ;;  %v2635_v50 = vor.u32 %v2634_v52, %v2631_v55  ;;  %v2442_v9 = vrot.slane %v2440_v48, 5  ;;  %v2450_v34 = vshrl.u32 %v5626_v13, 16  ;;  %v5645_v33 = vpop.permute.xlu0 %1855  ;;  %v3766_v27 = vld [vmem:[%s4336_s5 + $0x60] sm:$0xe]  ;;  %v5652_v59 = vpop.permute.xlu1 %1032 }
 0x138   : > { %v2456_v37 = vshll.u32 %v5636_v62, 16  ;;  %v2645_v15 = vor.u32 %v2644_v63, %v2640_v3  ;;  %v2448_v29 = vrot.slane %v2446_v31, 5  ;;  %v2063_v18 = vsel %vm2050_vm8, %v2010_v38, 0  ;;  %v4141_v52 = vld [vmem:[%s4336_s5 + $0x30] sm:$0xf] }
 0x139   : > { %3054 = vrot.lane.b32.xlu0 %v3829_v22, %s4252_s6  ;;  %v3536_v19 = vcombine.low %v4139_v11, %v4140_v49  ;;  %v2636_v55 = vrot.slane %v2635_v50, 4  ;;  %v2443_v21 = vor.u32 %v2442_v9, %v2439_v5  ;;  %v2452_v41 = vrot.slane %v2450_v34, 4  ;;  %3865 = vmatpush3.bf16.xpose.msra.mxu1 %v2063_v18  ;;  %v4142_v48 = vld [vmem:[%s4336_s5 + $0x34] sm:$0xf] }
 0x13a   : > { %v2458_v46 = vrot.slane %v2456_v37, 5  ;;  %v2646_v58 = vrot.slane %v2645_v15, 4  ;;  %v3528_v38 = vcombine.low %v4141_v52, %v4142_v48  ;;  %v3790_v63 = vrot.slane %v3774_v25, 9  ;;  %v5671_v15 = vld [vmem:[%s4336_s5 + $0xcc] sm:$0xf] }
 0x13b   : > { %v5656_v22 = vsel %vm1036_vm6, %v3536_v19, %v5317_v20  ;;  %v2641_v31 = vsel %vm4396_vm5, %v2636_v55, %v2640_v3  ;;  %v2444_v5 = vrot.slane %v2443_v21, 4  ;;  %v2453_v50 = vor.u32 %v2452_v41, %v2448_v29  ;;  %v5677_v49 = vpop.permute.xlu0 %1016  ;;  %v4143_v55 = vld [vmem:[%s4336_s5 + $0x9c] sm:$0xf]  ;;  %v4144_v21 = vld [vmem:[%s4336_s5 + $0xa0] sm:$0xf] }
 0x13c   : > { %v2840_v9 = vrot.slane %v5598_v35, 5  ;;  %v2651_v34 = vsel %vm4396_vm5, %v2646_v58, %v2650_v56  ;;  %v5667_v20 = vsel %vm1036_vm6, %v3528_v38, %v5326_v10  ;;  %v2843_v37 = vrot.slane %v5609_v53, 5  ;;  %v4146_v58 = vld [vmem:[%s4336_s5 + $0x40] sm:$0xf]  ;;  %v5689_v48 = vld [vmem:[%s4336_s5 + $0xd0] sm:$0xf] }
 0x13d   : > { %v3782_v25 = vrot.slane %v3766_v27, 9  ;;  %v3822_v3 = vcombine.low %v2641_v31, %v2651_v34  ;;  %v2449_v18 = vsel %vm4396_vm5, %v2444_v5, %v2448_v29  ;;  %v2454_v11 = vrot.slane %v2453_v50, 4  ;;  %v4145_v27 = vld [vmem:[%s4336_s5 + $0x3c] sm:$0xf]  ;;  %v5703_v34 = vld [vmem:[%s4336_s5 + $0x6c] sm:$0xf] }
 0x13e   : > { %v2841_v56 = vsel %vm4338_vm2, %v3790_v63, %v2840_v9  ;;  %v2842_v10 = vrot.slane %v2840_v9, 4  ;;  %v2784_v19 = vrot.slane %v5626_v13, 5  ;;  %v2787_v53 = vrot.slane %v5636_v62, 5  ;;  %v5693_v63 = vpop.permute.xlu1 %1951  ;;  %v5700_v9 = vld [vmem:[%s4336_s5 + $0xd4] sm:$0x1] }
 0x13f   : > { %v3664_v41 = vcombine.low %v4143_v55, %v4144_v21  ;;  %2992 = vrot.lane.b32.xlu1 %v3822_v3, %s4253_s7  ;;  %v2459_v29 = vsel %vm4396_vm5, %v2454_v11, %v2458_v46  ;;  %v3656_v52 = vcombine.low %v4145_v27, %v4146_v58  ;;  %v2653_v38 = vshrl.u32 %v5671_v15, 16  ;;  %v3751_v21 = vld [vmem:[%s4336_s5 + $0x74] sm:$0x1]  ;;  %v5726_v27 = vpop.permute.xlu0 %1935 }
 0x140   : > { %v2656_v62 = vshll.u32 %v5671_v15, 16  ;;  %v3814_v31 = vcombine.low %v2449_v18, %v2459_v29  ;;  %v2844_v5 = vsel %vm4338_vm2, %v2842_v10, %v2843_v37  ;;  %v2785_v50 = vsel %vm4338_vm2, %v3782_v25, %v2784_v19  ;;  %v5714_v37 = vld [vmem:[%s4336_s5 + $0x70] sm:$0xf] }
 0x141   : > { %v2786_v46 = vrot.slane %v2784_v19, 4  ;;  %v3838_v3 = vcombine.low %v2841_v56, %v2844_v5  ;;  %v5707_v11 = vsel %vm1036_vm6, %v3664_v41, %v5332_v28  ;;  %v5711_v18 = vsel %vm1036_vm6, %v3656_v52, %v5361_v32 }
 0x142   : > { %v2655_v55 = vrot.slane %v2653_v38, 4  ;;  %2976 = vrot.lane.b32.xlu0 %v3814_v31, %s4253_s7  ;;  %v2658_v10 = vrot.slane %v2656_v62, 5  ;;  %v2662_v19 = vshll.u32 %v5689_v48, 16  ;;  %v2666_v56 = vshrl.u32 %v5689_v48, 16 }
 0x143   : > { %v2788_v25 = vsel %vm4338_vm2, %v2786_v46, %v2787_v53  ;;  %3072 = vrot.lane.b32.xlu1 %v3838_v3, %s4252_s6  ;;  %v2672_v32 = vshll.u32 %v5700_v9, 16  ;;  %v2461_v41 = vshrl.u32 %v5703_v34, 16  ;;  %v2464_v29 = vshll.u32 %v5703_v34, 16  ;;  %v3775_v46 = vld [vmem:[%s4336_s5 + $0xcc] sm:$0xe]  ;;  %v5731_v3 = vpop.permute.xlu1 %954 }
 0x144   : > { %v3830_v28 = vcombine.low %v2785_v50, %v2788_v25  ;;  %v2659_v58 = vor.u32 %v2658_v10, %v2655_v55  ;;  %v2664_v53 = vrot.slane %v2662_v19, 5  ;;  %v2668_v52 = vrot.slane %v2666_v56, 4 }
 0x145   : > { %v2470_v38 = vshll.u32 %v5714_v37, 16  ;;  %v2674_v62 = vrot.slane %v2672_v32, 5  ;;  %v2463_v31 = vrot.slane %v2461_v41, 4  ;;  %v2466_v5 = vrot.slane %v2464_v29, 5  ;;  %v3767_v32 = vld [vmem:[%s4336_s5 + $0x6c] sm:$0xe] }
 0x146   : > { %v2474_v50 = vshrl.u32 %v5714_v37, 16  ;;  %3056 = vrot.lane.b32.xlu0 %v3830_v28, %s4252_s6  ;;  %v2660_v25 = vrot.slane %v2659_v58, 4  ;;  %v2669_v8 = vor.u32 %v2668_v52, %v2664_v53  ;;  %v2480_v47 = vshll.u32 %v3751_v21, 16 }
 0x147   : > { %v2472_v6 = vrot.slane %v2470_v38, 5  ;;  %v2467_v55 = vor.u32 %v2466_v5, %v2463_v31  ;;  %v1111_v19 = vsel %vm1085_vm7, %v5656_v22, %v5376_v36  ;;  %v1095_v56 = vsel %vm1085_vm7, %v5667_v20, %v5398_v12  ;;  %v5746_v36 = vpop.permute.xlu0 %938 }
 0x148   : > { %v2476_v10 = vrot.slane %v2474_v50, 4  ;;  %v2665_v41 = vsel %vm4396_vm5, %v2660_v25, %v2664_v53  ;;  %v2670_v29 = vrot.slane %v2669_v8, 4  ;;  %v2482_v28 = vrot.slane %v2480_v47, 5  ;;  %3962 = vmatprep.subr.msk.bf16.mxu0 %vm2050_vm8, %v1111_v19 }
 0x149   : > { %v3791_v58 = vrot.slane %v3775_v46, 9  ;;  %v2468_v52 = vrot.slane %v2467_v55, 4  ;;  %v2847_v31 = vrot.slane %v5689_v48, 5  ;;  %v2850_v5 = vrot.slane %v5700_v9, 5 }
 0x14a   : > { %v2477_v38 = vor.u32 %v2476_v10, %v2472_v6  ;;  %v2675_v12 = vsel %vm4396_vm5, %v2670_v29, %v2674_v62  ;;  %v3783_v22 = vrot.slane %v3767_v32, 9  ;;  %v2791_v20 = vrot.slane %v5714_v37, 5  ;;  %v4149_v29 = vld [vmem:[%s4336_s5 + $0x3c] sm:$0xf] }
 0x14b   : > { %v2794_v53 = vrot.slane %v3751_v21, 5  ;;  %v3823_v8 = vcombine.low %v2665_v41, %v2675_v12  ;;  %v2473_v47 = vsel %vm4396_vm5, %v2468_v52, %v2472_v6  ;;  %v2848_v46 = vsel %vm4338_vm2, %v3791_v58, %v2847_v31  ;;  %v4153_v12 = vld [vmem:[%s4336_s5 + $0x48] sm:$0xf] }
 0x14c   : > { %v2478_v50 = vrot.slane %v2477_v38, 4  ;;  %v5755_v25 = vpop.permute.xlu1 %1873  ;;  %v2849_v9 = vrot.slane %v2847_v31, 4  ;;  %v2792_v55 = vsel %vm4338_vm2, %v3783_v22, %v2791_v20  ;;  %v2793_v62 = vrot.slane %v2791_v20, 4  ;;  %v4151_v38 = vld [vmem:[%s4336_s5 + $0xa8] sm:$0xf] }
 0x14d   : > { %v2166_v10 = vsel %vm2050_vm8, %v1095_v56, 0  ;;  %2994 = vrot.lane.b32.xlu1 %v3823_v8, %s4253_s7  ;;  %v2028_v21 = vsel %vm1085_vm7, %v5707_v11, %v5408_v17  ;;  %v2012_v19 = vsel %vm1085_vm7, %v5711_v18, %v5422_v42  ;;  %v4147_v11 = vld [vmem:[%s4336_s5 + $0x9c] sm:$0xf]  ;;  %v4148_v42 = vld [vmem:[%s4336_s5 + $0xa0] sm:$0xf] }
 0x14e   : > { %v2483_v6 = vsel %vm4396_vm5, %v2478_v50, %v2482_v28  ;;  %3887 = vmatpush3.bf16.xpose.msra.mxu0 %v2166_v10  ;;  %v2851_v56 = vsel %vm4338_vm2, %v2849_v9, %v2850_v5  ;;  %v2795_v60 = vsel %vm4338_vm2, %v2793_v62, %v2794_v53  ;;  %3954 = vmatprep.subr.msk.bf16.mxu1 %vm2050_vm8, %v2028_v21  ;;  %v2065_v41 = vsel %vm2050_vm8, %v2012_v19, 0  ;;  %v4150_v28 = vld [vmem:[%s4336_s5 + $0x40] sm:$0xf]  ;;  %v4152_v31 = vld [vmem:[%s4336_s5 + $0xac] sm:$0xf] }
 0x14f   : > { %v3815_v32 = vcombine.low %v2473_v47, %v2483_v6  ;;  %v3839_v17 = vcombine.low %v2848_v46, %v2851_v56  ;;  %3867 = vmatpush3.bf16.xpose.msra.mxu1 %v2065_v41  ;;  %v3537_v18 = vcombine.low %v4147_v11, %v4148_v42  ;;  %v3529_v58 = vcombine.low %v4149_v29, %v4150_v28  ;;  %v4154_v22 = vld [vmem:[%s4336_s5 + $0x4c] sm:$0xf]  ;;  %v4155_v53 = vld [vmem:[%s4336_s5 + $0xa8] sm:$0xf]  ;;  %v4159_v10 = vld [vmem:[%s4336_s5 + $0xb4] sm:$0xf] }
 0x150   : > { %v5779_v0 = vpop.permute.xlu0 %1857  ;;  %v3831_v52 = vcombine.low %v2792_v55, %v2795_v60  ;;  %v3665_v5 = vcombine.low %v4151_v38, %v4152_v31  ;;  %v3657_v20 = vcombine.low %v4153_v12, %v4154_v22  ;;  %v4156_v8 = vld [vmem:[%s4336_s5 + $0xac] sm:$0xf]  ;;  %v4157_v9 = vld [vmem:[%s4336_s5 + $0x48] sm:$0xf]  ;;  %v4160_v6 = vld [vmem:[%s4336_s5 + $0xb8] sm:$0xf]  ;;  %v1035_v19 = vpop.permute.xlu1 %1034 }
 0x151   : > { %2978 = vrot.lane.b32.xlu0 %v3815_v32, %s4253_s7  ;;  %v3538_v47 = vcombine.low %v4155_v53, %v4156_v8  ;;  %3074 = vrot.lane.b32.xlu1 %v3839_v17, %s4252_s6  ;;  %v1078_v50 = vsel %vm1036_vm6, %v3537_v18, %v5442_v4  ;;  %v1054_v46 = vsel %vm1036_vm6, %v3529_v58, %v5471_v61  ;;  %v4158_v55 = vld [vmem:[%s4336_s5 + $0x4c] sm:$0xf]  ;;  %v4161_v17 = vld [vmem:[%s4336_s5 + $0x54] sm:$0xf] }
 0x152   : > { %v3530_v62 = vcombine.low %v4157_v9, %v4158_v55  ;;  %v3666_v21 = vcombine.low %v4159_v10, %v4160_v6  ;;  %v1996_v32 = vsel %vm1036_vm6, %v3665_v5, %v5477_v43  ;;  %v1972_v56 = vsel %vm1036_vm6, %v3657_v20, %v5494_v26  ;;  %v4162_v26 = vld [vmem:[%s4336_s5 + $0x58] sm:$0xf]  ;;  %v4163_v28 = vld [vmem:[%s4336_s5 + $0xb4] sm:$0xf] }
 0x153   : > { %v1113_v4 = vsel %vm1085_vm7, %v1078_v50, %v5504_v57  ;;  %v1097_v61 = vsel %vm1085_vm7, %v1054_v46, %v5544_v30  ;;  %v2030_v41 = vsel %vm1085_vm7, %v1996_v32, %v5561_v7  ;;  %v2014_v43 = vsel %vm1085_vm7, %v1972_v56, %v5576_v24  ;;  %v4164_v58 = vld [vmem:[%s4336_s5 + $0xb8] sm:$0xf]  ;;  %v4167_v22 = vld [vmem:[%s4336_s5 + $0x54] sm:$0xf]  ;;  %v4169_v50 = vld [vmem:[%s4336_s5 + $0x60] sm:$0xf] }
 0x154   : > { %3963 = vmatprep.subr.msk.bf16.mxu0 %vm2050_vm8, %v1113_v4  ;;  %v2168_v60 = vsel %vm2050_vm8, %v1097_v61, 0  ;;  %v3658_v11 = vcombine.low %v4161_v17, %v4162_v26  ;;  %v1019_v42 = vpop.permute.xlu0 %1018  ;;  %3955 = vmatprep.subr.msk.bf16.mxu1 %vm2050_vm8, %v2030_v41  ;;  %v2067_v57 = vsel %vm2050_vm8, %v2014_v43, 0  ;;  %v1081_v30 = vsel %vm1036_vm6, %v3538_v47, %v5581_v40  ;;  %v4168_v20 = vld [vmem:[%s4336_s5 + $0x58] sm:$0xf]  ;;  %v3271_v32 = vld [vmem:[%s6102_s2 + $0x8] sm:$0xff]  ;;  %v3270_v56 = vld [vmem:[%s6102_s2] sm:$0xff] }
 0x155   : > { %3058 = vrot.lane.b32.xlu0 %v3831_v52, %s4252_s6  ;;  %v1999_v7 = vsel %vm1036_vm6, %v3666_v21, %v5628_v14  ;;  %v1115_v24 = vsel %vm1085_vm7, %v1081_v30, %v5652_v59  ;;  %v1057_v29 = vsel %vm1036_vm6, %v3530_v62, %v5615_v23  ;;  %v3539_v40 = vcombine.low %v4163_v28, %v4164_v58  ;;  %v4165_v52 = vld [vmem:[%s4336_s5 + $0xc0] sm:$0xf]  ;;  %v1954_v23 = vpop.permute.xlu1 %1953  ;;  %v4171_v61 = vld [vmem:[%s4336_s5 + $0x78] sm:$0xf] }
 0x156   : > { %3889 = vmatpush3.bf16.xpose.msra.mxu0 %v2168_v60  ;;  %v2032_v18 = vsel %vm1085_vm7, %v1999_v7, %v5693_v63  ;;  %v1975_v14 = vsel %vm1036_vm6, %v3658_v11, %v5645_v33  ;;  %v1099_v59 = vsel %vm1085_vm7, %v1057_v29, %v5677_v49  ;;  %v4166_v63 = vld [vmem:[%s4336_s5 + $0xc4] sm:$0xf]  ;;  %v3531_v49 = vcombine.low %v4167_v22, %v4168_v20  ;;  %v4172_v60 = vld [vmem:[%s4336_s5 + $0x7c] sm:$0xf]  ;;  %v3272_v7 = vld [vmem:[%s6102_s2 + $0x10] sm:$0xff] }
 0x157   : > { %3964 = vmatprep.subr.msk.bf16.mxu0 %vm2050_vm8, %v1115_v24  ;;  %3869 = vmatpush3.bf16.xpose.msra.mxu1 %v2067_v57  ;;  %v3667_v38 = vcombine.low %v4165_v52, %v4166_v63  ;;  %v2016_v31 = vsel %vm1085_vm7, %v1975_v14, %v5726_v27  ;;  %v2170_v12 = vsel %vm2050_vm8, %v1099_v59, 0  ;;  %v1084_v33 = vsel %vm1036_vm6, %v3539_v40, %v5731_v3  ;;  %v4170_v27 = vld [vmem:[%s4336_s5 + $0x64] sm:$0xf]  ;;  %v4173_v57 = vld [vmem:[%s4336_s5 + $0x18] sm:$0xf]  ;;  %v3303_v52 = vld [vmem:[%s6103_s3 + $0x8] sm:$0xff] }
 0x158   : > { %3956 = vmatprep.subr.msk.bf16.mxu1 %vm2050_vm8, %v2032_v18  ;;  %v1938_v5 = vpop.permute.xlu0 %1937  ;;  %v2069_v53 = vsel %vm2050_vm8, %v2016_v31, 0  ;;  %v1117_v47 = vsel %vm1085_vm7, %v1084_v33, %v1035_v19  ;;  %v3659_v46 = vcombine.low %v4169_v50, %v4170_v27  ;;  %v3805_v3 = vcombine.low %v5512_v45, %v5523_v1  ;;  %v3302_v14 = vld [vmem:[%s6103_s3] sm:$0xff]  ;;  %v4080_v63 = vld [vmem:[%s6101_s1 + $0x8] sm:$0xff]   ;;  %v3304_v31 = vld [vmem:[%s6103_s3 + $0x10] sm:$0xff] }
 0x159   : > { %v2002_v8 = vsel %vm1036_vm6, %v3667_v38, %v5755_v25  ;;  %v3797_v55 = vcombine.low %v5533_v16, %v5553_v39  ;;  %v3806_v25 = vcombine.low %v5588_v51, %v5598_v35  ;;  %v3798_v10 = vcombine.low %v5613_v54, %v5626_v13  ;;  %v4177_v33 = vld [vmem:[%s4336_s5 + $0x88] sm:$0xf] }
 0x15a   : > { %v2034_v9 = vsel %vm1085_vm7, %v2002_v8, %v1954_v23  ;;  %v3807_v6 = vcombine.low %v5671_v15, %v5689_v48  ;;  %v3799_v21 = vcombine.low %v5703_v34, %v5714_v37  ;;  %v1060_v19 = vsel %vm1036_vm6, %v3531_v49, %v5746_v36  ;;  %v4079_v23 = vld [vmem:[%s6101_s1 + $0x18] sm:$0xff]   ;;  %v4179_v8 = vld [vmem:[%s4336_s5 + $0x24] sm:$0xf] }
 0x15b   : > { %v1101_v4 = vsel %vm1085_vm7, %v1060_v19, %v1019_v42  ;;  %v3800_v41 = vcombine.low %v4171_v61, %v4172_v60  ;;  %v4254_v36 = vmov 0   ;;  %v1978_v17 = vsel %vm1036_vm6, %v3659_v46, %v5779_v0  ;;  %v4174_v42 = vld [vmem:[%s4336_s5 + $0x1c] sm:$0xf] }
 0x15c   : > { %4028 = vset.pattern.permute.xlu1 %v4254_v36  ;;  %4027 = vset.pattern.permute.xlu0 %v4254_v36  ;;  %v2018_v26 = vsel %vm1085_vm7, %v1978_v17, %v1938_v5  ;;  %v2172_v11 = vsel %vm2050_vm8, %v1101_v4, 0  ;;  %v3792_v30 = vcombine.low %v4173_v57, %v4174_v42  ;;  %v3273_v0 = vld [vmem:[%s6102_s2 + $0x18] sm:$0xff]  ;;  %v4175_v5 = vld [vmem:[%s6101_s1] sm:$0xff]   ;;  %v5940_v4 = vld [vmem:[%s6101_s1 + $0x28] sm:$0xff]  }
 0x15d   : > { %3281 = vperm.xlu1 %4028, %v3271_v32   ;;  %3276 = vperm.xlu0 %4027, %v3270_v56   ;;  %v2071_v29 = vsel %vm2050_vm8, %v2018_v26, 0  ;;  %v3305_v49 = vld [vmem:[%s6103_s3 + $0x18] sm:$0xff]  ;;  %v4183_v26 = vld [vmem:[%s4336_s5 + $0x30] sm:$0xf] }
 0x15e   : > { %3891 = vmatpush3.bf16.xpose.msra.mxu0 %v2170_v12  ;;  %v2981_v62 = vpop.permute.xlu1 %2980  ;;  %v4176_v12 = vld [vmem:[%s4336_s5 + $0x84] sm:$0xf] }
 0x15f   : > { %3965 = vmatprep.subr.msk.bf16.mxu0 %vm2050_vm8, %v1117_v47  ;;  %3871 = vmatpush3.bf16.xpose.msra.mxu1 %v2069_v53  ;;  %v3102_v24 = vsel %vm1036_vm6, %v3800_v41, %v2981_v62  ;;  %v3801_v22 = vcombine.low %v4176_v12, %v4177_v33  ;;  %v4178_v53 = vld [vmem:[%s6101_s1 + $0x10] sm:$0xff]   ;;  %v4180_v47 = vld [vmem:[%s4336_s5 + $0x28] sm:$0xf]  ;;  %v5931_v62 = vld [vmem:[%s6101_s1 + $0x20] sm:$0xff]  }
 0x160   : > { %v2965_v43 = vpop.permute.xlu0 %2964  ;;  %3957 = vmatprep.subr.msk.bf16.mxu1 %vm2050_vm8, %v2034_v9  ;;  %v3793_v50 = vcombine.low %v4179_v8, %v4180_v47  ;;  %v4181_v41 = vld [vmem:[%s4336_s5 + $0x90] sm:$0xf]  ;;  %v6119_v47 = vld [vmem:[#allocation6_spill] sm:$0xff] }
 0x161   : > { %3286 = vperm.xlu1 %4028, %v3272_v7   ;;  %v3078_v40 = vsel %vm1036_vm6, %v3792_v30, %v2965_v43  ;;  %3291 = vperm.xlu0 %4027, %v3273_v0   ;;  %v4182_v43 = vld [vmem:[%s4336_s5 + $0x94] sm:$0xf] }
 0x162   : > { %v3802_v36 = vcombine.low %v4181_v41, %v4182_v43  ;;  %v6118_v8 = vld [vmem:[#allocation7_spill] sm:$0xff] }
 0x163   : > { %v3061_v18 = vpop.permute.xlu1 %3060 }
 0x164   : > { %v3141_v28 = vsel %vm1085_vm7, %v3102_v24, %v3061_v18  ;;  %v3045_v58 = vpop.permute.xlu0 %3044 }
 0x165   : > { %v3125_v59 = vsel %vm1085_vm7, %v3078_v40, %v3045_v58  ;;  %3308 = vperm.xlu1 %4028, %v3302_v14   ;;  %3313 = vperm.xlu0 %4027, %v3303_v52   ;;  %v4185_v58 = vld [vmem:[%s4336_s5 + $0x9c] sm:$0xf]  ;;  %v4186_v40 = vld [vmem:[%s4336_s5 + $0xa0] sm:$0xf] }
 0x166   : > { %3893 = vmatpush3.bf16.xpose.msra.mxu0 %v2172_v11  ;;  %v3177_v38 = vsel %vm2050_vm8, %v3125_v59, 0  ;;  %v4184_v11 = vld [vmem:[%s4336_s5 + $0x34] sm:$0xf]  ;;  %v3803_v14 = vcombine.low %v4185_v58, %v4186_v40  ;;  %v4187_v52 = vld [vmem:[%s4336_s5 + $0x3c] sm:$0xf]  ;;  %s188_s5 = sand.u32 1, %s4242_s16  }
 0x167   : > { %3966 = vmatprep.subr.msk.bf16.mxu0 %vm2050_vm8, %v3141_v28  ;;  %3873 = vmatpush3.bf16.xpose.msra.mxu1 %v2071_v29  ;;  %v3794_v57 = vcombine.low %v4183_v26, %v4184_v11  ;;  %s3506_s8 = sshll.u32 %s188_s5, 5  ;;  %s6059_s19 = scalar_lea.sflag [#allocation3], %s188_s5 }
 0x168   : > { %3967 = vmatprep.subr.msk.bf16.mxu1 %vm2050_vm8, %v3141_v28  ;;  %s190_s10 = scalar_lea.vmem [#allocation2], %s3506_s8 }
 0x169   : > { %3318 = vperm.xlu1 %4028, %v3304_v31   ;;  %3323 = vperm.xlu0 %4027, %v3305_v49   ;;  %s3440_s11 = sshll.u32 %s190_s10, 4  ;;  %s6055_s11 = int_to_ptr.vmem [resolvable:$true] %s3440_s11 }
 0x16a   : > { %s4188_s20 = scalar_lea.vmem %s6055_s11, 512  ;;  %p4195_p0 = scmp.lt.s32.totalorder %s6055_s11, %s4193_s23 }
 0x16b   : > { %p4189_p11 = scmp.ne.s32.totalorder %s6055_s11, %s4188_s20  ;;  %p4196_p1 = scmp.lt.s32.totalorder %s4194_s27, %s4188_s20 }
 0x16d   : > { %3895 = vmatmul.mubr.msk.bf16.vlgmr.msra.gmra.mrb[0].mxu0 %vm2050_vm8, %v4175_v5  ;;  %p4190_p12 = pnand %p4189_p11, %p4321_p5  ;;  %p4197_p2 = por %p4196_p1, %p4195_p0 }
 0x16e   : > { %3899 = vmatpush3.bf16.xpose.msra.mxu0 %v3177_v38  ;;  %v2983_v20 = vpop.permute.xlu1 %2982  ;;  %3896 = vmatprep.mubr.msk.bf16.mxu0 %vm2050_vm8, %v4080_v63 }
 0x16f   : > { %3875 = vmatmul.mubr.msk.bf16.vlgmr.msra.gmra.mrb[0].mxu1 %vm2050_vm8, %v4178_v53  ;;  %v2967_v27 = vpop.permute.xlu0 %2966  ;;  %v3105_v46 = vsel %vm1036_vm6, %v3801_v22, %v2983_v20  ;;  %p4191_p13 = pneg %p4190_p12 }
 0x170   : > { %3926 = vmatpush3.bf16.xpose.msra.mxu1 %v3177_v38  ;;  %3876 = vmatprep.mubr.msk.bf16.mxu1 %vm2050_vm8, %v4079_v23  ;;  %v3081_v32 = vsel %vm1036_vm6, %v3793_v50, %v2967_v27  ;;  %v3796_v50 = vcombine.low %v6119_v47, %v6118_v8 }
 0x171   : > { %p4198_p3 = pnand %p4197_p2, %p4191_p13 }
 0x172   : > { %v3063_v9 = vpop.permute.xlu1 %3062 }
 0x173   : > { %v3143_v19 = vsel %vm1085_vm7, %v3105_v46, %v3063_v9  ;;  %v3047_v56 = vpop.permute.xlu0 %3046 }
 0x174   : > { %3968 = vmatprep.subr.msk.bf16.mxu0 %vm2050_vm8, %v3143_v19  ;;  %3969 = vmatprep.subr.msk.bf16.mxu1 %vm2050_vm8, %v3143_v19  ;;  %v3127_v61 = vsel %vm1085_vm7, %v3081_v32, %v3047_v56 }
 0x175   : > { %3897 = vmatmul.mubr.msk.bf16.gmra.mrb[4].mxu0 %vm2050_vm8, %v4080_v63  ;;  %v3179_v60 = vsel %vm2050_vm8, %v3127_v61, 0  ;;  %v3795_v63 = vcombine.low %v4187_v52, %v5387_v2  ;;  %v6117_v2 = vld [vmem:[#allocation5_spill] sm:$0xff] }
 0x176   : > { %3914 = vmatprep.mubr.msk.bf16.mxu0 %vm2050_vm8, %v5931_v62  ;;  %3901 = vmatpush3.bf16.xpose.msra.mxu0 %v3179_v60  ;;  %v3804_v49 = vcombine.low %v6117_v2, %v5437_v44 }
 0x177   : > { %3877 = vmatmul.mubr.msk.bf16.gmra.mrb[4].mxu1 %vm2050_vm8, %v4079_v23 }
 0x178   : > { %3927 = vmatpush3.bf16.xpose.msra.mxu1 %v3179_v60  ;;  %3916 = vmatprep.mubr.msk.bf16.mxu1 %vm2050_vm8, %v5940_v4 }
 0x17a   : > { %v2985_v17 = vpop.permute.xlu1 %2984 }
 0x17b   : > { %v3108_v30 = vsel %vm1036_vm6, %v3802_v36, %v2985_v17 }
 0x17c   : > { %v2969_v42 = vpop.permute.xlu0 %2968 }
 0x17d   : > { %v3084_v18 = vsel %vm1036_vm6, %v3794_v57, %v2969_v42 }
 0x17e   : > { %v3065_v7 = vpop.permute.xlu1 %3064 }
 0x17f   : > { %v3145_v24 = vsel %vm1085_vm7, %v3108_v30, %v3065_v7 }
 0x180   : > { %v3049_v0 = vpop.permute.xlu0 %3048  ;;  %3970 = vmatprep.subr.msk.bf16.mxu0 %vm2050_vm8, %v3145_v24  ;;  %3971 = vmatprep.subr.msk.bf16.mxu1 %vm2050_vm8, %v3145_v24 }
 0x181   : > { %v3129_v29 = vsel %vm1085_vm7, %v3084_v18, %v3049_v0 }
 0x182   : > { %v3181_v28 = vsel %vm2050_vm8, %v3129_v29, 0 }
 0x183   : > { %3903 = vmatpush3.bf16.xpose.msra.mxu0 %v3181_v28  ;;  %3928 = vmatpush3.bf16.xpose.msra.mxu1 %v3181_v28 }
 0x188   : > { %v2987_v59 = vpop.permute.xlu1 %2986 }
 0x189   : > { %v3111_v23 = vsel %vm1036_vm6, %v3803_v14, %v2987_v59 }
 0x18b   : > { %v2971_v38 = vpop.permute.xlu0 %2970 }
 0x18c   : > { %v3067_v31 = vpop.permute.xlu1 %3066  ;;  %v3087_v12 = vsel %vm1036_vm6, %v3795_v63, %v2971_v38 }
 0x18d   : > { %v3147_v5 = vsel %vm1085_vm7, %v3111_v23, %v3067_v31 }
 0x18e   : > { %3972 = vmatprep.subr.msk.bf16.mxu0 %vm2050_vm8, %v3147_v5  ;;  %3973 = vmatprep.subr.msk.bf16.mxu1 %vm2050_vm8, %v3147_v5 }
 0x18f   : > { %v3051_v33 = vpop.permute.xlu0 %3050 }
 0x190   : > { %v3131_v22 = vsel %vm1085_vm7, %v3087_v12, %v3051_v33 }
 0x191   : > { %v3183_v20 = vsel %vm2050_vm8, %v3131_v22, 0 }
 0x192   : > { %3905 = vmatpush3.bf16.xpose.msra.mxu0 %v3183_v20  ;;  %3929 = vmatpush3.bf16.xpose.msra.mxu1 %v3183_v20 }
 0x195   : > { %v2989_v53 = vpop.permute.xlu1 %2988 }
 0x196   : > { %v3114_v46 = vsel %vm1036_vm6, %v3804_v49, %v2989_v53 }
 0x198   : > { %v2973_v27 = vpop.permute.xlu0 %2972 }
 0x199   : > { %v3069_v9 = vpop.permute.xlu1 %3068  ;;  %v3090_v32 = vsel %vm1036_vm6, %v3796_v50, %v2973_v27 }
 0x19a   : > { %v3149_v19 = vsel %vm1085_vm7, %v3114_v46, %v3069_v9 }
 0x19b   : > { %3974 = vmatprep.subr.msk.bf16.mxu0 %vm2050_vm8, %v3149_v19  ;;  %3975 = vmatprep.subr.msk.bf16.mxu1 %vm2050_vm8, %v3149_v19 }
 0x19c   : > { %v3053_v56 = vpop.permute.xlu0 %3052 }
 0x19d   : > { %v3133_v61 = vsel %vm1085_vm7, %v3090_v32, %v3053_v56 }
 0x19e   : > { %v3185_v44 = vsel %vm2050_vm8, %v3133_v61, 0 }
 0x19f   : > { %3907 = vmatpush3.bf16.xpose.msra.mxu0 %v3185_v44  ;;  %3930 = vmatpush3.bf16.xpose.msra.mxu1 %v3185_v44 }
 0x1a3   : > { %v2991_v60 = vpop.permute.xlu1 %2990 }
 0x1a4   : > { %v3117_v43 = vsel %vm1036_vm6, %v3805_v3, %v2991_v60 }
 0x1a7   : > { %v2975_v41 = vpop.permute.xlu0 %2974  ;;  %v3071_v36 = vpop.permute.xlu1 %3070 }
 0x1a8   : > { %v3151_v17 = vsel %vm1085_vm7, %v3117_v43, %v3071_v36  ;;  %v3093_v26 = vsel %vm1036_vm6, %v3797_v55, %v2975_v41 }
 0x1a9   : > { %3976 = vmatprep.subr.msk.bf16.mxu0 %vm2050_vm8, %v3151_v17  ;;  %3977 = vmatprep.subr.msk.bf16.mxu1 %vm2050_vm8, %v3151_v17 }
 0x1ab   : > { %v3055_v11 = vpop.permute.xlu0 %3054 }
 0x1ac   : > { %v3135_v57 = vsel %vm1085_vm7, %v3093_v26, %v3055_v11 }
 0x1ad   : > { %v3187_v42 = vsel %vm2050_vm8, %v3135_v57, 0 }
 0x1ae   : > { %3909 = vmatpush3.bf16.xpose.msra.mxu0 %v3187_v42  ;;  %3931 = vmatpush3.bf16.xpose.msra.mxu1 %v3187_v42 }
 0x1b1   : > { %v2993_v45 = vpop.permute.xlu1 %2992 }
 0x1b2   : > { %v3120_v3 = vsel %vm1036_vm6, %v3806_v25, %v2993_v45 }
 0x1b4   : > { %v2977_v1 = vpop.permute.xlu0 %2976 }
 0x1b5   : > { %v3073_v30 = vpop.permute.xlu1 %3072  ;;  %v3096_v16 = vsel %vm1036_vm6, %v3798_v10, %v2977_v1 }
 0x1b6   : > { %v3153_v7 = vsel %vm1085_vm7, %v3120_v3, %v3073_v30 }
 0x1b7   : > { %3978 = vmatprep.subr.msk.bf16.mxu0 %vm2050_vm8, %v3153_v7  ;;  %3979 = vmatprep.subr.msk.bf16.mxu1 %vm2050_vm8, %v3153_v7 }
 0x1b8   : > { %v3057_v39 = vpop.permute.xlu0 %3056 }
 0x1b9   : > { %v3137_v55 = vsel %vm1085_vm7, %v3096_v16, %v3057_v39 }
 0x1ba   : > { %v3189_v24 = vsel %vm2050_vm8, %v3137_v55, 0 }
 0x1bb   : > { %3911 = vmatpush3.bf16.xpose.msra.mxu0 %v3189_v24  ;;  %3932 = vmatpush3.bf16.xpose.msra.mxu1 %v3189_v24 }
 0x1bf   : > { %v2995_v51 = vpop.permute.xlu1 %2994 }
 0x1c0   : > { %v3123_v25 = vsel %vm1036_vm6, %v3807_v6, %v2995_v51 }
 0x1c3   : > { %v2979_v35 = vpop.permute.xlu0 %2978  ;;  %v3075_v18 = vpop.permute.xlu1 %3074 }
 0x1c4   : > { %v3155_v0 = vsel %vm1085_vm7, %v3123_v25, %v3075_v18  ;;  %v3099_v54 = vsel %vm1036_vm6, %v3799_v21, %v2979_v35 }
 0x1c5   : > { %3980 = vmatprep.subr.msk.bf16.mxu0 %vm2050_vm8, %v3155_v0  ;;  %3981 = vmatprep.subr.msk.bf16.mxu1 %vm2050_vm8, %v3155_v0 }
 0x1c7   : > { %v3059_v13 = vpop.permute.xlu0 %3058 }
 0x1c8   : > { %v3139_v10 = vsel %vm1085_vm7, %v3099_v54, %v3059_v13 }
 0x1c9   : > { %v3191_v29 = vsel %vm2050_vm8, %v3139_v10, 0 }
 0x1ca   : > { %3913 = vmatpush3.bf16.xpose.msra.mxu0 %v3191_v29  ;;  %3933 = vmatpush3.bf16.xpose.msra.mxu1 %v3191_v29 }
 0x1d1   : > { %3915 = vmatmul.mubr.msk.bf16.vlgmr.msra.gmra.mrb[0].mxu0 %vm2050_vm8, %v5931_v62  ;;  %3917 = vmatmul.mubr.msk.bf16.vlgmr.msra.gmra.mrb[8].mxu1 %vm2050_vm8, %v5940_v4 }
 0x1dc   : > { %v3282_v62 = vpop.permute.xlu1 %3281  ;;  %v3277_v5 = vpop.permute.xlu0 %3276 }
 0x1e0   : > { %v3287_v12 = vpop.permute.xlu1 %3286  ;;  %v3292_v4 = vpop.permute.xlu0 %3291 }
 0x1e4   : > { %v3309_v33 = vpop.permute.xlu1 %3308  ;;  %v3314_v22 = vpop.permute.xlu0 %3313 }
 0x1e8   : > { %v3319_v57 = vpop.permute.xlu1 %3318  ;;  %v3324_v42 = vpop.permute.xlu0 %3323 }
 0x242   : > { %v2123_v15 = vpop.f32.mrb[0].mxu1 }
 0x243   : > { %v2125_v48 = vpop.f32.mrb[1].mxu1 }
 0x244   : > { %v2127_v6 = vpop.f32.mrb[2].mxu1 }
 0x245   : > { %v2129_v28 = vpop.f32.mrb[3].mxu1 }
 0x248   : > { %v2234_v34 = vpop.f32.mrb[4].mxu0 }
 0x249   : > { %v2236_v37 = vpop.f32.mrb[5].mxu0 }
 0x24a   : > { %v2133_v21 = vpop.f32.mrb[4].mxu1  ;;  %v2238_v58 = vpop.f32.mrb[6].mxu0 }
 0x24b   : > { %v2235_v40 = vadd.f32 %v2234_v34, %v2133_v21  ;;  %v2135_v14 = vpop.f32.mrb[5].mxu1  ;;  %v2240_v59 = vpop.f32.mrb[7].mxu0 }
 0x24c   : > { %v2237_v52 = vadd.f32 %v2236_v37, %v2135_v14  ;;  %v2137_v63 = vpop.f32.mrb[6].mxu1 }
 0x24d   : > { %v2239_v38 = vadd.f32 %v2238_v58, %v2137_v63  ;;  %v2139_v23 = vpop.f32.mrb[7].mxu1 }
 0x24e   : > { %v2241_v31 = vadd.f32 %v2240_v59, %v2139_v23 }
 0x2a4   : > { %v3243_v20 = vpop.f32.mrb[0].mxu0  ;;  %v3253_v2 = vpop.f32.mrb[8].mxu1 }
 0x2a5   : > { %v3934_v49 = vadd.f32 %v3243_v20, %v2123_v15  ;;  %v3266_v53 = vadd.f32 %v3253_v2, %v2235_v40  ;;  %v3245_v8 = vpop.f32.mrb[1].mxu0  ;;  %v3255_v47 = vpop.f32.mrb[9].mxu1 }
 0x2a6   : > { %v3935_v50 = vadd.f32 %v3245_v8, %v2125_v48  ;;  %v3267_v27 = vadd.f32 %v3255_v47, %v2237_v52  ;;  %v3247_v46 = vpop.f32.mrb[2].mxu0  ;;  %v3257_v9 = vpop.f32.mrb[10].mxu1 }
 0x2a7   : > { %v3294_v19 = vmul.f32 %v3934_v49, %v3277_v5  ;;  %v3298_v32 = vmul.f32 %v3287_v12, %v3266_v53  ;;  %v3936_v56 = vadd.f32 %v3247_v46, %v2127_v6  ;;  %v3268_v61 = vadd.f32 %v3257_v9, %v2239_v38  ;;  %v3249_v44 = vpop.f32.mrb[3].mxu0  ;;  %v3259_v60 = vpop.f32.mrb[11].mxu1 }
 0x2a8   : > { %v3295_v41 = vmul.f32 %v3935_v50, %v3277_v5  ;;  %v3299_v43 = vmul.f32 %v3287_v12, %v3267_v27  ;;  %v3937_v36 = vadd.f32 %v3249_v44, %v2129_v28  ;;  %v3269_v17 = vadd.f32 %v3259_v60, %v2241_v31 }
 0x2a9   : > { %v3296_v26 = vmul.f32 %v3936_v56, %v3282_v62  ;;  %v3300_v11 = vmul.f32 %v3292_v4, %v3268_v61  ;;  %v3326_v3 = vadd.f32 %v3309_v33, %v3294_v19  ;;  %v3330_v30 = vadd.f32 %v3319_v57, %v3298_v32 }
 0x2aa   : > { %v3297_v45 = vmul.f32 %v3937_v36, %v3282_v62  ;;  %v3301_v1 = vmul.f32 %v3292_v4, %v3269_v17  ;;  %v3327_v39 = vadd.f32 %v3309_v33, %v3295_v41  ;;  %v3331_v55 = vadd.f32 %v3319_v57, %v3299_v43 }
 0x2ab   : > { %v3328_v7 = vadd.f32 %v3314_v22, %v3296_v26  ;;  %v3332_v16 = vadd.f32 %v3324_v42, %v3300_v11 }
 0x2ac   : > { %v3329_v24 = vadd.f32 %v3314_v22, %v3297_v45  ;;  %v3333_v51 = vadd.f32 %v3324_v42, %v3301_v1 }
 0x2ad   : > { %v6026_v35 = vpack.c.bf16 %v3328_v7, %v3326_v3  ;;  %v6028_v25 = vpack.c.bf16 %v3332_v16, %v3330_v30 }
 0x2ae   : > { %v6030_v18 = vpack.c.bf16 %v3329_v24, %v3327_v39  ;;  %v6032_v0 = vpack.c.bf16 %v3333_v51, %v3331_v55 }
 0x2af   : > { %v3338_v54 = vand.u32 2147450879, %v6026_v35  ;;  %v3340_v13 = vand.u32 2147450879, %v6028_v25  ;;  %vm3358_vm9 = vcmp.ge.bf16.partialorder %v6026_v35, 0  ;;  %vm3360_vm10 = vcmp.ge.bf16.partialorder %v6028_v25, 0 }
 0x2b0   : > { %v3339_v10 = vand.u32 2147450879, %v6030_v18  ;;  %v3341_v29 = vand.u32 2147450879, %v6032_v0  ;;  %vm3359_vm11 = vcmp.ge.bf16.partialorder %v6030_v18, 0  ;;  %vm3361_vm12 = vcmp.ge.bf16.partialorder %v6032_v0, 0 }
 0x2b1   : > { %v3342_v15 = vsub.bf16 0, %v3338_v54  ;;  %v3344_v48 = vsub.bf16 0, %v3340_v13 }
 0x2b2   : > { %v3343_v6 = vsub.bf16 0, %v3339_v10  ;;  %v3345_v28 = vsub.bf16 0, %v3341_v29 }
 0x2b3   : > { %v3347_v34 = vmul.bf16 1069105081, %v3342_v15  ;;  %v3353_v37 = vmul.bf16 1069105081, %v3344_v48 }
 0x2b4   : > { %v3350_v21 = vmul.bf16 1069105081, %v3343_v6  ;;  %v3356_v58 = vmul.bf16 1069105081, %v3345_v28 }
 0x2b5   : > { %4083 = vpow.bf16 %v3347_v34 }
 0x2b6   : > { %4085 = vpow.bf16 %v3353_v37 }
 0x2b7   : > { %4087 = vpow.bf16 %v3350_v21 }
 0x2b8   : > { %4089 = vpow.bf16 %v3356_v58 }
 0x2c0   : > { %v4084_v40 = vpop.eup %4083 }
 0x2c1   : > { %v4086_v14 = vpop.eup %4085  ;;  %v3366_v59 = vunpack.c.l.bf16 %v4084_v40  ;;  %v3368_v52 = vunpack.c.h.bf16 %v4084_v40  ;;  %v3362_v46 = vsel %vm3358_vm9, 1065369472, %v4084_v40 }
 0x2c2   : > { %v4088_v63 = vpop.eup %4087  ;;  %v3370_v38 = vunpack.c.l.bf16 %v4086_v14  ;;  %v3372_v23 = vunpack.c.h.bf16 %v4086_v14  ;;  %v3364_v56 = vsel %vm3360_vm10, 1065369472, %v4086_v14  ;;  %v3390_v60 = vmul.bf16 %v3362_v46, %v6026_v35 }
 0x2c3   : > { %v4090_v31 = vpop.eup %4089  ;;  %v3374_v62 = vadd.f32 1.0, %v3366_v59  ;;  %v3376_v5 = vadd.f32 1.0, %v3368_v52  ;;  %v3367_v33 = vunpack.c.l.bf16 %v4088_v63  ;;  %v3369_v22 = vunpack.c.h.bf16 %v4088_v63 }
 0x2c4   : > { %v3378_v12 = vadd.f32 1.0, %v3370_v38  ;;  %v3380_v4 = vadd.f32 1.0, %v3372_v23  ;;  %v3371_v20 = vunpack.c.l.bf16 %v4090_v31  ;;  %v3373_v53 = vunpack.c.h.bf16 %v4090_v31 }
 0x2c5   : > { %4091 = vrcp.f32 %v3374_v62  ;;  %v3375_v2 = vadd.f32 1.0, %v3367_v33  ;;  %v3377_v49 = vadd.f32 1.0, %v3369_v22  ;;  %v3363_v61 = vsel %vm3359_vm11, 1065369472, %v4088_v63 }
 0x2c6   : > { %4093 = vrcp.f32 %v3376_v5  ;;  %v3379_v8 = vadd.f32 1.0, %v3371_v20  ;;  %v3381_v47 = vadd.f32 1.0, %v3373_v53  ;;  %v3365_v36 = vsel %vm3361_vm12, 1065369472, %v4090_v31 }
 0x2c7   : > { %4095 = vrcp.f32 %v3378_v12  ;;  %v3392_v11 = vmul.bf16 %v3364_v56, %v6028_v25  ;;  %v3391_v57 = vmul.bf16 %v3363_v61, %v6030_v18  ;;  %v3393_v30 = vmul.bf16 %v3365_v36, %v6032_v0 }
 0x2c8   : > { %4097 = vrcp.f32 %v3380_v4 }
 0x2c9   : > { %4099 = vrcp.f32 %v3375_v2 }
 0x2ca   : > { %4101 = vrcp.f32 %v3377_v49 }
 0x2cb   : > { %4103 = vrcp.f32 %v3379_v8 }
 0x2cc   : > { %4105 = vrcp.f32 %v3381_v47 }
 0x2cf   : > { %v4092_v50 = vpop.eup %4091 }
 0x2d0   : > { %v4094_v27 = vpop.eup %4093 }
 0x2d1   : > { %v4096_v9 = vpop.eup %4095  ;;  %v3394_v19 = vpack.c.bf16 %v4094_v27, %v4092_v50 }
 0x2d2   : > { %v4098_v32 = vpop.eup %4097 }
 0x2d3   : > { %v4100_v44 = vpop.eup %4099  ;;  %v3396_v41 = vpack.c.bf16 %v4098_v32, %v4096_v9  ;;  %v3398_v26 = vmul.bf16 %v3394_v19, %v3390_v60 }
 0x2d4   : > { %v4102_v43 = vpop.eup %4101 }
 0x2d5   : > { %v4104_v17 = vpop.eup %4103  ;;  %v3395_v42 = vpack.c.bf16 %v4102_v43, %v4100_v44  ;;  %v3400_v1 = vmul.bf16 %v3396_v41, %v3392_v11 }
 0x2d6   : > { %v4106_v45 = vpop.eup %4105 }
 0x2d7   : > { %v3399_v3 = vmul.bf16 %v3395_v42, %v3391_v57  ;;  %v3397_v7 = vpack.c.bf16 %v4106_v45, %v4104_v17 }
 0x2d9   : > { %v3848_v16 = vcombine.low %v3398_v26, %v3399_v3  ;;  %v3849_v39 = vcombine.high %v3398_v26, %v3399_v3  ;;  %v3401_v55 = vmul.bf16 %v3397_v7, %v3393_v30 }
 0x2db   : > { %3422 = vst [vmem:[%s190_s10] sm:$0xff] %v3848_v16  ;;  %3423 = vst [vmem:[%s190_s10 + $0x8] sm:$0xff] %v3849_v39  ;;  %v3850_v24 = vcombine.low %v3400_v1, %v3401_v55  ;;  %v3851_v51 = vcombine.high %v3400_v1, %v3401_v55 }
 0x2dd   : > { %3424 = vst [vmem:[%s190_s10 + $0x10] sm:$0xff] %v3850_v24  ;;  %3425 = vst [vmem:[%s190_s10 + $0x18] sm:$0xff] %v3851_v51 }
 0x2de   : > { %4201 = shalt.err (!%p4198_p3)
}
 0x2df   : > { %s4202_s28 = scalar_lea.hbm %s6053_s14, 512  ;;  %s4206_s6 = scalar_lea.hbm %s6104_s4, 1024 }
 0x2e0   : > { %p4203_p4 = scmp.ne.s32.totalorder %s6053_s14, %s4202_s28  ;;  %p4207_p9 = scmp.lt.u32.totalorder %s6053_s14, %s6104_s4 }
 0x2e1   : > { %p4208_p10 = scmp.lt.u32.totalorder %s4206_s6, %s4202_s28  ;;  %p4210_p12 = scmp.lt.u32.totalorder %s4202_s28, %s6053_s14 }
 0x2e2   : > { %p4204_p7 = pnand %p4203_p4, %p4321_p5 }
 0x2e3   : > { %p4209_p11 = por %p4208_p10, %p4207_p9 }
 0x2e4   : > { %p4205_p8 = pneg %p4204_p7 }
 0x2e5   : > { %p4211_p13 = por %p4210_p12, %p4209_p11 }
 0x2e7   : > { %p4212_p0 = pnand %p4211_p13, %p4205_p8 }
 0x2e9   : > { %4215 = shalt.err (!%p4212_p0)
}
 0x2ea   : > { %s4256_s8 = smov 128   ;;  %s4257_s9 = smov 8  }
 0x2eb   : > { %3983 = dma.vmem_to_hbm [thread:$0]  (%p4321_p5), %s6055_s11, 512, %s6053_s14, %s6059_s19, %s4256_s8, %s4256_s8, %s4257_s9  }
 0x2ec PF: > { %p3989_p1 = scmp.ge.s32.totalorder %s4250_s18, 2  ;;  %s3455_s10 = sand.u32 1, %s4238_s15  }
 0x2ed   : > { %s3456_s12 = scalar_lea.sflag [#allocation3], %s3455_s10 }
 0x2ee   : > { %p3986_p2 = pnand %p3989_p1, %p4325_p6 }
 0x2f0   : > { %4233 = dma.done.wait (!%p3986_p2), %s3456_s12, 512  }
 0x2f1   : > { %4235 = vsyncadd (!%p3986_p2), %s3456_s12, 4294966784  ;;  %p14_p3 = scmp.ge.s32.totalorder %s4308_s21, 4   ;;  %s6120_s15 = smov %s4242_s16 }
 0x2f2   : > { %s6121_s16 = smov %s4246_s17  ;;  %s6122_s17 = smov %s4319_s24 }
 0x2f3   : > { %s6123_s18 = smov %s4308_s21  ;;  %16 = sbr.rel (!%p14_p3) target bundleno = 3 (0x3), region = 75 }
 0x2fa   :  { %3461 = vsyncpa [#allocation3], 1 }
 0x2fb   :  { %3463 = vsyncpa [#allocation3 + $0x1], 1 }

</bundles_post_ra>
